<compile_context>
chip_gen: v7x
topology: tpu7x:2x2x1
jax: 0.10.0
libtpu: 0.0.40
codegen_flags: <defaults>
</compile_context>

<pallas_src>
import functools

import jax
import jax.numpy as jnp
from jax.experimental import pallas as pl
from jax.experimental.pallas import tpu as pltpu

KSIZE = 4
STRIDE = 2
PAD = 1
NEG_SLOPE = 0.2
BN_EPS = 1e-5

LANE = 128
TM_MAX = 1024              # lanes (output grid positions) per row tile
BN_FUSE_MAX_LANES = 4096   # fuse BN into the epilogue if the whole grid fits one tile
VMEM_LIMIT = 32 * 1024 * 1024


def _round_up(x, m):
    return -(-x // m) * m


def _cdiv(a, b):
    return -(-a // b)


def _shift_offsets(ho, wo):
    # flat-grid offset of shift (sd, sh, sw) on the (Do+1, Ho+1, Wo+1) grid
    sh, sw = (ho + 1) * (wo + 1), (wo + 1)
    return tuple(sd * sh + s_h * sw + s_w
                 for sd in (0, 1) for s_h in (0, 1) for s_w in (0, 1))


def _pick_tiles(g, max_off):
    gpad = _round_up(g, LANE)
    tm_min = _round_up(max_off + 1, LANE)      # halo must fit inside one tile
    cap = max(TM_MAX, tm_min)
    n_tiles = _cdiv(gpad, cap)
    tm = max(_round_up(_cdiv(gpad, n_tiles), LANE), tm_min)
    n_tiles = _cdiv(gpad, tm)
    return n_tiles, tm


# ----------------------------- Pallas kernels ------------------------------

def _conv_body(w_ref, a_cur_ref, a_nxt_ref, b_ref, offsets, tm):
    """y (cp, tm) f32 = bias + sum_s W_s @ A[:, off_s : off_s + tm]."""
    a = jnp.concatenate([a_cur_ref[...], a_nxt_ref[...]], axis=1)   # (kc, 2*tm)
    acc = None
    for s, off in enumerate(offsets):
        part = jnp.dot(w_ref[s], a[:, off:off + tm],
                       preferred_element_type=jnp.float32)
        acc = part if acc is None else acc + part
    return acc + b_ref[...]


def _bn_lrelu_val(y, msk, m_valid):
    """Training-mode BatchNorm (masked biased batch stats) + leaky_relu(0.2)."""
    inv_m = 1.0 / float(m_valid)
    mean = jnp.sum(y * msk, axis=1, keepdims=True) * inv_m
    diff = y - mean
    var = jnp.sum(diff * diff * msk, axis=1, keepdims=True) * inv_m
    y = diff * jax.lax.rsqrt(var + BN_EPS)                  # rsqrt -> EUP slot
    return jnp.where(y > 0, y, NEG_SLOPE * y)


def _conv_kernel(w_ref, a_cur_ref, a_nxt_ref, b_ref, mask_ref, o_ref, *,
                 offsets, mode, m_valid):
    """One lane tile of a conv layer.

    w_ref:    (8, cp, kc) bf16  per-shift weight matrices (kc = 8*Cin)
    a_cur:    (kc, tm)    bf16  pair-grid activations for this tile
    a_nxt:    (kc, tm)    bf16  next column tile (halo for the shifted reads)
    b_ref:    (cp, 1)     f32
    mask_ref: (1, tm)     f32   1.0 on valid output-grid lanes (BN only)
    o_ref:    (cp, tm)          lane-dense output tile
    """
    tm = o_ref.shape[-1]
    y = _conv_body(w_ref, a_cur_ref, a_nxt_ref, b_ref, offsets, tm)
    if mode == "lrelu":
        y = jnp.where(y > 0, y, NEG_SLOPE * y)
    elif mode == "bn_lrelu":
        y = _bn_lrelu_val(y, mask_ref[...], m_valid)
    o_ref[...] = y.astype(o_ref.dtype)


def _conv_bn_head_kernel(w_ref, a_cur_ref, a_nxt_ref, b_ref, mask_ref,
                         w5_ref, b5_ref, o5_ref, *, offsets, m_valid, n_batch):
    """Layer 4 (conv + BN + lrelu) fused with layer 5.

    At these shapes layer 5 produces one voxel per sample, so it collapses to a
    per-sample weighted sum over h4; w5_ref (n, cp, tm) holds that weight map
    (zero on invalid lanes / padded rows).  o5_ref: (1, 128) f32.
    """
    tm = mask_ref.shape[-1]
    y = _conv_body(w_ref, a_cur_ref, a_nxt_ref, b_ref, offsets, tm)
    y = _bn_lrelu_val(y, mask_ref[...], m_valid)             # h4, (cp, tm) f32
    lanes = o5_ref.shape[-1]
    lane = jax.lax.broadcasted_iota(jnp.int32, (1, lanes), 1)
    out = jnp.zeros((1, lanes), jnp.float32)
    for nb in range(n_batch):
        s = jnp.sum(jnp.sum(y * w5_ref[nb], axis=1, keepdims=True),
                    axis=0, keepdims=True)                    # (1, 1)
        out = out + jnp.where(lane == nb, s, 0.0)
    o5_ref[...] = out + b5_ref[...]


# ------------------------------ XLA glue / layers ---------------------------

def _prep_parity(act):
    """(C, N, D, H, W) -> pair-grid matrix A (8*C, G) bf16, G = N*(Do+1)*(Ho+1)*(Wo+1).

    Rows ordered (pd, ph, pw, c); columns flat over (n, qd, qh, qw)."""
    c, n, d, h, w = act.shape
    assert d % 2 == 0 and h % 2 == 0 and w % 2 == 0
    do, ho, wo = d // 2, h // 2, w // 2
    xp = jnp.pad(act, ((0, 0), (0, 0), (PAD, PAD), (PAD, PAD), (PAD, PAD)))
    xr = xp.reshape(c, n, do + 1, 2, ho + 1, 2, wo + 1, 2)
    a = jnp.transpose(xr, (3, 5, 7, 0, 1, 2, 4, 6))   # (pd,ph,pw, c, n, qd,qh,qw)
    g = n * (do + 1) * (ho + 1) * (wo + 1)
    return a.reshape(8 * c, g).astype(jnp.bfloat16), (do, ho, wo)


def _prep_weight(w):
    """(Cout, Cin, 4,4,4) -> (8 shifts, cp, 8*Cin) bf16, rows (pd,ph,pw,cin)."""
    cout, cin = w.shape[:2]
    cp = _round_up(cout, 16)
    w8 = w.reshape(cout, cin, 2, 2, 2, 2, 2, 2)        # (o, c, sd,pd, sh,ph, sw,pw)
    w8 = jnp.transpose(w8, (2, 4, 6, 0, 3, 5, 7, 1))   # (sd,sh,sw, o, pd,ph,pw, c)
    w8 = w8.reshape(8, cout, 8 * cin)
    w8 = jnp.pad(w8, ((0, 0), (0, cp - cout), (0, 0)))
    return w8.astype(jnp.bfloat16), cp


def _valid_mask(n, do, ho, wo, cols):
    vd = (jnp.arange(do + 1) < do).astype(jnp.float32)
    vh = (jnp.arange(ho + 1) < ho).astype(jnp.float32)
    vw = (jnp.arange(wo + 1) < wo).astype(jnp.float32)
    m = vd[:, None, None] * vh[None, :, None] * vw[None, None, :]
    m = jnp.broadcast_to(m[None], (n, do + 1, ho + 1, wo + 1)).reshape(1, -1)
    return jnp.pad(m, ((0, 0), (0, cols - m.shape[1])))


def conv_layer(act, w, b, mode):
    """One conv layer.  act: (Cin, N, D, H, W) bf16.  mode: 'lrelu'|'bn_lrelu'|'none'."""
    _, n, _, _, _ = act.shape
    cout = w.shape[0]
    a2d, (do, ho, wo) = _prep_parity(act)
    kc, g = a2d.shape
    m_valid = n * do * ho * wo
    offsets = _shift_offsets(ho, wo)
    max_off = max(offsets)

    if mode == "bn_lrelu" and _round_up(g, LANE) <= BN_FUSE_MAX_LANES:
        n_tiles, tm = 1, _round_up(g, LANE)
        kmode = "bn_lrelu"                       # fully fused conv + BN + lrelu
    else:
        n_tiles, tm = _pick_tiles(g, max_off)
        kmode = mode if mode != "bn_lrelu" else "none"

    a2d = jnp.pad(a2d, ((0, 0), (0, (n_tiles + 1) * tm - g)))   # +1 tile = halo
    w8, cp = _prep_weight(w)
    bias = jnp.pad(b, (0, cp - cout)).reshape(cp, 1).astype(jnp.float32)
    if kmode == "bn_lrelu":
        msk = _valid_mask(n, do, ho, wo, tm)
    else:
        msk = jnp.zeros((1, tm), jnp.float32)    # unused by the kernel

    out_dtype = jnp.float32 if kmode == "none" else jnp.bfloat16
    out = pl.pallas_call(
        functools.partial(_conv_kernel, offsets=offsets, mode=kmode,
                          m_valid=m_valid),
        out_shape=jax.ShapeDtypeStruct((cp, n_tiles * tm), out_dtype),
        grid=(n_tiles,),
        in_specs=[
            pl.BlockSpec((8, cp, kc), lambda i: (0, 0, 0)),
            pl.BlockSpec((kc, tm), lambda i: (0, i)),
            pl.BlockSpec((kc, tm), lambda i: (0, i + 1)),
            pl.BlockSpec((cp, 1), lambda i: (0, 0)),
            pl.BlockSpec((1, tm), lambda i: (0, 0)),
        ],
        out_specs=pl.BlockSpec((cp, tm), lambda i: (0, i)),
        compiler_params=pltpu.CompilerParams(
            dimension_semantics=("parallel",),
            vmem_limit_bytes=VMEM_LIMIT),
    )(w8, a2d, a2d, bias, msk)

    y = out[:cout, :g].reshape(cout, n, do + 1, ho + 1, wo + 1)
    y = y[:, :, :do, :ho, :wo]

    if mode == "bn_lrelu" and kmode == "none":
        # TODO(synk): emit per-tile partial sums from the kernel epilogue for
        # the large-M BatchNorm case instead of this XLA stats fallback
        # (not hit at the shapes exercised in __main__).
        yf = y.astype(jnp.float32)
        mu = jnp.mean(yf, axis=(1, 2, 3, 4), keepdims=True)
        var = jnp.mean((yf - mu) ** 2, axis=(1, 2, 3, 4), keepdims=True)
        yf = (yf - mu) * jax.lax.rsqrt(var + BN_EPS)
        y = jnp.where(yf > 0, yf, NEG_SLOPE * yf).astype(jnp.bfloat16)
    return y


def conv4_conv5_fused(act, w4, b4, w5, b5):
    """Layer 4 (conv+BN+lrelu) fused with layer 5; returns one logit per sample."""
    _, n, _, _, _ = act.shape
    cout = w4.shape[0]
    a2d, (do, ho, wo) = _prep_parity(act)
    kc, g = a2d.shape
    m_valid = n * do * ho * wo
    offsets = _shift_offsets(ho, wo)
    tm = _round_up(g, LANE)
    a2d = jnp.pad(a2d, ((0, 0), (0, 2 * tm - g)))
    w8, cp = _prep_weight(w4)
    bias = jnp.pad(b4, (0, cp - cout)).reshape(cp, 1).astype(jnp.float32)
    msk = _valid_mask(n, do, ho, wo, tm)

    # Layer 5 (k=4,s=2,p=1 on a 2x2x2 map -> 1 voxel): only the centre 2x2x2
    # taps touch real h4 data; build a per-sample weight map on the h4 grid.
    w5c = w5[0, :, 1:3, 1:3, 1:3]                                    # (cout, 2,2,2)
    w5g = jnp.pad(w5c, ((0, 0), (0, do - 1), (0, ho - 1), (0, wo - 1)))
    eye = jnp.eye(n, dtype=jnp.float32)
    w5n = (eye[:, None, :, None, None, None] *
           w5g.astype(jnp.float32)[None, :, None, :, :, :])          # (n,cout,n,d+1,h+1,w+1)
    w5n = w5n.reshape(n, cout, g)
    w5n = jnp.pad(w5n, ((0, 0), (0, cp - cout), (0, tm - g)))
    b5v = b5.reshape(1, 1).astype(jnp.float32)

    out5 = pl.pallas_call(
        functools.partial(_conv_bn_head_kernel, offsets=offsets,
                          m_valid=m_valid, n_batch=n),
        out_shape=jax.ShapeDtypeStruct((1, LANE), jnp.float32),
        grid=(1,),
        in_specs=[
            pl.BlockSpec((8, cp, kc), lambda i: (0, 0, 0)),
            pl.BlockSpec((kc, tm), lambda i: (0, i)),
            pl.BlockSpec((kc, tm), lambda i: (0, i + 1)),
            pl.BlockSpec((cp, 1), lambda i: (0, 0)),
            pl.BlockSpec((1, tm), lambda i: (0, 0)),
            pl.BlockSpec((n, cp, tm), lambda i: (0, 0, 0)),
            pl.BlockSpec((1, 1), lambda i: (0, 0)),
        ],
        out_specs=pl.BlockSpec((1, LANE), lambda i: (0, 0)),
        compiler_params=pltpu.CompilerParams(
            dimension_semantics=("arbitrary",),
            vmem_limit_bytes=VMEM_LIMIT),
    )(w8, a2d, a2d, bias, msk, w5n, b5v)
    return out5[0, :n]


@jax.jit
def discriminator_forward(x, params):
    # boundary: NCDHW -> channel-major (C, N, D, H, W), bf16
    act = jnp.transpose(x, (1, 0, 2, 3, 4)).astype(jnp.bfloat16)
    act = conv_layer(act, params["w1"], params["b1"], "lrelu")
    act = conv_layer(act, params["w2"], params["b2"], "bn_lrelu")
    act = conv_layer(act, params["w3"], params["b3"], "bn_lrelu")
    n = act.shape[1]
    if act.shape[2:] == (4, 4, 4) and n <= LANE:
        logits = conv4_conv5_fused(act, params["w4"], params["b4"],
                                   params["w5"], params["b5"])
        return logits.reshape(n, 1, 1, 1, 1).astype(jnp.float32)
    # generic (unfused) tail for other spatial configs
    act = conv_layer(act, params["w4"], params["b4"], "bn_lrelu")
    act = conv_layer(act, params["w5"], params["b5"], "none")
    return jnp.transpose(act, (1, 0, 2, 3, 4)).astype(jnp.float32)


# ------------------------- pure-JAX reference -------------------------------

def _ref_conv3d(x, w, b):
    y = jax.lax.conv_general_dilated(
        x, w, window_strides=(STRIDE,) * 3,
        padding=((PAD, PAD),) * 3,
        dimension_numbers=("NCDHW", "OIDHW", "NCDHW"))
    return y + b.reshape(1, -1, 1, 1, 1)


def _ref_bn_lrelu(y):
    mu = jnp.mean(y, axis=(0, 2, 3, 4), keepdims=True)
    var = jnp.mean((y - mu) ** 2, axis=(0, 2, 3, 4), keepdims=True)
    y = (y - mu) / jnp.sqrt(var + BN_EPS)
    return jnp.where(y > 0, y, NEG_SLOPE * y)


def reference_forward(x, p):
    lrelu = lambda t: jnp.where(t > 0, t, NEG_SLOPE * t)
    h = lrelu(_ref_conv3d(x, p["w1"], p["b1"]))
    h = _ref_bn_lrelu(_ref_conv3d(h, p["w2"], p["b2"]))
    h = _ref_bn_lrelu(_ref_conv3d(h, p["w3"], p["b3"]))
    h = _ref_bn_lrelu(_ref_conv3d(h, p["w4"], p["b4"]))
    h = _ref_conv3d(h, p["w5"], p["b5"])
    return h


# --------------------------------- main --------------------------------------

def init_params(key, channel=32):
    sizes = [(channel // 8, 1), (channel // 4, channel // 8),
             (channel // 2, channel // 4), (channel, channel // 2),
             (1, channel)]
    params = {}
    for idx, (cout, cin) in enumerate(sizes, start=1):
        key, kw, kb = jax.random.split(key, 3)
        params[f"w{idx}"] = 0.05 * jax.random.normal(
            kw, (cout, cin, KSIZE, KSIZE, KSIZE), dtype=jnp.float32)
        params[f"b{idx}"] = 0.01 * jax.random.normal(kb, (cout,), dtype=jnp.float32)
    return params


if __name__ == "__main__":
    key = jax.random.PRNGKey(0)
    kx, kp = jax.random.split(key)
    # small config: channel=32 (torch default 512), spatial 32^3 so all 5
    # stride-2 convs produce a valid (non-empty) output: 32->16->8->4->2->1
    channel = 32
    x = jax.random.normal(kx, (2, 1, 32, 32, 32), dtype=jnp.float32)
    params = init_params(kp, channel)

    out = discriminator_forward(x, params)
    out = jax.block_until_ready(out)
    assert out.shape == (2, 1, 1, 1, 1), out.shape

    ref = jax.block_until_ready(reference_forward(x, params))
    # bf16 matmul inputs (f32 accumulation) vs f32 reference -> loose tolerance.
    assert jnp.allclose(out, ref, atol=2e-1, rtol=2e-1), (out, ref)

    print("KERNEL_OK")
</pallas_src>

<mosaic_0001>
module attributes {stable_mosaic.version = 11 : i64} {
  func.func @_conv_kernel(%arg0: i32, %arg1: memref<8x16x8xbf16, #tpu.memory_space<vmem>>, %arg2: memref<8x1024xbf16, #tpu.memory_space<vmem>>, %arg3: memref<8x1024xbf16, #tpu.memory_space<vmem>>, %arg4: memref<16x1xf32, #tpu.memory_space<vmem>>, %arg5: memref<1x1024xf32, #tpu.memory_space<vmem>>, %arg6: memref<16x1024xbf16, #tpu.memory_space<vmem>>) attributes {dimension_semantics = [#tpu.dimension_semantics<parallel>], iteration_bounds = array<i64: 10>, scalar_prefetch = 0 : i64, scratch_operands = 0 : i64, tpu.core_type = #tpu.core_type<tc>, window_params = [{pipeline_mode = #tpu.pipeline_mode<synchronous>, transform_indices = @transform_0, window_bounds = array<i64: 8, 16, 8>}, {transform_indices = @transform_1, window_bounds = array<i64: 8, 1024>}, {transform_indices = @transform_2, window_bounds = array<i64: 8, 1024>}, {pipeline_mode = #tpu.pipeline_mode<synchronous>, transform_indices = @transform_3, window_bounds = array<i64: 16, 1>}, {pipeline_mode = #tpu.pipeline_mode<synchronous>, transform_indices = @transform_4, window_bounds = array<i64: 1, 1024>}, {transform_indices = @transform_5, window_bounds = array<i64: 16, 1024>}]} {
    %c0 = arith.constant 0 : index
    %c0_0 = arith.constant 0 : index
    %0 = vector.load %arg2[%c0, %c0_0] : memref<8x1024xbf16, #tpu.memory_space<vmem>>, vector<8x1024xbf16>
    %c0_1 = arith.constant 0 : index
    %c0_2 = arith.constant 0 : index
    %1 = vector.load %arg3[%c0_1, %c0_2] : memref<8x1024xbf16, #tpu.memory_space<vmem>>, vector<8x1024xbf16>
    %2 = tpu.concatenate %0, %1 in 1 : vector<8x1024xbf16>, vector<8x1024xbf16> -> vector<8x2048xbf16>
    %c0_3 = arith.constant 0 : index
    %c0_4 = arith.constant 0 : index
    %c0_5 = arith.constant 0 : index
    %3 = vector.load %arg1[%c0_3, %c0_4, %c0_5] : memref<8x16x8xbf16, #tpu.memory_space<vmem>>, vector<1x16x8xbf16>
    %4 = vector.shape_cast %3 : vector<1x16x8xbf16> to vector<16x8xbf16>
    %5 = vector.extract_strided_slice %2 {offsets = [0, 0], sizes = [8, 1024], strides = [1, 1]} : vector<8x2048xbf16> to vector<8x1024xbf16>
    %cst = arith.constant dense<0.000000e+00> : vector<16x1024xf32>
    %6 = tpu.matmul %4, %5, %cst {dimension_numbers = #tpu.dot_dimension_numbers<[1], [0], [0], [1], [0, 0, 1, 1], [], []>} : vector<16x8xbf16>, vector<8x1024xbf16>, vector<16x1024xf32> -> vector<16x1024xf32>
    %c1 = arith.constant 1 : index
    %c0_6 = arith.constant 0 : index
    %c0_7 = arith.constant 0 : index
    %7 = vector.load %arg1[%c1, %c0_6, %c0_7] : memref<8x16x8xbf16, #tpu.memory_space<vmem>>, vector<1x16x8xbf16>
    %8 = vector.shape_cast %7 : vector<1x16x8xbf16> to vector<16x8xbf16>
    %9 = vector.extract_strided_slice %2 {offsets = [0, 1], sizes = [8, 1024], strides = [1, 1]} : vector<8x2048xbf16> to vector<8x1024xbf16>
    %cst_8 = arith.constant dense<0.000000e+00> : vector<16x1024xf32>
    %10 = tpu.matmul %8, %9, %cst_8 {dimension_numbers = #tpu.dot_dimension_numbers<[1], [0], [0], [1], [0, 0, 1, 1], [], []>} : vector<16x8xbf16>, vector<8x1024xbf16>, vector<16x1024xf32> -> vector<16x1024xf32>
    %11 = arith.addf %6, %10 : vector<16x1024xf32>
    %c2 = arith.constant 2 : index
    %c0_9 = arith.constant 0 : index
    %c0_10 = arith.constant 0 : index
    %12 = vector.load %arg1[%c2, %c0_9, %c0_10] : memref<8x16x8xbf16, #tpu.memory_space<vmem>>, vector<1x16x8xbf16>
    %13 = vector.shape_cast %12 : vector<1x16x8xbf16> to vector<16x8xbf16>
    %14 = vector.extract_strided_slice %2 {offsets = [0, 17], sizes = [8, 1024], strides = [1, 1]} : vector<8x2048xbf16> to vector<8x1024xbf16>
    %cst_11 = arith.constant dense<0.000000e+00> : vector<16x1024xf32>
    %15 = tpu.matmul %13, %14, %cst_11 {dimension_numbers = #tpu.dot_dimension_numbers<[1], [0], [0], [1], [0, 0, 1, 1], [], []>} : vector<16x8xbf16>, vector<8x1024xbf16>, vector<16x1024xf32> -> vector<16x1024xf32>
    %16 = arith.addf %11, %15 : vector<16x1024xf32>
    %c3 = arith.constant 3 : index
    %c0_12 = arith.constant 0 : index
    %c0_13 = arith.constant 0 : index
    %17 = vector.load %arg1[%c3, %c0_12, %c0_13] : memref<8x16x8xbf16, #tpu.memory_space<vmem>>, vector<1x16x8xbf16>
    %18 = vector.shape_cast %17 : vector<1x16x8xbf16> to vector<16x8xbf16>
    %19 = vector.extract_strided_slice %2 {offsets = [0, 18], sizes = [8, 1024], strides = [1, 1]} : vector<8x2048xbf16> to vector<8x1024xbf16>
    %cst_14 = arith.constant dense<0.000000e+00> : vector<16x1024xf32>
    %20 = tpu.matmul %18, %19, %cst_14 {dimension_numbers = #tpu.dot_dimension_numbers<[1], [0], [0], [1], [0, 0, 1, 1], [], []>} : vector<16x8xbf16>, vector<8x1024xbf16>, vector<16x1024xf32> -> vector<16x1024xf32>
    %21 = arith.addf %16, %20 : vector<16x1024xf32>
    %c4 = arith.constant 4 : index
    %c0_15 = arith.constant 0 : index
    %c0_16 = arith.constant 0 : index
    %22 = vector.load %arg1[%c4, %c0_15, %c0_16] : memref<8x16x8xbf16, #tpu.memory_space<vmem>>, vector<1x16x8xbf16>
    %23 = vector.shape_cast %22 : vector<1x16x8xbf16> to vector<16x8xbf16>
    %24 = vector.extract_strided_slice %2 {offsets = [0, 289], sizes = [8, 1024], strides = [1, 1]} : vector<8x2048xbf16> to vector<8x1024xbf16>
    %cst_17 = arith.constant dense<0.000000e+00> : vector<16x1024xf32>
    %25 = tpu.matmul %23, %24, %cst_17 {dimension_numbers = #tpu.dot_dimension_numbers<[1], [0], [0], [1], [0, 0, 1, 1], [], []>} : vector<16x8xbf16>, vector<8x1024xbf16>, vector<16x1024xf32> -> vector<16x1024xf32>
    %26 = arith.addf %21, %25 : vector<16x1024xf32>
    %c5 = arith.constant 5 : index
    %c0_18 = arith.constant 0 : index
    %c0_19 = arith.constant 0 : index
    %27 = vector.load %arg1[%c5, %c0_18, %c0_19] : memref<8x16x8xbf16, #tpu.memory_space<vmem>>, vector<1x16x8xbf16>
    %28 = vector.shape_cast %27 : vector<1x16x8xbf16> to vector<16x8xbf16>
    %29 = vector.extract_strided_slice %2 {offsets = [0, 290], sizes = [8, 1024], strides = [1, 1]} : vector<8x2048xbf16> to vector<8x1024xbf16>
    %cst_20 = arith.constant dense<0.000000e+00> : vector<16x1024xf32>
    %30 = tpu.matmul %28, %29, %cst_20 {dimension_numbers = #tpu.dot_dimension_numbers<[1], [0], [0], [1], [0, 0, 1, 1], [], []>} : vector<16x8xbf16>, vector<8x1024xbf16>, vector<16x1024xf32> -> vector<16x1024xf32>
    %31 = arith.addf %26, %30 : vector<16x1024xf32>
    %c6 = arith.constant 6 : index
    %c0_21 = arith.constant 0 : index
    %c0_22 = arith.constant 0 : index
    %32 = vector.load %arg1[%c6, %c0_21, %c0_22] : memref<8x16x8xbf16, #tpu.memory_space<vmem>>, vector<1x16x8xbf16>
    %33 = vector.shape_cast %32 : vector<1x16x8xbf16> to vector<16x8xbf16>
    %34 = vector.extract_strided_slice %2 {offsets = [0, 306], sizes = [8, 1024], strides = [1, 1]} : vector<8x2048xbf16> to vector<8x1024xbf16>
    %cst_23 = arith.constant dense<0.000000e+00> : vector<16x1024xf32>
    %35 = tpu.matmul %33, %34, %cst_23 {dimension_numbers = #tpu.dot_dimension_numbers<[1], [0], [0], [1], [0, 0, 1, 1], [], []>} : vector<16x8xbf16>, vector<8x1024xbf16>, vector<16x1024xf32> -> vector<16x1024xf32>
    %36 = arith.addf %31, %35 : vector<16x1024xf32>
    %c7 = arith.constant 7 : index
    %c0_24 = arith.constant 0 : index
    %c0_25 = arith.constant 0 : index
    %37 = vector.load %arg1[%c7, %c0_24, %c0_25] : memref<8x16x8xbf16, #tpu.memory_space<vmem>>, vector<1x16x8xbf16>
    %38 = vector.shape_cast %37 : vector<1x16x8xbf16> to vector<16x8xbf16>
    %39 = vector.extract_strided_slice %2 {offsets = [0, 307], sizes = [8, 1024], strides = [1, 1]} : vector<8x2048xbf16> to vector<8x1024xbf16>
    %cst_26 = arith.constant dense<0.000000e+00> : vector<16x1024xf32>
    %40 = tpu.matmul %38, %39, %cst_26 {dimension_numbers = #tpu.dot_dimension_numbers<[1], [0], [0], [1], [0, 0, 1, 1], [], []>} : vector<16x8xbf16>, vector<8x1024xbf16>, vector<16x1024xf32> -> vector<16x1024xf32>
    %41 = arith.addf %36, %40 : vector<16x1024xf32>
    %c0_27 = arith.constant 0 : index
    %c0_28 = arith.constant 0 : index
    %42 = vector.load %arg4[%c0_27, %c0_28] : memref<16x1xf32, #tpu.memory_space<vmem>>, vector<16x1xf32>
    %43 = vector.broadcast %42 : vector<16x1xf32> to vector<16x1024xf32>
    %44 = arith.addf %41, %43 : vector<16x1024xf32>
    %cst_29 = arith.constant 0.000000e+00 : f32
    %45 = vector.broadcast %cst_29 : f32 to vector<16x1024xf32>
    %46 = arith.cmpf ogt, %44, %45 : vector<16x1024xf32>
    %cst_30 = arith.constant 2.000000e-01 : f32
    %47 = vector.broadcast %cst_30 : f32 to vector<16x1024xf32>
    %48 = arith.mulf %47, %44 : vector<16x1024xf32>
    %49 = arith.select %46, %44, %48 : vector<16x1024xi1>, vector<16x1024xf32>
    %50 = arith.truncf %49 : vector<16x1024xf32> to vector<16x1024xbf16>
    %c0_31 = arith.constant 0 : index
    %c0_32 = arith.constant 0 : index
    %51 = vector.load %arg6[%c0_31, %c0_32] : memref<16x1024xbf16, #tpu.memory_space<vmem>>, vector<16x1024xbf16>
    tpu.vector_store %arg6[%c0_31, %c0_32], %50 {strides = array<i32>} : memref<16x1024xbf16, #tpu.memory_space<vmem>>, vector<16x1024xbf16>,
    return
  }
  func.func @transform_0(%arg0: i32) -> (i32, i32, i32) {
    %c0_i32 = arith.constant 0 : i32
    %c0_i32_0 = arith.constant 0 : i32
    %c0_i32_1 = arith.constant 0 : i32
    %c0_i32_2 = arith.constant 0 : i32
    return %c0_i32, %c0_i32_0, %c0_i32_1 : i32, i32, i32
  }
  func.func @transform_1(%arg0: i32) -> (i32, i32) {
    %c0_i32 = arith.constant 0 : i32
    %c0_i32_0 = arith.constant 0 : i32
    return %c0_i32, %arg0 : i32, i32
  }
  func.func @transform_2(%arg0: i32) -> (i32, i32) {
    %c1_i32 = arith.constant 1 : i32
    %0 = arith.addi %arg0, %c1_i32 : i32
    %c0_i32 = arith.constant 0 : i32
    %c0_i32_0 = arith.constant 0 : i32
    return %c0_i32, %0 : i32, i32
  }
  func.func @transform_3(%arg0: i32) -> (i32, i32) {
    %c0_i32 = arith.constant 0 : i32
    %c0_i32_0 = arith.constant 0 : i32
    %c0_i32_1 = arith.constant 0 : i32
    return %c0_i32, %c0_i32_0 : i32, i32
  }
  func.func @transform_4(%arg0: i32) -> (i32, i32) {
    %c0_i32 = arith.constant 0 : i32
    %c0_i32_0 = arith.constant 0 : i32
    %c0_i32_1 = arith.constant 0 : i32
    return %c0_i32, %c0_i32_0 : i32, i32
  }
  func.func @transform_5(%arg0: i32) -> (i32, i32) {
    %c0_i32 = arith.constant 0 : i32
    %c0_i32_0 = arith.constant 0 : i32
    return %c0_i32, %arg0 : i32, i32
  }
}

module attributes {stable_mosaic.version = 11 : i64} {
  func.func @_conv_kernel(%arg0: i32, %arg1: memref<8x16x32xbf16, #tpu.memory_space<vmem>>, %arg2: memref<32x1536xbf16, #tpu.memory_space<vmem>>, %arg3: memref<32x1536xbf16, #tpu.memory_space<vmem>>, %arg4: memref<16x1xf32, #tpu.memory_space<vmem>>, %arg5: memref<1x1536xf32, #tpu.memory_space<vmem>>, %arg6: memref<16x1536xbf16, #tpu.memory_space<vmem>>) attributes {dimension_semantics = [#tpu.dimension_semantics<parallel>], iteration_bounds = array<i64: 1>, scalar_prefetch = 0 : i64, scratch_operands = 0 : i64, tpu.core_type = #tpu.core_type<tc>, window_params = [{pipeline_mode = #tpu.pipeline_mode<synchronous>, transform_indices = @transform_0, window_bounds = array<i64: 8, 16, 32>}, {transform_indices = @transform_1, window_bounds = array<i64: 32, 1536>}, {transform_indices = @transform_2, window_bounds = array<i64: 32, 1536>}, {pipeline_mode = #tpu.pipeline_mode<synchronous>, transform_indices = @transform_3, window_bounds = array<i64: 16, 1>}, {pipeline_mode = #tpu.pipeline_mode<synchronous>, transform_indices = @transform_4, window_bounds = array<i64: 1, 1536>}, {transform_indices = @transform_5, window_bounds = array<i64: 16, 1536>}]} {
    %c0 = arith.constant 0 : index
    %c0_0 = arith.constant 0 : index
    %0 = vector.load %arg2[%c0, %c0_0] : memref<32x1536xbf16, #tpu.memory_space<vmem>>, vector<32x1536xbf16>
    %c0_1 = arith.constant 0 : index
    %c0_2 = arith.constant 0 : index
    %1 = vector.load %arg3[%c0_1, %c0_2] : memref<32x1536xbf16, #tpu.memory_space<vmem>>, vector<32x1536xbf16>
    %2 = tpu.concatenate %0, %1 in 1 : vector<32x1536xbf16>, vector<32x1536xbf16> -> vector<32x3072xbf16>
    %c0_3 = arith.constant 0 : index
    %c0_4 = arith.constant 0 : index
    %c0_5 = arith.constant 0 : index
    %3 = vector.load %arg1[%c0_3, %c0_4, %c0_5] : memref<8x16x32xbf16, #tpu.memory_space<vmem>>, vector<1x16x32xbf16>
    %4 = vector.shape_cast %3 : vector<1x16x32xbf16> to vector<16x32xbf16>
    %5 = vector.extract_strided_slice %2 {offsets = [0, 0], sizes = [32, 1536], strides = [1, 1]} : vector<32x3072xbf16> to vector<32x1536xbf16>
    %cst = arith.constant dense<0.000000e+00> : vector<16x1536xf32>
    %6 = tpu.matmul %4, %5, %cst {dimension_numbers = #tpu.dot_dimension_numbers<[1], [0], [0], [1], [0, 0, 1, 1], [], []>} : vector<16x32xbf16>, vector<32x1536xbf16>, vector<16x1536xf32> -> vector<16x1536xf32>
    %c1 = arith.constant 1 : index
    %c0_6 = arith.constant 0 : index
    %c0_7 = arith.constant 0 : index
    %7 = vector.load %arg1[%c1, %c0_6, %c0_7] : memref<8x16x32xbf16, #tpu.memory_space<vmem>>, vector<1x16x32xbf16>
    %8 = vector.shape_cast %7 : vector<1x16x32xbf16> to vector<16x32xbf16>
    %9 = vector.extract_strided_slice %2 {offsets = [0, 1], sizes = [32, 1536], strides = [1, 1]} : vector<32x3072xbf16> to vector<32x1536xbf16>
    %cst_8 = arith.constant dense<0.000000e+00> : vector<16x1536xf32>
    %10 = tpu.matmul %8, %9, %cst_8 {dimension_numbers = #tpu.dot_dimension_numbers<[1], [0], [0], [1], [0, 0, 1, 1], [], []>} : vector<16x32xbf16>, vector<32x1536xbf16>, vector<16x1536xf32> -> vector<16x1536xf32>
    %11 = arith.addf %6, %10 : vector<16x1536xf32>
    %c2 = arith.constant 2 : index
    %c0_9 = arith.constant 0 : index
    %c0_10 = arith.constant 0 : index
    %12 = vector.load %arg1[%c2, %c0_9, %c0_10] : memref<8x16x32xbf16, #tpu.memory_space<vmem>>, vector<1x16x32xbf16>
    %13 = vector.shape_cast %12 : vector<1x16x32xbf16> to vector<16x32xbf16>
    %14 = vector.extract_strided_slice %2 {offsets = [0, 9], sizes = [32, 1536], strides = [1, 1]} : vector<32x3072xbf16> to vector<32x1536xbf16>
    %cst_11 = arith.constant dense<0.000000e+00> : vector<16x1536xf32>
    %15 = tpu.matmul %13, %14, %cst_11 {dimension_numbers = #tpu.dot_dimension_numbers<[1], [0], [0], [1], [0, 0, 1, 1], [], []>} : vector<16x32xbf16>, vector<32x1536xbf16>, vector<16x1536xf32> -> vector<16x1536xf32>
    %16 = arith.addf %11, %15 : vector<16x1536xf32>
    %c3 = arith.constant 3 : index
    %c0_12 = arith.constant 0 : index
    %c0_13 = arith.constant 0 : index
    %17 = vector.load %arg1[%c3, %c0_12, %c0_13] : memref<8x16x32xbf16, #tpu.memory_space<vmem>>, vector<1x16x32xbf16>
    %18 = vector.shape_cast %17 : vector<1x16x32xbf16> to vector<16x32xbf16>
    %19 = vector.extract_strided_slice %2 {offsets = [0, 10], sizes = [32, 1536], strides = [1, 1]} : vector<32x3072xbf16> to vector<32x1536xbf16>
    %cst_14 = arith.constant dense<0.000000e+00> : vector<16x1536xf32>
    %20 = tpu.matmul %18, %19, %cst_14 {dimension_numbers = #tpu.dot_dimension_numbers<[1], [0], [0], [1], [0, 0, 1, 1], [], []>} : vector<16x32xbf16>, vector<32x1536xbf16>, vector<16x1536xf32> -> vector<16x1536xf32>
    %21 = arith.addf %16, %20 : vector<16x1536xf32>
    %c4 = arith.constant 4 : index
    %c0_15 = arith.constant 0 : index
    %c0_16 = arith.constant 0 : index
    %22 = vector.load %arg1[%c4, %c0_15, %c0_16] : memref<8x16x32xbf16, #tpu.memory_space<vmem>>, vector<1x16x32xbf16>
    %23 = vector.shape_cast %22 : vector<1x16x32xbf16> to vector<16x32xbf16>
    %24 = vector.extract_strided_slice %2 {offsets = [0, 81], sizes = [32, 1536], strides = [1, 1]} : vector<32x3072xbf16> to vector<32x1536xbf16>
    %cst_17 = arith.constant dense<0.000000e+00> : vector<16x1536xf32>
    %25 = tpu.matmul %23, %24, %cst_17 {dimension_numbers = #tpu.dot_dimension_numbers<[1], [0], [0], [1], [0, 0, 1, 1], [], []>} : vector<16x32xbf16>, vector<32x1536xbf16>, vector<16x1536xf32> -> vector<16x1536xf32>
    %26 = arith.addf %21, %25 : vector<16x1536xf32>
    %c5 = arith.constant 5 : index
    %c0_18 = arith.constant 0 : index
    %c0_19 = arith.constant 0 : index
    %27 = vector.load %arg1[%c5, %c0_18, %c0_19] : memref<8x16x32xbf16, #tpu.memory_space<vmem>>, vector<1x16x32xbf16>
    %28 = vector.shape_cast %27 : vector<1x16x32xbf16> to vector<16x32xbf16>
    %29 = vector.extract_strided_slice %2 {offsets = [0, 82], sizes = [32, 1536], strides = [1, 1]} : vector<32x3072xbf16> to vector<32x1536xbf16>
    %cst_20 = arith.constant dense<0.000000e+00> : vector<16x1536xf32>
    %30 = tpu.matmul %28, %29, %cst_20 {dimension_numbers = #tpu.dot_dimension_numbers<[1], [0], [0], [1], [0, 0, 1, 1], [], []>} : vector<16x32xbf16>, vector<32x1536xbf16>, vector<16x1536xf32> -> vector<16x1536xf32>
    %31 = arith.addf %26, %30 : vector<16x1536xf32>
    %c6 = arith.constant 6 : index
    %c0_21 = arith.constant 0 : index
    %c0_22 = arith.constant 0 : index
    %32 = vector.load %arg1[%c6, %c0_21, %c0_22] : memref<8x16x32xbf16, #tpu.memory_space<vmem>>, vector<1x16x32xbf16>
    %33 = vector.shape_cast %32 : vector<1x16x32xbf16> to vector<16x32xbf16>
    %34 = vector.extract_strided_slice %2 {offsets = [0, 90], sizes = [32, 1536], strides = [1, 1]} : vector<32x3072xbf16> to vector<32x1536xbf16>
    %cst_23 = arith.constant dense<0.000000e+00> : vector<16x1536xf32>
    %35 = tpu.matmul %33, %34, %cst_23 {dimension_numbers = #tpu.dot_dimension_numbers<[1], [0], [0], [1], [0, 0, 1, 1], [], []>} : vector<16x32xbf16>, vector<32x1536xbf16>, vector<16x1536xf32> -> vector<16x1536xf32>
    %36 = arith.addf %31, %35 : vector<16x1536xf32>
    %c7 = arith.constant 7 : index
    %c0_24 = arith.constant 0 : index
    %c0_25 = arith.constant 0 : index
    %37 = vector.load %arg1[%c7, %c0_24, %c0_25] : memref<8x16x32xbf16, #tpu.memory_space<vmem>>, vector<1x16x32xbf16>
    %38 = vector.shape_cast %37 : vector<1x16x32xbf16> to vector<16x32xbf16>
    %39 = vector.extract_strided_slice %2 {offsets = [0, 91], sizes = [32, 1536], strides = [1, 1]} : vector<32x3072xbf16> to vector<32x1536xbf16>
    %cst_26 = arith.constant dense<0.000000e+00> : vector<16x1536xf32>
    %40 = tpu.matmul %38, %39, %cst_26 {dimension_numbers = #tpu.dot_dimension_numbers<[1], [0], [0], [1], [0, 0, 1, 1], [], []>} : vector<16x32xbf16>, vector<32x1536xbf16>, vector<16x1536xf32> -> vector<16x1536xf32>
    %41 = arith.addf %36, %40 : vector<16x1536xf32>
    %c0_27 = arith.constant 0 : index
    %c0_28 = arith.constant 0 : index
    %42 = vector.load %arg4[%c0_27, %c0_28] : memref<16x1xf32, #tpu.memory_space<vmem>>, vector<16x1xf32>
    %43 = vector.broadcast %42 : vector<16x1xf32> to vector<16x1536xf32>
    %44 = arith.addf %41, %43 : vector<16x1536xf32>
    %c0_29 = arith.constant 0 : index
    %c0_30 = arith.constant 0 : index
    %45 = vector.load %arg5[%c0_29, %c0_30] : memref<1x1536xf32, #tpu.memory_space<vmem>>, vector<1x1536xf32>
    %46 = vector.broadcast %45 : vector<1x1536xf32> to vector<16x1536xf32>
    %47 = arith.mulf %44, %46 : vector<16x1536xf32>
    %cst_31 = arith.constant dense<0.000000e+00> : vector<16xf32>
    %48 = vector.multi_reduction <add>, %47, %cst_31 [1] : vector<16x1536xf32> to vector<16xf32>
    %49 = vector.shape_cast %48 : vector<16xf32> to vector<16x1xf32>
    %cst_32 = arith.constant 9.765625E-4 : f32
    %50 = vector.broadcast %cst_32 : f32 to vector<16x1xf32>
    %51 = arith.mulf %49, %50 : vector<16x1xf32>
    %52 = vector.broadcast %51 : vector<16x1xf32> to vector<16x1536xf32>
    %53 = arith.subf %44, %52 : vector<16x1536xf32>
    %54 = arith.mulf %53, %53 : vector<16x1536xf32>
    %55 = vector.broadcast %45 : vector<1x1536xf32> to vector<16x1536xf32>
    %56 = arith.mulf %54, %55 : vector<16x1536xf32>
    %cst_33 = arith.constant dense<0.000000e+00> : vector<16xf32>
    %57 = vector.multi_reduction <add>, %56, %cst_33 [1] : vector<16x1536xf32> to vector<16xf32>
    %58 = vector.shape_cast %57 : vector<16xf32> to vector<16x1xf32>
    %cst_34 = arith.constant 9.765625E-4 : f32
    %59 = vector.broadcast %cst_34 : f32 to vector<16x1xf32>
    %60 = arith.mulf %58, %59 : vector<16x1xf32>
    %cst_35 = arith.constant 9.99999974E-6 : f32
    %61 = vector.broadcast %cst_35 : f32 to vector<16x1xf32>
    %62 = arith.addf %60, %61 : vector<16x1xf32>
    %63 = math.rsqrt %62 : vector<16x1xf32>
    %64 = vector.broadcast %63 : vector<16x1xf32> to vector<16x1536xf32>
    %65 = arith.mulf %53, %64 : vector<16x1536xf32>
    %cst_36 = arith.constant 0.000000e+00 : f32
    %66 = vector.broadcast %cst_36 : f32 to vector<16x1536xf32>
    %67 = arith.cmpf ogt, %65, %66 : vector<16x1536xf32>
    %cst_37 = arith.constant 2.000000e-01 : f32
    %68 = vector.broadcast %cst_37 : f32 to vector<16x1536xf32>
    %69 = arith.mulf %68, %65 : vector<16x1536xf32>
    %70 = arith.select %67, %65, %69 : vector<16x1536xi1>, vector<16x1536xf32>
    %71 = arith.truncf %70 : vector<16x1536xf32> to vector<16x1536xbf16>
    %c0_38 = arith.constant 0 : index
    %c0_39 = arith.constant 0 : index
    %72 = vector.load %arg6[%c0_38, %c0_39] : memref<16x1536xbf16, #tpu.memory_space<vmem>>, vector<16x1536xbf16>
    tpu.vector_store %arg6[%c0_38, %c0_39], %71 {strides = array<i32>} : memref<16x1536xbf16, #tpu.memory_space<vmem>>, vector<16x1536xbf16>,
    return
  }
  func.func @transform_0(%arg0: i32) -> (i32, i32, i32) {
    %c0_i32 = arith.constant 0 : i32
    %c0_i32_0 = arith.constant 0 : i32
    %c0_i32_1 = arith.constant 0 : i32
    %c0_i32_2 = arith.constant 0 : i32
    return %c0_i32, %c0_i32_0, %c0_i32_1 : i32, i32, i32
  }
  func.func @transform_1(%arg0: i32) -> (i32, i32) {
    %c0_i32 = arith.constant 0 : i32
    %c0_i32_0 = arith.constant 0 : i32
    return %c0_i32, %arg0 : i32, i32
  }
  func.func @transform_2(%arg0: i32) -> (i32, i32) {
    %c1_i32 = arith.constant 1 : i32
    %0 = arith.addi %arg0, %c1_i32 : i32
    %c0_i32 = arith.constant 0 : i32
    %c0_i32_0 = arith.constant 0 : i32
    return %c0_i32, %0 : i32, i32
  }
  func.func @transform_3(%arg0: i32) -> (i32, i32) {
    %c0_i32 = arith.constant 0 : i32
    %c0_i32_0 = arith.constant 0 : i32
    %c0_i32_1 = arith.constant 0 : i32
    return %c0_i32, %c0_i32_0 : i32, i32
  }
  func.func @transform_4(%arg0: i32) -> (i32, i32) {
    %c0_i32 = arith.constant 0 : i32
    %c0_i32_0 = arith.constant 0 : i32
    %c0_i32_1 = arith.constant 0 : i32
    return %c0_i32, %c0_i32_0 : i32, i32
  }
  func.func @transform_5(%arg0: i32) -> (i32, i32) {
    %c0_i32 = arith.constant 0 : i32
    %c0_i32_0 = arith.constant 0 : i32
    return %c0_i32, %arg0 : i32, i32
  }
}

module attributes {stable_mosaic.version = 11 : i64} {
  func.func @_conv_kernel(%arg0: i32, %arg1: memref<8x16x64xbf16, #tpu.memory_space<vmem>>, %arg2: memref<64x256xbf16, #tpu.memory_space<vmem>>, %arg3: memref<64x256xbf16, #tpu.memory_space<vmem>>, %arg4: memref<16x1xf32, #tpu.memory_space<vmem>>, %arg5: memref<1x256xf32, #tpu.memory_space<vmem>>, %arg6: memref<16x256xbf16, #tpu.memory_space<vmem>>) attributes {dimension_semantics = [#tpu.dimension_semantics<parallel>], iteration_bounds = array<i64: 1>, scalar_prefetch = 0 : i64, scratch_operands = 0 : i64, tpu.core_type = #tpu.core_type<tc>, window_params = [{pipeline_mode = #tpu.pipeline_mode<synchronous>, transform_indices = @transform_0, window_bounds = array<i64: 8, 16, 64>}, {transform_indices = @transform_1, window_bounds = array<i64: 64, 256>}, {transform_indices = @transform_2, window_bounds = array<i64: 64, 256>}, {pipeline_mode = #tpu.pipeline_mode<synchronous>, transform_indices = @transform_3, window_bounds = array<i64: 16, 1>}, {pipeline_mode = #tpu.pipeline_mode<synchronous>, transform_indices = @transform_4, window_bounds = array<i64: 1, 256>}, {transform_indices = @transform_5, window_bounds = array<i64: 16, 256>}]} {
    %c0 = arith.constant 0 : index
    %c0_0 = arith.constant 0 : index
    %0 = vector.load %arg2[%c0, %c0_0] : memref<64x256xbf16, #tpu.memory_space<vmem>>, vector<64x256xbf16>
    %c0_1 = arith.constant 0 : index
    %c0_2 = arith.constant 0 : index
    %1 = vector.load %arg3[%c0_1, %c0_2] : memref<64x256xbf16, #tpu.memory_space<vmem>>, vector<64x256xbf16>
    %2 = tpu.concatenate %0, %1 in 1 : vector<64x256xbf16>, vector<64x256xbf16> -> vector<64x512xbf16>
    %c0_3 = arith.constant 0 : index
    %c0_4 = arith.constant 0 : index
    %c0_5 = arith.constant 0 : index
    %3 = vector.load %arg1[%c0_3, %c0_4, %c0_5] : memref<8x16x64xbf16, #tpu.memory_space<vmem>>, vector<1x16x64xbf16>
    %4 = vector.shape_cast %3 : vector<1x16x64xbf16> to vector<16x64xbf16>
    %5 = vector.extract_strided_slice %2 {offsets = [0, 0], sizes = [64, 256], strides = [1, 1]} : vector<64x512xbf16> to vector<64x256xbf16>
    %cst = arith.constant dense<0.000000e+00> : vector<16x256xf32>
    %6 = tpu.matmul %4, %5, %cst {dimension_numbers = #tpu.dot_dimension_numbers<[1], [0], [0], [1], [0, 0, 1, 1], [], []>} : vector<16x64xbf16>, vector<64x256xbf16>, vector<16x256xf32> -> vector<16x256xf32>
    %c1 = arith.constant 1 : index
    %c0_6 = arith.constant 0 : index
    %c0_7 = arith.constant 0 : index
    %7 = vector.load %arg1[%c1, %c0_6, %c0_7] : memref<8x16x64xbf16, #tpu.memory_space<vmem>>, vector<1x16x64xbf16>
    %8 = vector.shape_cast %7 : vector<1x16x64xbf16> to vector<16x64xbf16>
    %9 = vector.extract_strided_slice %2 {offsets = [0, 1], sizes = [64, 256], strides = [1, 1]} : vector<64x512xbf16> to vector<64x256xbf16>
    %cst_8 = arith.constant dense<0.000000e+00> : vector<16x256xf32>
    %10 = tpu.matmul %8, %9, %cst_8 {dimension_numbers = #tpu.dot_dimension_numbers<[1], [0], [0], [1], [0, 0, 1, 1], [], []>} : vector<16x64xbf16>, vector<64x256xbf16>, vector<16x256xf32> -> vector<16x256xf32>
    %11 = arith.addf %6, %10 : vector<16x256xf32>
    %c2 = arith.constant 2 : index
    %c0_9 = arith.constant 0 : index
    %c0_10 = arith.constant 0 : index
    %12 = vector.load %arg1[%c2, %c0_9, %c0_10] : memref<8x16x64xbf16, #tpu.memory_space<vmem>>, vector<1x16x64xbf16>
    %13 = vector.shape_cast %12 : vector<1x16x64xbf16> to vector<16x64xbf16>
    %14 = vector.extract_strided_slice %2 {offsets = [0, 5], sizes = [64, 256], strides = [1, 1]} : vector<64x512xbf16> to vector<64x256xbf16>
    %cst_11 = arith.constant dense<0.000000e+00> : vector<16x256xf32>
    %15 = tpu.matmul %13, %14, %cst_11 {dimension_numbers = #tpu.dot_dimension_numbers<[1], [0], [0], [1], [0, 0, 1, 1], [], []>} : vector<16x64xbf16>, vector<64x256xbf16>, vector<16x256xf32> -> vector<16x256xf32>
    %16 = arith.addf %11, %15 : vector<16x256xf32>
    %c3 = arith.constant 3 : index
    %c0_12 = arith.constant 0 : index
    %c0_13 = arith.constant 0 : index
    %17 = vector.load %arg1[%c3, %c0_12, %c0_13] : memref<8x16x64xbf16, #tpu.memory_space<vmem>>, vector<1x16x64xbf16>
    %18 = vector.shape_cast %17 : vector<1x16x64xbf16> to vector<16x64xbf16>
    %19 = vector.extract_strided_slice %2 {offsets = [0, 6], sizes = [64, 256], strides = [1, 1]} : vector<64x512xbf16> to vector<64x256xbf16>
    %cst_14 = arith.constant dense<0.000000e+00> : vector<16x256xf32>
    %20 = tpu.matmul %18, %19, %cst_14 {dimension_numbers = #tpu.dot_dimension_numbers<[1], [0], [0], [1], [0, 0, 1, 1], [], []>} : vector<16x64xbf16>, vector<64x256xbf16>, vector<16x256xf32> -> vector<16x256xf32>
    %21 = arith.addf %16, %20 : vector<16x256xf32>
    %c4 = arith.constant 4 : index
    %c0_15 = arith.constant 0 : index
    %c0_16 = arith.constant 0 : index
    %22 = vector.load %arg1[%c4, %c0_15, %c0_16] : memref<8x16x64xbf16, #tpu.memory_space<vmem>>, vector<1x16x64xbf16>
    %23 = vector.shape_cast %22 : vector<1x16x64xbf16> to vector<16x64xbf16>
    %24 = vector.extract_strided_slice %2 {offsets = [0, 25], sizes = [64, 256], strides = [1, 1]} : vector<64x512xbf16> to vector<64x256xbf16>
    %cst_17 = arith.constant dense<0.000000e+00> : vector<16x256xf32>
    %25 = tpu.matmul %23, %24, %cst_17 {dimension_numbers = #tpu.dot_dimension_numbers<[1], [0], [0], [1], [0, 0, 1, 1], [], []>} : vector<16x64xbf16>, vector<64x256xbf16>, vector<16x256xf32> -> vector<16x256xf32>
    %26 = arith.addf %21, %25 : vector<16x256xf32>
    %c5 = arith.constant 5 : index
    %c0_18 = arith.constant 0 : index
    %c0_19 = arith.constant 0 : index
    %27 = vector.load %arg1[%c5, %c0_18, %c0_19] : memref<8x16x64xbf16, #tpu.memory_space<vmem>>, vector<1x16x64xbf16>
    %28 = vector.shape_cast %27 : vector<1x16x64xbf16> to vector<16x64xbf16>
    %29 = vector.extract_strided_slice %2 {offsets = [0, 26], sizes = [64, 256], strides = [1, 1]} : vector<64x512xbf16> to vector<64x256xbf16>
    %cst_20 = arith.constant dense<0.000000e+00> : vector<16x256xf32>
    %30 = tpu.matmul %28, %29, %cst_20 {dimension_numbers = #tpu.dot_dimension_numbers<[1], [0], [0], [1], [0, 0, 1, 1], [], []>} : vector<16x64xbf16>, vector<64x256xbf16>, vector<16x256xf32> -> vector<16x256xf32>
    %31 = arith.addf %26, %30 : vector<16x256xf32>
    %c6 = arith.constant 6 : index
    %c0_21 = arith.constant 0 : index
    %c0_22 = arith.constant 0 : index
    %32 = vector.load %arg1[%c6, %c0_21, %c0_22] : memref<8x16x64xbf16, #tpu.memory_space<vmem>>, vector<1x16x64xbf16>
    %33 = vector.shape_cast %32 : vector<1x16x64xbf16> to vector<16x64xbf16>
    %34 = vector.extract_strided_slice %2 {offsets = [0, 30], sizes = [64, 256], strides = [1, 1]} : vector<64x512xbf16> to vector<64x256xbf16>
    %cst_23 = arith.constant dense<0.000000e+00> : vector<16x256xf32>
    %35 = tpu.matmul %33, %34, %cst_23 {dimension_numbers = #tpu.dot_dimension_numbers<[1], [0], [0], [1], [0, 0, 1, 1], [], []>} : vector<16x64xbf16>, vector<64x256xbf16>, vector<16x256xf32> -> vector<16x256xf32>
    %36 = arith.addf %31, %35 : vector<16x256xf32>
    %c7 = arith.constant 7 : index
    %c0_24 = arith.constant 0 : index
    %c0_25 = arith.constant 0 : index
    %37 = vector.load %arg1[%c7, %c0_24, %c0_25] : memref<8x16x64xbf16, #tpu.memory_space<vmem>>, vector<1x16x64xbf16>
    %38 = vector.shape_cast %37 : vector<1x16x64xbf16> to vector<16x64xbf16>
    %39 = vector.extract_strided_slice %2 {offsets = [0, 31], sizes = [64, 256], strides = [1, 1]} : vector<64x512xbf16> to vector<64x256xbf16>
    %cst_26 = arith.constant dense<0.000000e+00> : vector<16x256xf32>
    %40 = tpu.matmul %38, %39, %cst_26 {dimension_numbers = #tpu.dot_dimension_numbers<[1], [0], [0], [1], [0, 0, 1, 1], [], []>} : vector<16x64xbf16>, vector<64x256xbf16>, vector<16x256xf32> -> vector<16x256xf32>
    %41 = arith.addf %36, %40 : vector<16x256xf32>
    %c0_27 = arith.constant 0 : index
    %c0_28 = arith.constant 0 : index
    %42 = vector.load %arg4[%c0_27, %c0_28] : memref<16x1xf32, #tpu.memory_space<vmem>>, vector<16x1xf32>
    %43 = vector.broadcast %42 : vector<16x1xf32> to vector<16x256xf32>
    %44 = arith.addf %41, %43 : vector<16x256xf32>
    %c0_29 = arith.constant 0 : index
    %c0_30 = arith.constant 0 : index
    %45 = vector.load %arg5[%c0_29, %c0_30] : memref<1x256xf32, #tpu.memory_space<vmem>>, vector<1x256xf32>
    %46 = vector.broadcast %45 : vector<1x256xf32> to vector<16x256xf32>
    %47 = arith.mulf %44, %46 : vector<16x256xf32>
    %cst_31 = arith.constant dense<0.000000e+00> : vector<16xf32>
    %48 = vector.multi_reduction <add>, %47, %cst_31 [1] : vector<16x256xf32> to vector<16xf32>
    %49 = vector.shape_cast %48 : vector<16xf32> to vector<16x1xf32>
    %cst_32 = arith.constant 7.812500e-03 : f32
    %50 = vector.broadcast %cst_32 : f32 to vector<16x1xf32>
    %51 = arith.mulf %49, %50 : vector<16x1xf32>
    %52 = vector.broadcast %51 : vector<16x1xf32> to vector<16x256xf32>
    %53 = arith.subf %44, %52 : vector<16x256xf32>
    %54 = arith.mulf %53, %53 : vector<16x256xf32>
    %55 = vector.broadcast %45 : vector<1x256xf32> to vector<16x256xf32>
    %56 = arith.mulf %54, %55 : vector<16x256xf32>
    %cst_33 = arith.constant dense<0.000000e+00> : vector<16xf32>
    %57 = vector.multi_reduction <add>, %56, %cst_33 [1] : vector<16x256xf32> to vector<16xf32>
    %58 = vector.shape_cast %57 : vector<16xf32> to vector<16x1xf32>
    %cst_34 = arith.constant 7.812500e-03 : f32
    %59 = vector.broadcast %cst_34 : f32 to vector<16x1xf32>
    %60 = arith.mulf %58, %59 : vector<16x1xf32>
    %cst_35 = arith.constant 9.99999974E-6 : f32
    %61 = vector.broadcast %cst_35 : f32 to vector<16x1xf32>
    %62 = arith.addf %60, %61 : vector<16x1xf32>
    %63 = math.rsqrt %62 : vector<16x1xf32>
    %64 = vector.broadcast %63 : vector<16x1xf32> to vector<16x256xf32>
    %65 = arith.mulf %53, %64 : vector<16x256xf32>
    %cst_36 = arith.constant 0.000000e+00 : f32
    %66 = vector.broadcast %cst_36 : f32 to vector<16x256xf32>
    %67 = arith.cmpf ogt, %65, %66 : vector<16x256xf32>
    %cst_37 = arith.constant 2.000000e-01 : f32
    %68 = vector.broadcast %cst_37 : f32 to vector<16x256xf32>
    %69 = arith.mulf %68, %65 : vector<16x256xf32>
    %70 = arith.select %67, %65, %69 : vector<16x256xi1>, vector<16x256xf32>
    %71 = arith.truncf %70 : vector<16x256xf32> to vector<16x256xbf16>
    %c0_38 = arith.constant 0 : index
    %c0_39 = arith.constant 0 : index
    %72 = vector.load %arg6[%c0_38, %c0_39] : memref<16x256xbf16, #tpu.memory_space<vmem>>, vector<16x256xbf16>
    tpu.vector_store %arg6[%c0_38, %c0_39], %71 {strides = array<i32>} : memref<16x256xbf16, #tpu.memory_space<vmem>>, vector<16x256xbf16>,
    return
  }
  func.func @transform_0(%arg0: i32) -> (i32, i32, i32) {
    %c0_i32 = arith.constant 0 : i32
    %c0_i32_0 = arith.constant 0 : i32
    %c0_i32_1 = arith.constant 0 : i32
    %c0_i32_2 = arith.constant 0 : i32
    return %c0_i32, %c0_i32_0, %c0_i32_1 : i32, i32, i32
  }
  func.func @transform_1(%arg0: i32) -> (i32, i32) {
    %c0_i32 = arith.constant 0 : i32
    %c0_i32_0 = arith.constant 0 : i32
    return %c0_i32, %arg0 : i32, i32
  }
  func.func @transform_2(%arg0: i32) -> (i32, i32) {
    %c1_i32 = arith.constant 1 : i32
    %0 = arith.addi %arg0, %c1_i32 : i32
    %c0_i32 = arith.constant 0 : i32
    %c0_i32_0 = arith.constant 0 : i32
    return %c0_i32, %0 : i32, i32
  }
  func.func @transform_3(%arg0: i32) -> (i32, i32) {
    %c0_i32 = arith.constant 0 : i32
    %c0_i32_0 = arith.constant 0 : i32
    %c0_i32_1 = arith.constant 0 : i32
    return %c0_i32, %c0_i32_0 : i32, i32
  }
  func.func @transform_4(%arg0: i32) -> (i32, i32) {
    %c0_i32 = arith.constant 0 : i32
    %c0_i32_0 = arith.constant 0 : i32
    %c0_i32_1 = arith.constant 0 : i32
    return %c0_i32, %c0_i32_0 : i32, i32
  }
  func.func @transform_5(%arg0: i32) -> (i32, i32) {
    %c0_i32 = arith.constant 0 : i32
    %c0_i32_0 = arith.constant 0 : i32
    return %c0_i32, %arg0 : i32, i32
  }
}

module attributes {stable_mosaic.version = 11 : i64} {
  func.func @_conv_bn_head_kernel(%arg0: i32, %arg1: memref<8x32x128xbf16, #tpu.memory_space<vmem>>, %arg2: memref<128x128xbf16, #tpu.memory_space<vmem>>, %arg3: memref<128x128xbf16, #tpu.memory_space<vmem>>, %arg4: memref<32x1xf32, #tpu.memory_space<vmem>>, %arg5: memref<1x128xf32, #tpu.memory_space<vmem>>, %arg6: memref<2x32x128xf32, #tpu.memory_space<vmem>>, %arg7: memref<1x1xf32, #tpu.memory_space<vmem>>, %arg8: memref<1x128xf32, #tpu.memory_space<vmem>>) attributes {dimension_semantics = [#tpu.dimension_semantics<arbitrary>], iteration_bounds = array<i64: 1>, scalar_prefetch = 0 : i64, scratch_operands = 0 : i64, tpu.core_type = #tpu.core_type<tc>, window_params = [{pipeline_mode = #tpu.pipeline_mode<synchronous>, transform_indices = @transform_0, window_bounds = array<i64: 8, 32, 128>}, {transform_indices = @transform_1, window_bounds = array<i64: 128, 128>}, {transform_indices = @transform_2, window_bounds = array<i64: 128, 128>}, {pipeline_mode = #tpu.pipeline_mode<synchronous>, transform_indices = @transform_3, window_bounds = array<i64: 32, 1>}, {pipeline_mode = #tpu.pipeline_mode<synchronous>, transform_indices = @transform_4, window_bounds = array<i64: 1, 128>}, {pipeline_mode = #tpu.pipeline_mode<synchronous>, transform_indices = @transform_5, window_bounds = array<i64: 2, 32, 128>}, {pipeline_mode = #tpu.pipeline_mode<synchronous>, transform_indices = @transform_6, window_bounds = array<i64: 1, 1>}, {pipeline_mode = #tpu.pipeline_mode<synchronous>, transform_indices = @transform_7, window_bounds = array<i64: 1, 128>}]} {
    %c0 = arith.constant 0 : index
    %c0_0 = arith.constant 0 : index
    %0 = vector.load %arg2[%c0, %c0_0] : memref<128x128xbf16, #tpu.memory_space<vmem>>, vector<128x128xbf16>
    %c0_1 = arith.constant 0 : index
    %c0_2 = arith.constant 0 : index
    %1 = vector.load %arg3[%c0_1, %c0_2] : memref<128x128xbf16, #tpu.memory_space<vmem>>, vector<128x128xbf16>
    %2 = tpu.concatenate %0, %1 in 1 : vector<128x128xbf16>, vector<128x128xbf16> -> vector<128x256xbf16>
    %c0_3 = arith.constant 0 : index
    %c0_4 = arith.constant 0 : index
    %c0_5 = arith.constant 0 : index
    %3 = vector.load %arg1[%c0_3, %c0_4, %c0_5] : memref<8x32x128xbf16, #tpu.memory_space<vmem>>, vector<1x32x128xbf16>
    %4 = vector.shape_cast %3 : vector<1x32x128xbf16> to vector<32x128xbf16>
    %5 = vector.extract_strided_slice %2 {offsets = [0, 0], sizes = [128, 128], strides = [1, 1]} : vector<128x256xbf16> to vector<128x128xbf16>
    %cst = arith.constant dense<0.000000e+00> : vector<32x128xf32>
    %6 = tpu.matmul %4, %5, %cst {dimension_numbers = #tpu.dot_dimension_numbers<[1], [0], [0], [1], [0, 0, 1, 1], [], []>} : vector<32x128xbf16>, vector<128x128xbf16>, vector<32x128xf32> -> vector<32x128xf32>
    %c1 = arith.constant 1 : index
    %c0_6 = arith.constant 0 : index
    %c0_7 = arith.constant 0 : index
    %7 = vector.load %arg1[%c1, %c0_6, %c0_7] : memref<8x32x128xbf16, #tpu.memory_space<vmem>>, vector<1x32x128xbf16>
    %8 = vector.shape_cast %7 : vector<1x32x128xbf16> to vector<32x128xbf16>
    %9 = vector.extract_strided_slice %2 {offsets = [0, 1], sizes = [128, 128], strides = [1, 1]} : vector<128x256xbf16> to vector<128x128xbf16>
    %cst_8 = arith.constant dense<0.000000e+00> : vector<32x128xf32>
    %10 = tpu.matmul %8, %9, %cst_8 {dimension_numbers = #tpu.dot_dimension_numbers<[1], [0], [0], [1], [0, 0, 1, 1], [], []>} : vector<32x128xbf16>, vector<128x128xbf16>, vector<32x128xf32> -> vector<32x128xf32>
    %11 = arith.addf %6, %10 : vector<32x128xf32>
    %c2 = arith.constant 2 : index
    %c0_9 = arith.constant 0 : index
    %c0_10 = arith.constant 0 : index
    %12 = vector.load %arg1[%c2, %c0_9, %c0_10] : memref<8x32x128xbf16, #tpu.memory_space<vmem>>, vector<1x32x128xbf16>
    %13 = vector.shape_cast %12 : vector<1x32x128xbf16> to vector<32x128xbf16>
    %14 = vector.extract_strided_slice %2 {offsets = [0, 3], sizes = [128, 128], strides = [1, 1]} : vector<128x256xbf16> to vector<128x128xbf16>
    %cst_11 = arith.constant dense<0.000000e+00> : vector<32x128xf32>
    %15 = tpu.matmul %13, %14, %cst_11 {dimension_numbers = #tpu.dot_dimension_numbers<[1], [0], [0], [1], [0, 0, 1, 1], [], []>} : vector<32x128xbf16>, vector<128x128xbf16>, vector<32x128xf32> -> vector<32x128xf32>
    %16 = arith.addf %11, %15 : vector<32x128xf32>
    %c3 = arith.constant 3 : index
    %c0_12 = arith.constant 0 : index
    %c0_13 = arith.constant 0 : index
    %17 = vector.load %arg1[%c3, %c0_12, %c0_13] : memref<8x32x128xbf16, #tpu.memory_space<vmem>>, vector<1x32x128xbf16>
    %18 = vector.shape_cast %17 : vector<1x32x128xbf16> to vector<32x128xbf16>
    %19 = vector.extract_strided_slice %2 {offsets = [0, 4], sizes = [128, 128], strides = [1, 1]} : vector<128x256xbf16> to vector<128x128xbf16>
    %cst_14 = arith.constant dense<0.000000e+00> : vector<32x128xf32>
    %20 = tpu.matmul %18, %19, %cst_14 {dimension_numbers = #tpu.dot_dimension_numbers<[1], [0], [0], [1], [0, 0, 1, 1], [], []>} : vector<32x128xbf16>, vector<128x128xbf16>, vector<32x128xf32> -> vector<32x128xf32>
    %21 = arith.addf %16, %20 : vector<32x128xf32>
    %c4 = arith.constant 4 : index
    %c0_15 = arith.constant 0 : index
    %c0_16 = arith.constant 0 : index
    %22 = vector.load %arg1[%c4, %c0_15, %c0_16] : memref<8x32x128xbf16, #tpu.memory_space<vmem>>, vector<1x32x128xbf16>
    %23 = vector.shape_cast %22 : vector<1x32x128xbf16> to vector<32x128xbf16>
    %24 = vector.extract_strided_slice %2 {offsets = [0, 9], sizes = [128, 128], strides = [1, 1]} : vector<128x256xbf16> to vector<128x128xbf16>
    %cst_17 = arith.constant dense<0.000000e+00> : vector<32x128xf32>
    %25 = tpu.matmul %23, %24, %cst_17 {dimension_numbers = #tpu.dot_dimension_numbers<[1], [0], [0], [1], [0, 0, 1, 1], [], []>} : vector<32x128xbf16>, vector<128x128xbf16>, vector<32x128xf32> -> vector<32x128xf32>
    %26 = arith.addf %21, %25 : vector<32x128xf32>
    %c5 = arith.constant 5 : index
    %c0_18 = arith.constant 0 : index
    %c0_19 = arith.constant 0 : index
    %27 = vector.load %arg1[%c5, %c0_18, %c0_19] : memref<8x32x128xbf16, #tpu.memory_space<vmem>>, vector<1x32x128xbf16>
    %28 = vector.shape_cast %27 : vector<1x32x128xbf16> to vector<32x128xbf16>
    %29 = vector.extract_strided_slice %2 {offsets = [0, 10], sizes = [128, 128], strides = [1, 1]} : vector<128x256xbf16> to vector<128x128xbf16>
    %cst_20 = arith.constant dense<0.000000e+00> : vector<32x128xf32>
    %30 = tpu.matmul %28, %29, %cst_20 {dimension_numbers = #tpu.dot_dimension_numbers<[1], [0], [0], [1], [0, 0, 1, 1], [], []>} : vector<32x128xbf16>, vector<128x128xbf16>, vector<32x128xf32> -> vector<32x128xf32>
    %31 = arith.addf %26, %30 : vector<32x128xf32>
    %c6 = arith.constant 6 : index
    %c0_21 = arith.constant 0 : index
    %c0_22 = arith.constant 0 : index
    %32 = vector.load %arg1[%c6, %c0_21, %c0_22] : memref<8x32x128xbf16, #tpu.memory_space<vmem>>, vector<1x32x128xbf16>
    %33 = vector.shape_cast %32 : vector<1x32x128xbf16> to vector<32x128xbf16>
    %34 = vector.extract_strided_slice %2 {offsets = [0, 12], sizes = [128, 128], strides = [1, 1]} : vector<128x256xbf16> to vector<128x128xbf16>
    %cst_23 = arith.constant dense<0.000000e+00> : vector<32x128xf32>
    %35 = tpu.matmul %33, %34, %cst_23 {dimension_numbers = #tpu.dot_dimension_numbers<[1], [0], [0], [1], [0, 0, 1, 1], [], []>} : vector<32x128xbf16>, vector<128x128xbf16>, vector<32x128xf32> -> vector<32x128xf32>
    %36 = arith.addf %31, %35 : vector<32x128xf32>
    %c7 = arith.constant 7 : index
    %c0_24 = arith.constant 0 : index
    %c0_25 = arith.constant 0 : index
    %37 = vector.load %arg1[%c7, %c0_24, %c0_25] : memref<8x32x128xbf16, #tpu.memory_space<vmem>>, vector<1x32x128xbf16>
    %38 = vector.shape_cast %37 : vector<1x32x128xbf16> to vector<32x128xbf16>
    %39 = vector.extract_strided_slice %2 {offsets = [0, 13], sizes = [128, 128], strides = [1, 1]} : vector<128x256xbf16> to vector<128x128xbf16>
    %cst_26 = arith.constant dense<0.000000e+00> : vector<32x128xf32>
    %40 = tpu.matmul %38, %39, %cst_26 {dimension_numbers = #tpu.dot_dimension_numbers<[1], [0], [0], [1], [0, 0, 1, 1], [], []>} : vector<32x128xbf16>, vector<128x128xbf16>, vector<32x128xf32> -> vector<32x128xf32>
    %41 = arith.addf %36, %40 : vector<32x128xf32>
    %c0_27 = arith.constant 0 : index
    %c0_28 = arith.constant 0 : index
    %42 = vector.load %arg4[%c0_27, %c0_28] : memref<32x1xf32, #tpu.memory_space<vmem>>, vector<32x1xf32>
    %43 = vector.broadcast %42 : vector<32x1xf32> to vector<32x128xf32>
    %44 = arith.addf %41, %43 : vector<32x128xf32>
    %c0_29 = arith.constant 0 : index
    %c0_30 = arith.constant 0 : index
    %45 = vector.load %arg5[%c0_29, %c0_30] : memref<1x128xf32, #tpu.memory_space<vmem>>, vector<1x128xf32>
    %46 = vector.broadcast %45 : vector<1x128xf32> to vector<32x128xf32>
    %47 = arith.mulf %44, %46 : vector<32x128xf32>
    %cst_31 = arith.constant dense<0.000000e+00> : vector<32xf32>
    %48 = vector.multi_reduction <add>, %47, %cst_31 [1] : vector<32x128xf32> to vector<32xf32>
    %49 = vector.shape_cast %48 : vector<32xf32> to vector<32x1xf32>
    %cst_32 = arith.constant 6.250000e-02 : f32
    %50 = vector.broadcast %cst_32 : f32 to vector<32x1xf32>
    %51 = arith.mulf %49, %50 : vector<32x1xf32>
    %52 = vector.broadcast %51 : vector<32x1xf32> to vector<32x128xf32>
    %53 = arith.subf %44, %52 : vector<32x128xf32>
    %54 = arith.mulf %53, %53 : vector<32x128xf32>
    %55 = vector.broadcast %45 : vector<1x128xf32> to vector<32x128xf32>
    %56 = arith.mulf %54, %55 : vector<32x128xf32>
    %cst_33 = arith.constant dense<0.000000e+00> : vector<32xf32>
    %57 = vector.multi_reduction <add>, %56, %cst_33 [1] : vector<32x128xf32> to vector<32xf32>
    %58 = vector.shape_cast %57 : vector<32xf32> to vector<32x1xf32>
    %cst_34 = arith.constant 6.250000e-02 : f32
    %59 = vector.broadcast %cst_34 : f32 to vector<32x1xf32>
    %60 = arith.mulf %58, %59 : vector<32x1xf32>
    %cst_35 = arith.constant 9.99999974E-6 : f32
    %61 = vector.broadcast %cst_35 : f32 to vector<32x1xf32>
    %62 = arith.addf %60, %61 : vector<32x1xf32>
    %63 = math.rsqrt %62 : vector<32x1xf32>
    %64 = vector.broadcast %63 : vector<32x1xf32> to vector<32x128xf32>
    %65 = arith.mulf %53, %64 : vector<32x128xf32>
    %cst_36 = arith.constant 0.000000e+00 : f32
    %66 = vector.broadcast %cst_36 : f32 to vector<32x128xf32>
    %67 = arith.cmpf ogt, %65, %66 : vector<32x128xf32>
    %cst_37 = arith.constant 2.000000e-01 : f32
    %68 = vector.broadcast %cst_37 : f32 to vector<32x128xf32>
    %69 = arith.mulf %68, %65 : vector<32x128xf32>
    %70 = arith.select %67, %65, %69 : vector<32x128xi1>, vector<32x128xf32>
    %71 = tpu.iota {dimensions = array<i32: 1>} : vector<1x128xi32>
    %cst_38 = arith.constant 0.000000e+00 : f32
    %72 = vector.broadcast %cst_38 : f32 to vector<1x128xf32>
    %c0_39 = arith.constant 0 : index
    %c0_40 = arith.constant 0 : index
    %c0_41 = arith.constant 0 : index
    %73 = vector.load %arg6[%c0_39, %c0_40, %c0_41] : memref<2x32x128xf32, #tpu.memory_space<vmem>>, vector<1x32x128xf32>
    %74 = vector.shape_cast %73 : vector<1x32x128xf32> to vector<32x128xf32>
    %75 = arith.mulf %70, %74 : vector<32x128xf32>
    %cst_42 = arith.constant dense<0.000000e+00> : vector<32xf32>
    %76 = vector.multi_reduction <add>, %75, %cst_42 [1] : vector<32x128xf32> to vector<32xf32>
    %77 = vector.shape_cast %76 : vector<32xf32> to vector<32x1xf32>
    %cst_43 = arith.constant dense<0.000000e+00> : vector<1xf32>
    %78 = vector.multi_reduction <add>, %77, %cst_43 [0] : vector<32x1xf32> to vector<1xf32>
    %79 = vector.shape_cast %78 : vector<1xf32> to vector<1x1xf32>
    %c0_i32 = arith.constant 0 : i32
    %80 = vector.broadcast %c0_i32 : i32 to vector<1x128xi32>
    %81 = arith.cmpi eq, %71, %80 : vector<1x128xi32>
    %cst_44 = arith.constant 0.000000e+00 : f32
    %82 = vector.shape_cast %79 : vector<1x1xf32> to vector<1x1xf32>
    %83 = vector.broadcast %82 : vector<1x1xf32> to vector<1x128xf32>
    %84 = vector.broadcast %cst_44 : f32 to vector<1x128xf32>
    %85 = arith.select %81, %83, %84 : vector<1x128xi1>, vector<1x128xf32>
    %86 = arith.addf %72, %85 : vector<1x128xf32>
    %c1_45 = arith.constant 1 : index
    %c0_46 = arith.constant 0 : index
    %c0_47 = arith.constant 0 : index
    %87 = vector.load %arg6[%c1_45, %c0_46, %c0_47] : memref<2x32x128xf32, #tpu.memory_space<vmem>>, vector<1x32x128xf32>
    %88 = vector.shape_cast %87 : vector<1x32x128xf32> to vector<32x128xf32>
    %89 = arith.mulf %70, %88 : vector<32x128xf32>
    %cst_48 = arith.constant dense<0.000000e+00> : vector<32xf32>
    %90 = vector.multi_reduction <add>, %89, %cst_48 [1] : vector<32x128xf32> to vector<32xf32>
    %91 = vector.shape_cast %90 : vector<32xf32> to vector<32x1xf32>
    %cst_49 = arith.constant dense<0.000000e+00> : vector<1xf32>
    %92 = vector.multi_reduction <add>, %91, %cst_49 [0] : vector<32x1xf32> to vector<1xf32>
    %93 = vector.shape_cast %92 : vector<1xf32> to vector<1x1xf32>
    %c1_i32 = arith.constant 1 : i32
    %94 = vector.broadcast %c1_i32 : i32 to vector<1x128xi32>
    %95 = arith.cmpi eq, %71, %94 : vector<1x128xi32>
    %cst_50 = arith.constant 0.000000e+00 : f32
    %96 = vector.shape_cast %93 : vector<1x1xf32> to vector<1x1xf32>
    %97 = vector.broadcast %96 : vector<1x1xf32> to vector<1x128xf32>
    %98 = vector.broadcast %cst_50 : f32 to vector<1x128xf32>
    %99 = arith.select %95, %97, %98 : vector<1x128xi1>, vector<1x128xf32>
    %100 = arith.addf %86, %99 : vector<1x128xf32>
    %c0_51 = arith.constant 0 : index
    %c0_52 = arith.constant 0 : index
    %101 = vector.load %arg7[%c0_51, %c0_52] : memref<1x1xf32, #tpu.memory_space<vmem>>, vector<1x1xf32>
    %102 = vector.broadcast %101 : vector<1x1xf32> to vector<1x128xf32>
    %103 = arith.addf %100, %102 : vector<1x128xf32>
    %c0_53 = arith.constant 0 : index
    %c0_54 = arith.constant 0 : index
    %104 = vector.load %arg8[%c0_53, %c0_54] : memref<1x128xf32, #tpu.memory_space<vmem>>, vector<1x128xf32>
    tpu.vector_store %arg8[%c0_53, %c0_54], %103 {strides = array<i32>} : memref<1x128xf32, #tpu.memory_space<vmem>>, vector<1x128xf32>,
    return
  }
  func.func @transform_0(%arg0: i32) -> (i32, i32, i32) {
    %c0_i32 = arith.constant 0 : i32
    %c0_i32_0 = arith.constant 0 : i32
    %c0_i32_1 = arith.constant 0 : i32
    %c0_i32_2 = arith.constant 0 : i32
    return %c0_i32, %c0_i32_0, %c0_i32_1 : i32, i32, i32
  }
  func.func @transform_1(%arg0: i32) -> (i32, i32) {
    %c0_i32 = arith.constant 0 : i32
    %c0_i32_0 = arith.constant 0 : i32
    return %c0_i32, %arg0 : i32, i32
  }
  func.func @transform_2(%arg0: i32) -> (i32, i32) {
    %c1_i32 = arith.constant 1 : i32
    %0 = arith.addi %arg0, %c1_i32 : i32
    %c0_i32 = arith.constant 0 : i32
    %c0_i32_0 = arith.constant 0 : i32
    return %c0_i32, %0 : i32, i32
  }
  func.func @transform_3(%arg0: i32) -> (i32, i32) {
    %c0_i32 = arith.constant 0 : i32
    %c0_i32_0 = arith.constant 0 : i32
    %c0_i32_1 = arith.constant 0 : i32
    return %c0_i32, %c0_i32_0 : i32, i32
  }
  func.func @transform_4(%arg0: i32) -> (i32, i32) {
    %c0_i32 = arith.constant 0 : i32
    %c0_i32_0 = arith.constant 0 : i32
    %c0_i32_1 = arith.constant 0 : i32
    return %c0_i32, %c0_i32_0 : i32, i32
  }
  func.func @transform_5(%arg0: i32) -> (i32, i32, i32) {
    %c0_i32 = arith.constant 0 : i32
    %c0_i32_0 = arith.constant 0 : i32
    %c0_i32_1 = arith.constant 0 : i32
    %c0_i32_2 = arith.constant 0 : i32
    return %c0_i32, %c0_i32_0, %c0_i32_1 : i32, i32, i32
  }
  func.func @transform_6(%arg0: i32) -> (i32, i32) {
    %c0_i32 = arith.constant 0 : i32
    %c0_i32_0 = arith.constant 0 : i32
    %c0_i32_1 = arith.constant 0 : i32
    return %c0_i32, %c0_i32_0 : i32, i32
  }
  func.func @transform_7(%arg0: i32) -> (i32, i32) {
    %c0_i32 = arith.constant 0 : i32
    %c0_i32_0 = arith.constant 0 : i32
    %c0_i32_1 = arith.constant 0 : i32
    return %c0_i32, %c0_i32_0 : i32, i32
  }
}

</mosaic_0001>

<bundles_post_ra>
// kernel: discriminator_forward.4
= control target key start
LH: loop header
LB: loop body
LE: loop exit
PB: predicated region body
PF: predicated region fallthrough
CT: control target
= control target key end

     0   :  { %s2821_s18 = smov 0   ;;  %s2823_s19 = smov 0   ;;  %s3213_s0 = inlined_call_operand.vmem [shape: bf16[8,16,8], index: 0, kind: input, shape index: {}]   ;;  %s3214_s1 = inlined_call_operand.vmem [shape: bf16[8,11264], index: 1, kind: input, shape index: {}, may-alias: {1,2}]   ;;  %s3215_s2 = inlined_call_operand.vmem [shape: bf16[8,11264], index: 2, kind: input, shape index: {}, may-alias: {1,2}]   ;;  %s3216_s3 = inlined_call_operand.vmem [shape: f32[16,1], index: 3, kind: input, shape index: {}]   ;;  %s3217_s4 = inlined_call_operand.vmem [shape: f32[1,1024], index: 4, kind: input, shape index: {}]   ;;  %s3218_s5 = inlined_call_operand.vmem [shape: bf16[16,10240], index: 5, kind: output, shape index: {}]  }
   0x1   :  { %s2825_s20 = smov 0  }
   0x2 LB: > { %s2834_s4 = sadd.s32 4294967295, %s2781_s20   ;;  %s2836_s21 = sadd.s32 1, %s2781_s20   ;;  %s2781_s20 = sphi %s2825_s20, %s3222_s20   ;;  %s2777_s19 = sphi %s2823_s19, %s3221_s19   ;;  %s2773_s18 = sphi %s2821_s18, %s3220_s18  }
   0x3   : > { %s136_s22 = ssub.s32 %s2781_s20, %s2836_s21  ;;  %s139_s23 = sadd.s32 1, %s2777_s19 }
   0x4   : > { %p137_p0 = scmp.eq.s32.totalorder %s136_s22, 0  ;;  %p149_p1 = scmp.ne.s32.totalorder %s2777_s19, %s2773_s18 }
   0x5   : > { %p150_p2 = scmp.eq.s32.totalorder %s2834_s4, 9  ;;  %p2467_p3 = scmp.ge.s32.totalorder %s2781_s20, 1 }
   0x6   : > { %s2844_s24 = scalar_select %p137_p0, %s2777_s19, %s139_s23  }
   0x7   : > { %p2846_p4 = por %p150_p2, %p149_p1  ;;  %p203_p5 = scmp.lt.s32.totalorder %s2781_s20, 11 }
   0x9   : > { %p204_p6 = pnand %p2467_p3, %p203_p5 }
   0xa   : > { %s2469_s26 = sshll.u32 (!%p204_p6), %s2834_s4, 3  ;;  %v2783_v0 = vmov (!%p204_p6), 0   ;;  %s2784_s11 = smov (!%p204_p6), 127   ;;  %vm314_vm0 = vcmask (!%p204_p6), 1039360   ;;  %vm327_vm1 = vcmask (!%p204_p6), 1043456   ;;  %v2751_v24 = vld [vmem:[%s3213_s0 + $0x8] sm:$0xff] (!%p204_p6)  }
   0xb   : > { %207 = sbr.rel (%p204_p6) target bundleno = 506 (0x1fa), region = 40  ;;  %p237_p7 = scmp.lt.s32.totalorder (!%p204_p6), %s2469_s26, 87  ;;  %384 = vmatprep.mubr.bf16.mxu0 (!%p204_p6), %v2783_v0  ;;  %427 = vmatprep.mubr.bf16.mxu1 (!%p204_p6), %v2783_v0  ;;  %vm323_vm2 = vcmask (!%p204_p6), 64512   ;;  %v2228_v29 = vld [vmem:[%s3216_s3] sm:$0xff] (!%p204_p6)  ;;  %v2229_v32 = vld [vmem:[%s3216_s3 + $0x8] sm:$0xff] (!%p204_p6)  ;;  %vm754_vm3 = vcmask (!%p204_p6), 908288  }
   0xc   : > { %s2584_s27 = sadd.s32 (!%p204_p6), 8, %s2469_s26  ;;  %2738 = vset.pattern.permute.xlu1 (!%p204_p6), %v2783_v0  ;;  %2739 = vset.pattern.permute.xlu0 (!%p204_p6), %v2783_v0  ;;  %s2785_s12 = smov (!%p204_p6), 111   ;;  %v2752_v46 = vld [vmem:[%s3213_s0] sm:$0xff] (!%p204_p6)   ;;  %vm1004_vm4 = vcmask (!%p204_p6), 900096   ;;  %vm1254_vm5 = vcmask (!%p204_p6), 777216   ;;  %vm1504_vm6 = vcmask (!%p204_p6), 769024  }
   0xd   : > { %p244_p8 = scmp.lt.s32.totalorder (!%p204_p6), %s2584_s27, 87  ;;  %s2786_s13 = smov (!%p204_p6), 110   ;;  %vm1754_vm7 = vcmask (!%p204_p6), 637952   ;;  %vm2004_vm8 = vcmask (!%p204_p6), 629760  }
   0xe   : > { %s2787_s14 = smov (!%p204_p6), 95   ;;  %s2788_s15 = smov (!%p204_p6), 94  }
   0xf   : > { %s2789_s16 = smov (!%p204_p6), 78   ;;  %s2790_s17 = smov (!%p204_p6), 77  }
  0x10   : > { %s233_s20 = sand.u32 (!%p204_p6), 1, %s2773_s18  }
  0x11   : > { %s2468_s22 = sshll.u32 (!%p204_p6), %s233_s20, 6 }
  0x12   : > { %s3224_s26 = smov (!%p237_p7, %s2469_s26), 87  ;;  %s3226_s27 = smov (!%p244_p8, %s2584_s27), 87 }
  0x13   : > { %s2470_s28 = sshll.u32 %s3224_s26, 2  ;;  %s2472_s7 = sshll.u32 %s3226_s27, 2 }
  0x14   : > { %s240_s6 = scalar_lea.vmem %s3214_s1, %s2470_s28  ;;  %s2861_s10 = scalar_lea.vmem %s3215_s2, %s2472_s7 }
  0x15   : > { %v253_v1 = vld [vmem:[%s240_s6 + $0x8] sm:$0xff]  ;;  %v252_v2 = vld [vmem:[%s240_s6] sm:$0xff]  ;;  %v254_v5 = vld [vmem:[%s240_s6 + $0x10] sm:$0xff]  ;;  %s3170_s18 = scalar_lea.vmem [#allocation2], %s2468_s22  ;;  %s2593_s23 = sshll.u32 (%p2846_p4), %s2834_s4, 5 }
  0x16   : > { %v2863_v3 = vcombine.low %v253_v1, %v253_v1  ;;  %v2865_v4 = vcombine.low %v252_v2, %v252_v2  ;;  %v2869_v6 = vcombine.high %v253_v1, %v253_v1  ;;  %v2871_v7 = vcombine.high %v252_v2, %v252_v2  ;;  %v255_v10 = vld [vmem:[%s240_s6 + $0x18] sm:$0xff]  ;;  %v256_v13 = vld [vmem:[%s2861_s10] sm:$0xff]  ;;  %v2750_v16 = vld [vmem:[%s2861_s10 + $0x8] ss:$0 sps:$4 sm:$0xff]   ;;  %s2369_s28 = scalar_lea.vmem (%p2846_p4), %s3218_s5, %s2593_s23 }
  0x17   : > { %v2875_v8 = vcombine.high %v254_v5, %v254_v5  ;;  %v2877_v9 = vcombine.low %v254_v5, %v254_v5  ;;  %v2881_v11 = vcombine.high %v255_v10, %v255_v10  ;;  %v2883_v12 = vcombine.low %v255_v10, %v255_v10  ;;  %v2753_v1 = vld [vmem:[%s3213_s0 + $0x10] sm:$0xff]  }
  0x18   : > { %300 = vrot.lane.b32.xlu1 %v2863_v3, %s2784_s11  ;;  %296 = vrot.lane.b32.xlu0 %v2865_v4, %s2784_s11  ;;  %v2888_v14 = vcombine.low %v256_v13, %v256_v13  ;;  %v2482_v15 = vcombine.high %v256_v13, %v256_v13  ;;  %v533_v40 = vsel %vm327_vm1, %v2865_v4, 0  ;;  %v539_v45 = vsel %vm327_vm1, %v2863_v3, 0 }
  0x19   : > { %v545_v48 = vsel %vm327_vm1, %v2877_v9, 0  ;;  %v551_v53 = vsel %vm327_vm1, %v2883_v12, 0 }
  0x1c   : > { %302 = vrot.lane.b32.xlu1 %v2869_v6, %s2784_s11  ;;  %298 = vrot.lane.b32.xlu0 %v2871_v7, %s2784_s11 }
  0x20   : > { %306 = vrot.lane.b32.xlu1 %v2875_v8, %s2784_s11  ;;  %304 = vrot.lane.b32.xlu0 %v2877_v9, %s2784_s11 }
  0x24   : > { %310 = vrot.lane.b32.xlu1 %v2881_v11, %s2784_s11  ;;  %308 = vrot.lane.b32.xlu0 %v2883_v12, %s2784_s11 }
  0x28   : > { %312 = vrot.lane.b32.xlu0 %v2888_v14, %s2784_s11  ;;  %736 = vrot.lane.b32.xlu1 %v2865_v4, %s2785_s12 }
  0x2c   : > { %738 = vrot.lane.b32.xlu0 %v2871_v7, %s2785_s12  ;;  %740 = vrot.lane.b32.xlu1 %v2863_v3, %s2785_s12 }
  0x30   : > { %742 = vrot.lane.b32.xlu0 %v2869_v6, %s2785_s12  ;;  %744 = vrot.lane.b32.xlu1 %v2877_v9, %s2785_s12 }
  0x34   : > { %746 = vrot.lane.b32.xlu0 %v2875_v8, %s2785_s12  ;;  %748 = vrot.lane.b32.xlu1 %v2883_v12, %s2785_s12 }
  0x38   : > { %750 = vrot.lane.b32.xlu0 %v2881_v11, %s2785_s12  ;;  %752 = vrot.lane.b32.xlu1 %v2888_v14, %s2785_s12 }
  0x3c   : > { %986 = vrot.lane.b32.xlu0 %v2865_v4, %s2786_s13  ;;  %988 = vrot.lane.b32.xlu1 %v2871_v7, %s2786_s13 }
  0x40   : > { %990 = vrot.lane.b32.xlu0 %v2863_v3, %s2786_s13  ;;  %992 = vrot.lane.b32.xlu1 %v2869_v6, %s2786_s13 }
  0x44   : > { %994 = vrot.lane.b32.xlu0 %v2877_v9, %s2786_s13  ;;  %996 = vrot.lane.b32.xlu1 %v2875_v8, %s2786_s13 }
  0x48   : > { %998 = vrot.lane.b32.xlu0 %v2883_v12, %s2786_s13  ;;  %1000 = vrot.lane.b32.xlu1 %v2881_v11, %s2786_s13 }
  0x4c   : > { %1002 = vrot.lane.b32.xlu0 %v2888_v14, %s2786_s13  ;;  %1236 = vrot.lane.b32.xlu1 %v2863_v3, %s2787_s14 }
  0x50   : > { %1238 = vrot.lane.b32.xlu0 %v2869_v6, %s2787_s14  ;;  %1240 = vrot.lane.b32.xlu1 %v2877_v9, %s2787_s14 }
  0x54   : > { %1242 = vrot.lane.b32.xlu0 %v2875_v8, %s2787_s14  ;;  %1244 = vrot.lane.b32.xlu1 %v2883_v12, %s2787_s14 }
  0x58   : > { %1246 = vrot.lane.b32.xlu0 %v2881_v11, %s2787_s14  ;;  %1248 = vrot.lane.b32.xlu1 %v2888_v14, %s2787_s14 }
  0x5c   : > { %1250 = vrot.lane.b32.xlu0 %v2482_v15, %s2787_s14  ;;  %1252 = vrot.lane.b32.xlu1 %v2750_v16, %s2787_s14 }
  0x60   : > { %1486 = vrot.lane.b32.xlu0 %v2863_v3, %s2788_s15  ;;  %1488 = vrot.lane.b32.xlu1 %v2869_v6, %s2788_s15 }
  0x64   : > { %1490 = vrot.lane.b32.xlu0 %v2877_v9, %s2788_s15  ;;  %1492 = vrot.lane.b32.xlu1 %v2875_v8, %s2788_s15 }
  0x68   : > { %1494 = vrot.lane.b32.xlu0 %v2883_v12, %s2788_s15  ;;  %1496 = vrot.lane.b32.xlu1 %v2881_v11, %s2788_s15 }
  0x6c   : > { %1498 = vrot.lane.b32.xlu0 %v2888_v14, %s2788_s15  ;;  %1500 = vrot.lane.b32.xlu1 %v2482_v15, %s2788_s15 }
  0x70   : > { %1502 = vrot.lane.b32.xlu0 %v2750_v16, %s2788_s15  ;;  %1736 = vrot.lane.b32.xlu1 %v2863_v3, %s2789_s16 }
  0x74   : > { %1738 = vrot.lane.b32.xlu0 %v2869_v6, %s2789_s16  ;;  %1740 = vrot.lane.b32.xlu1 %v2877_v9, %s2789_s16 }
  0x78   : > { %1742 = vrot.lane.b32.xlu0 %v2875_v8, %s2789_s16  ;;  %1744 = vrot.lane.b32.xlu1 %v2883_v12, %s2789_s16 }
  0x7c   : > { %1746 = vrot.lane.b32.xlu0 %v2881_v11, %s2789_s16  ;;  %1748 = vrot.lane.b32.xlu1 %v2888_v14, %s2789_s16 }
  0x80   : > { %1750 = vrot.lane.b32.xlu0 %v2482_v15, %s2789_s16  ;;  %1752 = vrot.lane.b32.xlu1 %v2750_v16, %s2789_s16 }
  0x84   : > { %1986 = vrot.lane.b32.xlu0 %v2863_v3, %s2790_s17  ;;  %1988 = vrot.lane.b32.xlu1 %v2869_v6, %s2790_s17 }
  0x88   : > { %1990 = vrot.lane.b32.xlu0 %v2877_v9, %s2790_s17  ;;  %1992 = vrot.lane.b32.xlu1 %v2875_v8, %s2790_s17 }
  0x8a   : > { %v301_v17 = vpop.permute.xlu1 %300  ;;  %v297_v18 = vpop.permute.xlu0 %296 }
  0x8c   : > { %1994 = vrot.lane.b32.xlu0 %v2883_v12, %s2790_s17  ;;  %1996 = vrot.lane.b32.xlu1 %v2881_v11, %s2790_s17 }
  0x8e   : > { %v303_v19 = vpop.permute.xlu1 %302  ;;  %v299_v20 = vpop.permute.xlu0 %298 }
  0x8f   : > { %v316_v21 = vsel %vm314_vm0, %v299_v20, %v301_v17  ;;  %v315_v22 = vsel %vm314_vm0, %v297_v18, %v299_v20  ;;  %v317_v27 = vsel %vm314_vm0, %v301_v17, %v303_v19 }
  0x90   : > { %1998 = vrot.lane.b32.xlu0 %v2888_v14, %s2790_s17  ;;  %2487 = vmatprep.subr.msk.bf16.mxu0 %vm327_vm1, %v316_v21  ;;  %v329_v23 = vsel %vm327_vm1, %v315_v22, 0  ;;  %v335_v31 = vsel %vm327_vm1, %v317_v27, 0  ;;  %v2754_v22 = vld [vmem:[%s3213_s0 + $0x18] sm:$0xff]  }
  0x91   : > { %353 = vmatpush1.bf16.msra.mxu0 %v329_v23  ;;  %2000 = vrot.lane.b32.xlu1 %v2482_v15, %s2790_s17 }
  0x92   : > { %v307_v25 = vpop.permute.xlu1 %306  ;;  %v305_v26 = vpop.permute.xlu0 %304 }
  0x93   : > { %v318_v28 = vsel %vm314_vm0, %v303_v19, %v305_v26  ;;  %v319_v30 = vsel %vm314_vm0, %v305_v26, %v307_v25 }
  0x94   : > { %2002 = vrot.lane.b32.xlu0 %v2750_v16, %s2790_s17  ;;  %2488 = vmatmul.mubr.msk.bf16.vlgmr.msra.gmra.mrb[0].mxu0 %vm323_vm2, %v2751_v24  ;;  %v341_v36 = vsel %vm327_vm1, %v319_v30, 0 }
  0x95   : > { %2489 = vmatprep.subr.msk.bf16.mxu1 %vm327_vm1, %v318_v28  ;;  %470 = vmatprep.mubr.bf16.mxu0 %v2783_v0 }
  0x96   : > { %396 = vmatpush1.bf16.msra.mxu1 %v335_v31  ;;  %v311_v33 = vpop.permute.xlu1 %310  ;;  %v309_v34 = vpop.permute.xlu0 %308  ;;  %2232 = vperm.xlu1 %2738, %v2228_v29  }
  0x97   : > { %v320_v35 = vsel %vm314_vm0, %v307_v25, %v309_v34  ;;  %v321_v37 = vsel %vm314_vm0, %v309_v34, %v311_v33 }
  0x98   : > { %2491 = vmatprep.subr.msk.bf16.mxu0 %vm327_vm1, %v320_v35  ;;  %2237 = vperm.xlu0 %2739, %v2229_v32   ;;  %v347_v42 = vsel %vm327_vm1, %v321_v37, 0 }
  0x99   : > { %2490 = vmatmul.mubr.msk.bf16.vlgmr.msra.gmra.mrb[0].mxu1 %vm323_vm2, %v2751_v24  ;;  %439 = vmatpush1.bf16.msra.mxu0 %v341_v36 }
  0x9a   : > { %v313_v38 = vpop.permute.xlu0 %312  ;;  %v737_v39 = vpop.permute.xlu1 %736  ;;  %513 = vmatprep.mubr.bf16.mxu1 %v2783_v0  ;;  %2496 = vmatprep.subr.msk.bf16.mxu0 %vm327_vm1, %v2871_v7 }
  0x9b   : > { %v322_v41 = vsel %vm314_vm0, %v311_v33, %v313_v38 }
  0x9c   : > { %2492 = vmatmul.mubr.msk.bf16.vlgmr.msra.gmra.mrb[4].mxu0 %vm323_vm2, %v2751_v24  ;;  %2493 = vmatprep.subr.msk.bf16.mxu1 %vm327_vm1, %v322_v41 }
  0x9d   : > { %482 = vmatpush1.bf16.msra.mxu1 %v347_v42  ;;  %557 = vmatpush1.bf16.msra.mxu0 %v533_v40 }
  0x9e   : > { %v739_v43 = vpop.permute.xlu0 %738  ;;  %v741_v44 = vpop.permute.xlu1 %740  ;;  %588 = vmatprep.mubr.bf16.mxu0 %v2783_v0  ;;  %2498 = vmatprep.subr.msk.bf16.mxu1 %vm327_vm1, %v2869_v6 }
  0x9f   : > { %2500 = vmatprep.subr.msk.bf16.mxu0 %vm327_vm1, %v2875_v8  ;;  %v756_v50 = vsel %vm754_vm3, %v739_v43, %v741_v44  ;;  %v755_v55 = vsel %vm754_vm3, %v737_v39, %v739_v43  ;;  %v2755_v43 = vld [vmem:[%s3213_s0 + $0x20] sm:$0xff]  }
  0xa0   : > { %v767_v59 = vsel %vm327_vm1, %v755_v55, 0 }
  0xa1   : > { %2494 = vmatmul.mubr.msk.bf16.vlgmr.msra.gmra.mrb[4].mxu1 %vm323_vm2, %v2751_v24 }
  0xa2   : > { %v743_v47 = vpop.permute.xlu0 %742  ;;  %600 = vmatpush1.bf16.msra.mxu1 %v539_v45  ;;  %v745_v49 = vpop.permute.xlu1 %744  ;;  %631 = vmatprep.mubr.bf16.mxu1 %v2783_v0 }
  0xa3   : > { %2502 = vmatprep.subr.msk.bf16.mxu1 %vm327_vm1, %v2881_v11  ;;  %v758_v54 = vsel %vm754_vm3, %v743_v47, %v745_v49  ;;  %v757_v60 = vsel %vm754_vm3, %v741_v44, %v743_v47 }
  0xa4   : > { %2497 = vmatmul.mubr.msk.bf16.vlgmr.msra.gmra.mrb[0].mxu0 %vm323_vm2, %v2752_v46  ;;  %v773_v2 = vsel %vm327_vm1, %v757_v60, 0 }
  0xa5   : > { %643 = vmatpush1.bf16.msra.mxu0 %v545_v48  ;;  %674 = vmatprep.mubr.bf16.mxu0 %v2783_v0 }
  0xa6   : > { %2507 = vmatprep.subr.msk.bf16.mxu0 %vm327_vm1, %v756_v50  ;;  %v747_v51 = vpop.permute.xlu0 %746  ;;  %v749_v52 = vpop.permute.xlu1 %748 }
  0xa7   : > { %v760_v58 = vsel %vm754_vm3, %v747_v51, %v749_v52  ;;  %v759_v3 = vsel %vm754_vm3, %v745_v49, %v747_v51 }
  0xa8   : > { %v779_v7 = vsel %vm327_vm1, %v759_v3, 0 }
  0xa9   : > { %2499 = vmatmul.mubr.msk.bf16.vlgmr.msra.gmra.mrb[0].mxu1 %vm323_vm2, %v2752_v46 }
  0xaa   : > { %686 = vmatpush1.bf16.msra.mxu1 %v551_v53  ;;  %v751_v56 = vpop.permute.xlu0 %750  ;;  %v753_v57 = vpop.permute.xlu1 %752  ;;  %717 = vmatprep.mubr.bf16.mxu1 %v2783_v0 }
  0xab   : > { %2509 = vmatprep.subr.msk.bf16.mxu1 %vm327_vm1, %v758_v54  ;;  %v762_v63 = vsel %vm754_vm3, %v751_v56, %v753_v57  ;;  %v761_v8 = vsel %vm754_vm3, %v749_v52, %v751_v56 }
  0xac   : > { %2501 = vmatmul.mubr.msk.bf16.vlgmr.msra.gmra.mrb[4].mxu0 %vm323_vm2, %v2752_v46  ;;  %v785_v12 = vsel %vm327_vm1, %v761_v8, 0 }
  0xad   : > { %791 = vmatpush1.bf16.msra.mxu0 %v767_v59  ;;  %822 = vmatprep.mubr.bf16.mxu0 %v2783_v0 }
  0xae   : > { %2511 = vmatprep.subr.msk.bf16.mxu0 %vm327_vm1, %v760_v58  ;;  %v987_v61 = vpop.permute.xlu0 %986  ;;  %v989_v62 = vpop.permute.xlu1 %988 }
  0xaf   : > { %v1005_v13 = vsel %vm1004_vm4, %v987_v61, %v989_v62 }
  0xb0   : > { %v1017_v17 = vsel %vm327_vm1, %v1005_v13, 0 }
  0xb1   : > { %2503 = vmatmul.mubr.msk.bf16.vlgmr.msra.gmra.mrb[4].mxu1 %vm323_vm2, %v2752_v46 }
  0xb2   : > { %834 = vmatpush1.bf16.msra.mxu1 %v773_v2  ;;  %v991_v4 = vpop.permute.xlu0 %990  ;;  %v993_v5 = vpop.permute.xlu1 %992  ;;  %865 = vmatprep.mubr.bf16.mxu1 %v2783_v0 }
  0xb3   : > { %2513 = vmatprep.subr.msk.bf16.mxu1 %vm327_vm1, %v762_v63  ;;  %v1006_v6 = vsel %vm1004_vm4, %v989_v62, %v991_v4  ;;  %v1007_v18 = vsel %vm1004_vm4, %v991_v4, %v993_v5  ;;  %v2756_v63 = vld [vmem:[%s3213_s0 + $0x28] sm:$0xff]  }
  0xb4   : > { %2508 = vmatmul.mubr.msk.bf16.vlgmr.msra.gmra.mrb[0].mxu0 %vm323_vm2, %v2753_v1  ;;  %v1023_v23 = vsel %vm327_vm1, %v1007_v18, 0 }
  0xb5   : > { %877 = vmatpush1.bf16.msra.mxu0 %v779_v7  ;;  %908 = vmatprep.mubr.bf16.mxu0 %v2783_v0 }
  0xb6   : > { %v995_v9 = vpop.permute.xlu0 %994  ;;  %2518 = vmatprep.subr.msk.bf16.mxu0 %vm327_vm1, %v1006_v6  ;;  %v997_v10 = vpop.permute.xlu1 %996 }
  0xb7   : > { %v1008_v11 = vsel %vm1004_vm4, %v993_v5, %v995_v9  ;;  %v1009_v24 = vsel %vm1004_vm4, %v995_v9, %v997_v10 }
  0xb8   : > { %v1029_v28 = vsel %vm327_vm1, %v1009_v24, 0 }
  0xb9   : > { %2510 = vmatmul.mubr.msk.bf16.vlgmr.msra.gmra.mrb[0].mxu1 %vm323_vm2, %v2753_v1 }
  0xba   : > { %920 = vmatpush1.bf16.msra.mxu1 %v785_v12  ;;  %v999_v14 = vpop.permute.xlu0 %998  ;;  %v1001_v15 = vpop.permute.xlu1 %1000  ;;  %951 = vmatprep.mubr.bf16.mxu1 %v2783_v0 }
  0xbb   : > { %v1010_v16 = vsel %vm1004_vm4, %v997_v10, %v999_v14  ;;  %2520 = vmatprep.subr.msk.bf16.mxu1 %vm327_vm1, %v1008_v11  ;;  %v1011_v29 = vsel %vm1004_vm4, %v999_v14, %v1001_v15 }
  0xbc   : > { %2512 = vmatmul.mubr.msk.bf16.vlgmr.msra.gmra.mrb[4].mxu0 %vm323_vm2, %v2753_v1  ;;  %v1035_v33 = vsel %vm327_vm1, %v1011_v29, 0 }
  0xbd   : > { %1041 = vmatpush1.bf16.msra.mxu0 %v1017_v17  ;;  %1072 = vmatprep.mubr.bf16.mxu0 %v2783_v0 }
  0xbe   : > { %v1003_v19 = vpop.permute.xlu0 %1002  ;;  %2522 = vmatprep.subr.msk.bf16.mxu0 %vm327_vm1, %v1010_v16  ;;  %v1237_v20 = vpop.permute.xlu1 %1236 }
  0xbf   : > { %v1012_v21 = vsel %vm1004_vm4, %v1001_v15, %v1003_v19 }
  0xc1   : > { %2514 = vmatmul.mubr.msk.bf16.vlgmr.msra.gmra.mrb[4].mxu1 %vm323_vm2, %v2753_v1 }
  0xc2   : > { %1084 = vmatpush1.bf16.msra.mxu1 %v1023_v23  ;;  %v1239_v25 = vpop.permute.xlu0 %1238  ;;  %v1241_v26 = vpop.permute.xlu1 %1240  ;;  %1115 = vmatprep.mubr.bf16.mxu1 %v2783_v0  ;;  %v2757_v23 = vld [vmem:[%s3213_s0 + $0x30] sm:$0xff]  }
  0xc3   : > { %2524 = vmatprep.subr.msk.bf16.mxu1 %vm327_vm1, %v1012_v21  ;;  %v1256_v27 = vsel %vm1254_vm5, %v1239_v25, %v1241_v26  ;;  %v1255_v34 = vsel %vm1254_vm5, %v1237_v20, %v1239_v25 }
  0xc4   : > { %2519 = vmatmul.mubr.msk.bf16.vlgmr.msra.gmra.mrb[0].mxu0 %vm323_vm2, %v2754_v22  ;;  %v1267_v38 = vsel %vm327_vm1, %v1255_v34, 0 }
  0xc5   : > { %1127 = vmatpush1.bf16.msra.mxu0 %v1029_v28  ;;  %1158 = vmatprep.mubr.bf16.mxu0 %v2783_v0 }
  0xc6   : > { %v1243_v30 = vpop.permute.xlu0 %1242  ;;  %2529 = vmatprep.subr.msk.bf16.mxu0 %vm327_vm1, %v1256_v27  ;;  %v1245_v31 = vpop.permute.xlu1 %1244 }
  0xc7   : > { %v1258_v32 = vsel %vm1254_vm5, %v1243_v30, %v1245_v31  ;;  %v1257_v39 = vsel %vm1254_vm5, %v1241_v26, %v1243_v30 }
  0xc8   : > { %v1273_v44 = vsel %vm327_vm1, %v1257_v39, 0 }
  0xc9   : > { %2521 = vmatmul.mubr.msk.bf16.vlgmr.msra.gmra.mrb[0].mxu1 %vm323_vm2, %v2754_v22 }
  0xca   : > { %1170 = vmatpush1.bf16.msra.mxu1 %v1035_v33  ;;  %v1247_v35 = vpop.permute.xlu0 %1246  ;;  %v1249_v36 = vpop.permute.xlu1 %1248  ;;  %1201 = vmatprep.mubr.bf16.mxu1 %v2783_v0 }
  0xcb   : > { %2531 = vmatprep.subr.msk.bf16.mxu1 %vm327_vm1, %v1258_v32  ;;  %v1260_v37 = vsel %vm1254_vm5, %v1247_v35, %v1249_v36  ;;  %v1259_v45 = vsel %vm1254_vm5, %v1245_v31, %v1247_v35 }
  0xcc   : > { %2523 = vmatmul.mubr.msk.bf16.vlgmr.msra.gmra.mrb[4].mxu0 %vm323_vm2, %v2754_v22  ;;  %v1279_v48 = vsel %vm327_vm1, %v1259_v45, 0 }
  0xcd   : > { %1291 = vmatpush1.bf16.msra.mxu0 %v1267_v38  ;;  %1322 = vmatprep.mubr.bf16.mxu0 %v2783_v0 }
  0xce   : > { %v1251_v40 = vpop.permute.xlu0 %1250  ;;  %2533 = vmatprep.subr.msk.bf16.mxu0 %vm327_vm1, %v1260_v37  ;;  %v1253_v41 = vpop.permute.xlu1 %1252 }
  0xcf   : > { %v1262_v42 = vsel %vm1254_vm5, %v1251_v40, %v1253_v41  ;;  %v1261_v49 = vsel %vm1254_vm5, %v1249_v36, %v1251_v40 }
  0xd0   : > { %v1285_v53 = vsel %vm327_vm1, %v1261_v49, 0 }
  0xd1   : > { %2525 = vmatmul.mubr.msk.bf16.vlgmr.msra.gmra.mrb[4].mxu1 %vm323_vm2, %v2754_v22 }
  0xd2   : > { %1334 = vmatpush1.bf16.msra.mxu1 %v1273_v44  ;;  %v1487_v46 = vpop.permute.xlu0 %1486  ;;  %v1489_v47 = vpop.permute.xlu1 %1488  ;;  %1365 = vmatprep.mubr.bf16.mxu1 %v2783_v0 }
  0xd3   : > { %2535 = vmatprep.subr.msk.bf16.mxu1 %vm327_vm1, %v1262_v42  ;;  %v1505_v54 = vsel %vm1504_vm6, %v1487_v46, %v1489_v47 }
  0xd4   : > { %2530 = vmatmul.mubr.msk.bf16.vlgmr.msra.gmra.mrb[0].mxu0 %vm323_vm2, %v2755_v43  ;;  %v1517_v58 = vsel %vm327_vm1, %v1505_v54, 0 }
  0xd5   : > { %1377 = vmatpush1.bf16.msra.mxu0 %v1279_v48  ;;  %1408 = vmatprep.mubr.bf16.mxu0 %v2783_v0 }
  0xd6   : > { %v1491_v50 = vpop.permute.xlu0 %1490  ;;  %v1493_v51 = vpop.permute.xlu1 %1492 }
  0xd7   : > { %v1506_v52 = vsel %vm1504_vm6, %v1489_v47, %v1491_v50  ;;  %v1507_v59 = vsel %vm1504_vm6, %v1491_v50, %v1493_v51 }
  0xd8   : > { %2540 = vmatprep.subr.msk.bf16.mxu0 %vm327_vm1, %v1506_v52  ;;  %v1523_v1 = vsel %vm327_vm1, %v1507_v59, 0 }
  0xd9   : > { %2532 = vmatmul.mubr.msk.bf16.vlgmr.msra.gmra.mrb[0].mxu1 %vm323_vm2, %v2755_v43 }
  0xda   : > { %1420 = vmatpush1.bf16.msra.mxu1 %v1285_v53  ;;  %v1495_v55 = vpop.permute.xlu0 %1494  ;;  %v1497_v56 = vpop.permute.xlu1 %1496  ;;  %1451 = vmatprep.mubr.bf16.mxu1 %v2783_v0 }
  0xdb   : > { %v1508_v57 = vsel %vm1504_vm6, %v1493_v51, %v1495_v55  ;;  %v1509_v2 = vsel %vm1504_vm6, %v1495_v55, %v1497_v56 }
  0xdc   : > { %2534 = vmatmul.mubr.msk.bf16.vlgmr.msra.gmra.mrb[4].mxu0 %vm323_vm2, %v2755_v43  ;;  %2542 = vmatprep.subr.msk.bf16.mxu1 %vm327_vm1, %v1508_v57  ;;  %v1529_v6 = vsel %vm327_vm1, %v1509_v2, 0 }
  0xdd   : > { %1541 = vmatpush1.bf16.msra.mxu0 %v1517_v58  ;;  %1572 = vmatprep.mubr.bf16.mxu0 %v2783_v0 }
  0xde   : > { %v1499_v60 = vpop.permute.xlu0 %1498  ;;  %v1501_v61 = vpop.permute.xlu1 %1500 }
  0xdf   : > { %v1510_v62 = vsel %vm1504_vm6, %v1497_v56, %v1499_v60  ;;  %v1511_v7 = vsel %vm1504_vm6, %v1499_v60, %v1501_v61 }
  0xe0   : > { %2544 = vmatprep.subr.msk.bf16.mxu0 %vm327_vm1, %v1510_v62  ;;  %v1535_v12 = vsel %vm327_vm1, %v1511_v7, 0 }
  0xe1   : > { %2536 = vmatmul.mubr.msk.bf16.vlgmr.msra.gmra.mrb[4].mxu1 %vm323_vm2, %v2755_v43  ;;  %v2758_v43 = vld [vmem:[%s3213_s0 + $0x38] sm:$0xff]  }
  0xe2   : > { %1584 = vmatpush1.bf16.msra.mxu1 %v1523_v1  ;;  %v1503_v3 = vpop.permute.xlu0 %1502  ;;  %v1737_v4 = vpop.permute.xlu1 %1736  ;;  %1615 = vmatprep.mubr.bf16.mxu1 %v2783_v0 }
  0xe3   : > { %v1512_v5 = vsel %vm1504_vm6, %v1501_v61, %v1503_v3 }
  0xe4   : > { %2541 = vmatmul.mubr.msk.bf16.vlgmr.msra.gmra.mrb[0].mxu0 %vm323_vm2, %v2756_v63  ;;  %2546 = vmatprep.subr.msk.bf16.mxu1 %vm327_vm1, %v1512_v5 }
  0xe5   : > { %1627 = vmatpush1.bf16.msra.mxu0 %v1529_v6  ;;  %1658 = vmatprep.mubr.bf16.mxu0 %v2783_v0 }
  0xe6   : > { %v1739_v8 = vpop.permute.xlu0 %1738  ;;  %v1741_v9 = vpop.permute.xlu1 %1740 }
  0xe7   : > { %v1755_v10 = vsel %vm1754_vm7, %v1737_v4, %v1739_v8  ;;  %v1756_v11 = vsel %vm1754_vm7, %v1739_v8, %v1741_v9 }
  0xe8   : > { %2551 = vmatprep.subr.msk.bf16.mxu0 %vm327_vm1, %v1756_v11  ;;  %v1767_v13 = vsel %vm327_vm1, %v1755_v10, 0 }
  0xe9   : > { %2543 = vmatmul.mubr.msk.bf16.vlgmr.msra.gmra.mrb[0].mxu1 %vm323_vm2, %v2756_v63 }
  0xea   : > { %1670 = vmatpush1.bf16.msra.mxu1 %v1535_v12  ;;  %v1743_v14 = vpop.permute.xlu0 %1742  ;;  %v1745_v15 = vpop.permute.xlu1 %1744  ;;  %1701 = vmatprep.mubr.bf16.mxu1 %v2783_v0 }
  0xeb   : > { %v1758_v16 = vsel %vm1754_vm7, %v1743_v14, %v1745_v15  ;;  %v1757_v17 = vsel %vm1754_vm7, %v1741_v9, %v1743_v14 }
  0xec   : > { %2545 = vmatmul.mubr.msk.bf16.vlgmr.msra.gmra.mrb[4].mxu0 %vm323_vm2, %v2756_v63  ;;  %2553 = vmatprep.subr.msk.bf16.mxu1 %vm327_vm1, %v1758_v16  ;;  %v1773_v20 = vsel %vm327_vm1, %v1757_v17, 0 }
  0xed   : > { %1791 = vmatpush1.bf16.msra.mxu0 %v1767_v13  ;;  %1822 = vmatprep.mubr.bf16.mxu0 %v2783_v0 }
  0xee   : > { %v1747_v18 = vpop.permute.xlu0 %1746  ;;  %v1749_v19 = vpop.permute.xlu1 %1748 }
  0xef   : > { %v1759_v21 = vsel %vm1754_vm7, %v1745_v15, %v1747_v18  ;;  %v1760_v22 = vsel %vm1754_vm7, %v1747_v18, %v1749_v19 }
  0xf0   : > { %2555 = vmatprep.subr.msk.bf16.mxu0 %vm327_vm1, %v1760_v22  ;;  %v1779_v24 = vsel %vm327_vm1, %v1759_v21, 0 }
  0xf1   : > { %2547 = vmatmul.mubr.msk.bf16.vlgmr.msra.gmra.mrb[4].mxu1 %vm323_vm2, %v2756_v63 }
  0xf2   : > { %1834 = vmatpush1.bf16.msra.mxu1 %v1773_v20  ;;  %v1751_v25 = vpop.permute.xlu0 %1750  ;;  %v1753_v26 = vpop.permute.xlu1 %1752  ;;  %1865 = vmatprep.mubr.bf16.mxu1 %v2783_v0 }
  0xf3   : > { %v1762_v27 = vsel %vm1754_vm7, %v1751_v25, %v1753_v26  ;;  %v1761_v28 = vsel %vm1754_vm7, %v1749_v19, %v1751_v25 }
  0xf4   : > { %2552 = vmatmul.mubr.msk.bf16.vlgmr.msra.gmra.mrb[0].mxu0 %vm323_vm2, %v2757_v23  ;;  %2557 = vmatprep.subr.msk.bf16.mxu1 %vm327_vm1, %v1762_v27  ;;  %v1785_v31 = vsel %vm327_vm1, %v1761_v28, 0 }
  0xf5   : > { %1877 = vmatpush1.bf16.msra.mxu0 %v1779_v24  ;;  %1908 = vmatprep.mubr.bf16.mxu0 %v2783_v0 }
  0xf6   : > { %v1987_v29 = vpop.permute.xlu0 %1986  ;;  %v1989_v30 = vpop.permute.xlu1 %1988 }
  0xf7   : > { %v2005_v32 = vsel %vm2004_vm8, %v1987_v29, %v1989_v30 }
  0xf8   : > { %v2017_v33 = vsel %vm327_vm1, %v2005_v32, 0 }
  0xf9   : > { %2554 = vmatmul.mubr.msk.bf16.vlgmr.msra.gmra.mrb[0].mxu1 %vm323_vm2, %v2757_v23 }
  0xfa   : > { %1920 = vmatpush1.bf16.msra.mxu1 %v1785_v31  ;;  %v1991_v34 = vpop.permute.xlu0 %1990  ;;  %v1993_v35 = vpop.permute.xlu1 %1992  ;;  %1951 = vmatprep.mubr.bf16.mxu1 %v2783_v0 }
  0xfb   : > { %v2006_v36 = vsel %vm2004_vm8, %v1989_v30, %v1991_v34  ;;  %v2007_v37 = vsel %vm2004_vm8, %v1991_v34, %v1993_v35 }
  0xfc   : > { %2556 = vmatmul.mubr.msk.bf16.vlgmr.msra.gmra.mrb[4].mxu0 %vm323_vm2, %v2757_v23  ;;  %2562 = vmatprep.subr.msk.bf16.mxu0 %vm327_vm1, %v2006_v36  ;;  %v2023_v40 = vsel %vm327_vm1, %v2007_v37, 0 }
  0xfd   : > { %2041 = vmatpush1.bf16.msra.mxu0 %v2017_v33  ;;  %2072 = vmatprep.mubr.bf16.mxu0 %v2783_v0 }
  0xfe   : > { %v1995_v38 = vpop.permute.xlu0 %1994  ;;  %v1997_v39 = vpop.permute.xlu1 %1996 }
  0xff   : > { %v2008_v41 = vsel %vm2004_vm8, %v1993_v35, %v1995_v38  ;;  %v2009_v42 = vsel %vm2004_vm8, %v1995_v38, %v1997_v39 }
 0x100   : > { %2564 = vmatprep.subr.msk.bf16.mxu1 %vm327_vm1, %v2008_v41  ;;  %v2029_v44 = vsel %vm327_vm1, %v2009_v42, 0 }
 0x101   : > { %2558 = vmatmul.mubr.msk.bf16.vlgmr.msra.gmra.mrb[4].mxu1 %vm323_vm2, %v2757_v23 }
 0x102   : > { %2084 = vmatpush1.bf16.msra.mxu1 %v2023_v40  ;;  %v1999_v45 = vpop.permute.xlu0 %1998  ;;  %2115 = vmatprep.mubr.bf16.mxu1 %v2783_v0 }
 0x103   : > { %v2010_v46 = vsel %vm2004_vm8, %v1997_v39, %v1999_v45  ;;  %v2001_v47 = vpop.permute.xlu1 %2000 }
 0x104   : > { %2563 = vmatmul.mubr.msk.bf16.vlgmr.msra.gmra.mrb[0].mxu0 %vm323_vm2, %v2758_v43  ;;  %2566 = vmatprep.subr.msk.bf16.mxu0 %vm327_vm1, %v2010_v46  ;;  %v2011_v48 = vsel %vm2004_vm8, %v1999_v45, %v2001_v47 }
 0x105   : > { %2127 = vmatpush1.bf16.msra.mxu0 %v2029_v44  ;;  %2158 = vmatprep.mubr.bf16.mxu0 %v2783_v0  ;;  %v2035_v50 = vsel %vm327_vm1, %v2011_v48, 0 }
 0x106   : > { %v2003_v49 = vpop.permute.xlu0 %2002 }
 0x107   : > { %v2012_v51 = vsel %vm2004_vm8, %v2001_v47, %v2003_v49 }
 0x108   : > { %2568 = vmatprep.subr.msk.bf16.mxu1 %vm327_vm1, %v2012_v51 }
 0x109   : > { %2565 = vmatmul.mubr.msk.bf16.vlgmr.msra.gmra.mrb[0].mxu1 %vm323_vm2, %v2758_v43 }
 0x10a   : > { %2170 = vmatpush1.bf16.msra.mxu1 %v2035_v50  ;;  %2201 = vmatprep.mubr.bf16.mxu1 %v2783_v0 }
 0x10c   : > { %2567 = vmatmul.mubr.msk.bf16.vlgmr.msra.gmra.mrb[4].mxu0 %vm323_vm2, %v2758_v43 }
 0x111   : > { %2569 = vmatmul.mubr.msk.bf16.vlgmr.msra.gmra.mrb[4].mxu1 %vm323_vm2, %v2758_v43 }
 0x115   : > { %v3158_v52 = vpop.permute.xlu1 %2232 }
 0x117   : > { %v3161_v54 = vpop.permute.xlu0 %2237 }
 0x1d7   : > { %v2074_v53 = vpop.f32.mrb[0].mxu0 }
 0x1d8   : > { %v2240_v55 = vadd.f32 %v3158_v52, %v2074_v53  ;;  %v2076_v56 = vpop.f32.mrb[1].mxu0 }
 0x1d9   : > { %v2241_v57 = vadd.f32 %v3158_v52, %v2076_v56  ;;  %v2078_v58 = vpop.f32.mrb[2].mxu0 }
 0x1da   : > { %vm2256_vm9 = vcmp.gt.f32.partialorder %v2240_v55, 0.0  ;;  %v2272_v59 = vmul.f32 0.2, %v2240_v55  ;;  %v2248_v0 = vadd.f32 %v3161_v54, %v2078_v58  ;;  %v2080_v60 = vpop.f32.mrb[3].mxu0 }
 0x1db   : > { %vm2257_vm10 = vcmp.gt.f32.partialorder %v2241_v57, 0.0  ;;  %v2273_v61 = vmul.f32 0.2, %v2241_v57  ;;  %v2249_v62 = vadd.f32 %v3161_v54, %v2080_v60 }
 0x1dc   : > { %v2288_v63 = vsel %vm2256_vm9, %v2240_v55, %v2272_v59  ;;  %vm2264_vm11 = vcmp.gt.f32.partialorder %v2248_v0, 0.0  ;;  %v2280_v1 = vmul.f32 0.2, %v2248_v0  ;;  %v2117_v2 = vpop.f32.mrb[0].mxu1 }
 0x1dd   : > { %v2289_v3 = vsel %vm2257_vm10, %v2241_v57, %v2273_v61  ;;  %vm2265_vm12 = vcmp.gt.f32.partialorder %v2249_v62, 0.0  ;;  %v2281_v4 = vmul.f32 0.2, %v2249_v62  ;;  %v2242_v5 = vadd.f32 %v3158_v52, %v2117_v2  ;;  %v2119_v6 = vpop.f32.mrb[1].mxu1 }
 0x1de   : > { %v2585_v7 = vpack.c.bf16 %v2289_v3, %v2288_v63  ;;  %v2296_v8 = vsel %vm2264_vm11, %v2248_v0, %v2280_v1  ;;  %v2243_v9 = vadd.f32 %v3158_v52, %v2119_v6  ;;  %v2121_v10 = vpop.f32.mrb[2].mxu1 }
 0x1df   : > { %v2297_v11 = vsel %vm2265_vm12, %v2249_v62, %v2281_v4  ;;  %vm2258_vm13 = vcmp.gt.f32.partialorder %v2242_v5, 0.0  ;;  %v2274_v12 = vmul.f32 0.2, %v2242_v5  ;;  %v2250_v13 = vadd.f32 %v3161_v54, %v2121_v10  ;;  %v2123_v14 = vpop.f32.mrb[3].mxu1  ;;  %v2160_v15 = vpop.f32.mrb[4].mxu0 }
 0x1e0   : > { %2352 = vst [vmem:[%s3170_s18] sm:$0xff] %v2585_v7  ;;  %v2589_v16 = vpack.c.bf16 %v2297_v11, %v2296_v8  ;;  %vm2259_vm14 = vcmp.gt.f32.partialorder %v2243_v9, 0.0  ;;  %v2275_v17 = vmul.f32 0.2, %v2243_v9  ;;  %v2251_v18 = vadd.f32 %v3161_v54, %v2123_v14  ;;  %v2162_v19 = vpop.f32.mrb[5].mxu0 }
 0x1e1   : > { %v2290_v20 = vsel %vm2258_vm13, %v2242_v5, %v2274_v12  ;;  %vm2266_vm15 = vcmp.gt.f32.partialorder %v2250_v13, 0.0  ;;  %v2282_v21 = vmul.f32 0.2, %v2250_v13  ;;  %v2244_v22 = vadd.f32 %v3158_v52, %v2160_v15  ;;  %v2164_v23 = vpop.f32.mrb[6].mxu0 }
 0x1e2   : > { %2356 = vst [vmem:[%s3170_s18 + $0x20] sm:$0xff] %v2589_v16  ;;  %v2291_v24 = vsel %vm2259_vm14, %v2243_v9, %v2275_v17  ;;  %vm2267_vm0 = vcmp.gt.f32.partialorder %v2251_v18, 0.0  ;;  %v2283_v25 = vmul.f32 0.2, %v2251_v18  ;;  %v2245_v26 = vadd.f32 %v3158_v52, %v2162_v19  ;;  %v2166_v27 = vpop.f32.mrb[7].mxu0 }
 0x1e3   : > { %v2586_v28 = vpack.c.bf16 %v2291_v24, %v2290_v20  ;;  %v2298_v29 = vsel %vm2266_vm15, %v2250_v13, %v2282_v21  ;;  %vm2260_vm1 = vcmp.gt.f32.partialorder %v2244_v22, 0.0  ;;  %v2276_v30 = vmul.f32 0.2, %v2244_v22 }
 0x1e4   : > { %v2299_v31 = vsel %vm2267_vm0, %v2251_v18, %v2283_v25  ;;  %vm2261_vm2 = vcmp.gt.f32.partialorder %v2245_v26, 0.0  ;;  %v2277_v32 = vmul.f32 0.2, %v2245_v26  ;;  %v2252_v33 = vadd.f32 %v3161_v54, %v2164_v23  ;;  %v2203_v34 = vpop.f32.mrb[4].mxu1 }
 0x1e5   : > { %2353 = vst [vmem:[%s3170_s18 + $0x8] sm:$0xff] %v2586_v28  ;;  %v2590_v35 = vpack.c.bf16 %v2299_v31, %v2298_v29  ;;  %v2292_v36 = vsel %vm2260_vm1, %v2244_v22, %v2276_v30  ;;  %v2253_v37 = vadd.f32 %v3161_v54, %v2166_v27  ;;  %v2246_v38 = vadd.f32 %v3158_v52, %v2203_v34  ;;  %v2205_v39 = vpop.f32.mrb[5].mxu1 }
 0x1e6   : > { %v2293_v40 = vsel %vm2261_vm2, %v2245_v26, %v2277_v32  ;;  %vm2268_vm3 = vcmp.gt.f32.partialorder %v2252_v33, 0.0  ;;  %v2284_v41 = vmul.f32 0.2, %v2252_v33  ;;  %v2247_v42 = vadd.f32 %v3158_v52, %v2205_v39  ;;  %v2207_v43 = vpop.f32.mrb[6].mxu1 }
 0x1e7   : > { %2357 = vst [vmem:[%s3170_s18 + $0x28] sm:$0xff] %v2590_v35  ;;  %v2587_v44 = vpack.c.bf16 %v2293_v40, %v2292_v36  ;;  %vm2269_vm4 = vcmp.gt.f32.partialorder %v2253_v37, 0.0  ;;  %v2285_v45 = vmul.f32 0.2, %v2253_v37  ;;  %vm2262_vm5 = vcmp.gt.f32.partialorder %v2246_v38, 0.0  ;;  %v2209_v46 = vpop.f32.mrb[7].mxu1 }
 0x1e8   : > { %v2300_v47 = vsel %vm2268_vm3, %v2252_v33, %v2284_v41  ;;  %v2278_v48 = vmul.f32 0.2, %v2246_v38  ;;  %vm2263_vm6 = vcmp.gt.f32.partialorder %v2247_v42, 0.0  ;;  %v2279_v49 = vmul.f32 0.2, %v2247_v42 }
 0x1e9   : > { %2354 = vst [vmem:[%s3170_s18 + $0x10] sm:$0xff] %v2587_v44  ;;  %v2301_v50 = vsel %vm2269_vm4, %v2253_v37, %v2285_v45  ;;  %v2254_v51 = vadd.f32 %v3161_v54, %v2207_v43  ;;  %v2255_v52 = vadd.f32 %v3161_v54, %v2209_v46  ;;  %v2382_v54 = vld [vmem:[%s3170_s18] sm:$0xff] (%p2846_p4) }
 0x1ea   : > { %v2591_v53 = vpack.c.bf16 %v2301_v50, %v2300_v47  ;;  %v2294_v55 = vsel %vm2262_vm5, %v2246_v38, %v2278_v48  ;;  %v2295_v56 = vsel %vm2263_vm6, %v2247_v42, %v2279_v49  ;;  %v2390_v2 = vld [vmem:[%s3170_s18 + $0x20] sm:$0xff] (%p2846_p4)  ;;  %2383 = vst [vmem:[%s2369_s28] sm:$0xff] (%p2846_p4), %v2382_v54 }
 0x1eb   : > { %v2588_v57 = vpack.c.bf16 %v2295_v56, %v2294_v55  ;;  %vm2270_vm7 = vcmp.gt.f32.partialorder %v2254_v51, 0.0  ;;  %v2286_v58 = vmul.f32 0.2, %v2254_v51  ;;  %vm2271_vm8 = vcmp.gt.f32.partialorder %v2255_v52, 0.0  ;;  %2366 = sbr.rel (!%p2846_p4) target bundleno = 506 (0x1fa), region = 44  ;;  %2391 = vst [vmem:[%s2369_s28 + $0x140] sm:$0xff] (%p2846_p4), %v2390_v2 }
 0x1ec   : > { %2358 = vst [vmem:[%s3170_s18 + $0x30] sm:$0xff] %v2591_v53  ;;  %v2287_v59 = vmul.f32 0.2, %v2255_v52  ;;  %v2384_v62 = vld [vmem:[%s3170_s18 + $0x8] sm:$0xff] (%p2846_p4) }
 0x1ed   : > { %2355 = vst [vmem:[%s3170_s18 + $0x18] sm:$0xff] %v2588_v57  ;;  %v2302_v0 = vsel %vm2270_vm7, %v2254_v51, %v2286_v58  ;;  %2385 = vst [vmem:[%s2369_s28 + $0x8] sm:$0xff] (%p2846_p4), %v2384_v62 }
 0x1ee   : > { %v2303_v60 = vsel %vm2271_vm8, %v2255_v52, %v2287_v59  ;;  %v2392_v3 = vld [vmem:[%s3170_s18 + $0x28] sm:$0xff] (%p2846_p4) }
 0x1ef   : > { %v2592_v61 = vpack.c.bf16 %v2303_v60, %v2302_v0  ;;  %2393 = vst [vmem:[%s2369_s28 + $0x148] sm:$0xff] (%p2846_p4), %v2392_v3 }
 0x1f0   : > { %v2386_v63 = vld [vmem:[%s3170_s18 + $0x10] sm:$0xff] (%p2846_p4) }
 0x1f1   : > { %2359 = vst [vmem:[%s3170_s18 + $0x38] sm:$0xff] %v2592_v61  ;;  %2387 = vst [vmem:[%s2369_s28 + $0x10] sm:$0xff] (%p2846_p4), %v2386_v63 }
 0x1f3   : > { %v2394_v4 = vld [vmem:[%s3170_s18 + $0x30] sm:$0xff] }
 0x1f4   : > { %v2388_v1 = vld [vmem:[%s3170_s18 + $0x18] sm:$0xff]  ;;  %2395 = vst [vmem:[%s2369_s28 + $0x150] sm:$0xff] %v2394_v4 }
 0x1f5   : > { %2389 = vst [vmem:[%s2369_s28 + $0x18] sm:$0xff] %v2388_v1 }
 0x1f8   : > { %v2396_v5 = vld [vmem:[%s3170_s18 + $0x38] sm:$0xff] }
 0x1f9   : > { %2397 = vst [vmem:[%s2369_s28 + $0x158] sm:$0xff] %v2396_v5 }
 0x1fa PF: > { %p12_p9 = scmp.ge.s32.totalorder %s2836_s21, 12   ;;  %s3220_s18 = smov %s2777_s19 }
 0x1fb   : > { %s3221_s19 = smov %s2844_s24  ;;  %s3222_s20 = smov %s2836_s21 }
 0x1fc   :  { %14 = sbr.rel (!%p12_p9) target bundleno = 2 (0x2), region = 103 }

// kernel: discriminator_forward.5
= control target key start
LH: loop header
LB: loop body
LE: loop exit
PB: predicated region body
PF: predicated region fallthrough
CT: control target
= control target key end

     0   :  { %s4101_s26 = smov 127   ;;  %v4102_v16 = vmov 0   ;;  %vm377_vm0 = vcmask 1039360   ;;  %vm426_vm1 = vcmask 261120   ;;  %s4105_s28 = smov 47   ;;  %vm1014_vm2 = vcmask 973824   ;;  %s5431_s0 = inlined_call_operand.vmem [shape: bf16[8,16,32], index: 0, kind: input, shape index: {}]   ;;  %s5432_s1 = inlined_call_operand.vmem [shape: bf16[32,3072], index: 1, kind: input, shape index: {}, may-alias: {1,2}]   ;;  %s5433_s2 = inlined_call_operand.vmem [shape: bf16[32,3072], index: 2, kind: input, shape index: {}, may-alias: {1,2}]   ;;  %s5434_s3 = inlined_call_operand.vmem [shape: f32[16,1], index: 3, kind: input, shape index: {}]   ;;  %s5435_s4 = inlined_call_operand.vmem [shape: f32[1,1536], index: 4, kind: input, shape index: {}]   ;;  %s5436_s5 = inlined_call_operand.vmem [shape: bf16[16,1536], index: 5, kind: output, shape index: {}]  }
   0x1   :  { %v26_v0 = vld [vmem:[%s5432_s1] sm:$0xff]  ;;  %v28_v2 = vld [vmem:[%s5432_s1 + $0x8] sm:$0xff]  ;;  %v30_v8 = vld [vmem:[%s5432_s1 + $0x10] sm:$0xff]  ;;  %462 = vmatprep.mubr.bf16.mxu0 %v4102_v16  ;;  %505 = vmatprep.mubr.bf16.mxu1 %v4102_v16  ;;  %s4106_s8 = smov 46   ;;  %vm1408_vm3 = vcmask 965632   ;;  %s4107_s11 = smov 38  }
   0x2   :  { %v38_v1 = vld [vmem:[%s5432_s1 + $0x60] sm:$0xff]  ;;  %v40_v5 = vld [vmem:[%s5432_s1 + $0x68] sm:$0xff]  ;;  %v42_v9 = vld [vmem:[%s5432_s1 + $0x70] sm:$0xff]  ;;  %4087 = vset.pattern.permute.xlu0 %v4102_v16  ;;  %4088 = vset.pattern.permute.xlu1 %v4102_v16  ;;  %vm1802_vm4 = vcmask 384000   ;;  %s4108_s14 = smov 37   ;;  %vm2196_vm5 = vcmask 375808  }
   0x3   :  { %v4148_v3 = vcombine.high %v26_v0, %v38_v1  ;;  %v4150_v4 = vcombine.low %v26_v0, %v38_v1  ;;  %v4159_v6 = vcombine.low %v28_v2, %v40_v5  ;;  %v4161_v7 = vcombine.high %v28_v2, %v40_v5  ;;  %v50_v10 = vld [vmem:[%s5432_s1 + $0xc0] sm:$0xff]  ;;  %v52_v14 = vld [vmem:[%s5432_s1 + $0xc8] sm:$0xff]  ;;  %v32_v17 = vld [vmem:[%s5432_s1 + $0x18] sm:$0xff] }
   0x4   :  { %v62_v11 = vld [vmem:[%s5432_s1 + $0x120] sm:$0xff]  ;;  %v4179_v12 = vcombine.low %v30_v8, %v42_v9  ;;  %v64_v15 = vld [vmem:[%s5432_s1 + $0x128] sm:$0xff]  ;;  %v44_v18 = vld [vmem:[%s5432_s1 + $0x78] sm:$0xff]  ;;  %v4211_v21 = vcombine.high %v30_v8, %v42_v9  ;;  %vm2590_vm6 = vcmask 310272   ;;  %vm2984_vm7 = vcmask 302080  }
   0x5   :  { %327 = vrot.lane.b32.xlu0 %v4148_v3, %s4101_s26  ;;  %325 = vrot.lane.b32.xlu1 %v4150_v4, %s4101_s26  ;;  %v4181_v13 = vcombine.high %v50_v10, %v62_v11  ;;  %v4203_v19 = vcombine.low %v52_v14, %v64_v15  ;;  %v4205_v20 = vcombine.low %v50_v10, %v62_v11  ;;  %v54_v23 = vld [vmem:[%s5432_s1 + $0xd0] sm:$0xff]  ;;  %v34_v27 = vld [vmem:[%s5432_s1 + $0x20] sm:$0xff] }
   0x6   :  { %v4213_v22 = vcombine.low %v32_v17, %v44_v18  ;;  %v66_v24 = vld [vmem:[%s5432_s1 + $0x130] sm:$0xff]  ;;  %v4225_v25 = vcombine.high %v52_v14, %v64_v15  ;;  %v46_v28 = vld [vmem:[%s5432_s1 + $0x80] sm:$0xff]  ;;  %v4239_v29 = vcombine.high %v32_v17, %v44_v18  ;;  %v56_v31 = vld [vmem:[%s5432_s1 + $0xd8] sm:$0xff] }
   0x7   :  { %v4227_v26 = vcombine.low %v54_v23, %v66_v24  ;;  %v4241_v30 = vcombine.low %v34_v27, %v46_v28  ;;  %v68_v32 = vld [vmem:[%s5432_s1 + $0x138] sm:$0xff]  ;;  %v4253_v33 = vcombine.high %v54_v23, %v66_v24  ;;  %v36_v35 = vld [vmem:[%s5432_s1 + $0x28] sm:$0xff]  ;;  %v4267_v37 = vcombine.high %v34_v27, %v46_v28  ;;  %v58_v39 = vld [vmem:[%s5432_s1 + $0xe0] sm:$0xff] }
   0x8   :  { %v4255_v34 = vcombine.low %v56_v31, %v68_v32  ;;  %v48_v36 = vld [vmem:[%s5432_s1 + $0x88] sm:$0xff]  ;;  %v70_v40 = vld [vmem:[%s5432_s1 + $0x140] sm:$0xff]  ;;  %v4281_v41 = vcombine.high %v56_v31, %v68_v32  ;;  %v3767_v43 = vld [vmem:[%s5433_s2 + $0x30] sm:$0xff] }
   0x9   :  { %329 = vrot.lane.b32.xlu0 %v4159_v6, %s4101_s26  ;;  %331 = vrot.lane.b32.xlu1 %v4161_v7, %s4101_s26  ;;  %v4269_v38 = vcombine.low %v36_v35, %v48_v36  ;;  %v4283_v42 = vcombine.low %v58_v39, %v70_v40  ;;  %v3773_v44 = vld [vmem:[%s5433_s2 + $0x90] sm:$0xff]  ;;  %v4295_v45 = vcombine.high %v36_v35, %v48_v36  ;;  %v60_v47 = vld [vmem:[%s5432_s1 + $0xe8] sm:$0xff] }
   0xa   :  { %v4297_v46 = vcombine.low %v3767_v43, %v3773_v44  ;;  %v72_v48 = vld [vmem:[%s5432_s1 + $0x148] sm:$0xff]  ;;  %v4309_v49 = vcombine.high %v58_v39, %v70_v40  ;;  %v3779_v51 = vld [vmem:[%s5433_s2 + $0xf0] sm:$0xff]  ;;  %s4103_s1 = smov 119  }
   0xb   :  { %v4311_v50 = vcombine.low %v60_v47, %v72_v48  ;;  %v3785_v52 = vld [vmem:[%s5433_s2 + $0x150] sm:$0xff]  ;;  %v4323_v53 = vcombine.high %v60_v47, %v72_v48  ;;  %s4104_s2 = smov 118   ;;  %v4394_v9 = vld [vmem:[%s5431_s0 + $0x8] sm:$0xff]  }
   0xc   :  { %v4325_v54 = vcombine.low %v3779_v51, %v3785_v52 }
   0xd   :  { %333 = vrot.lane.b32.xlu0 %v4179_v12, %s4101_s26  ;;  %353 = vrot.lane.b32.xlu1 %v4181_v13, %s4101_s26 }
  0x11   :  { %355 = vrot.lane.b32.xlu0 %v4203_v19, %s4101_s26  ;;  %351 = vrot.lane.b32.xlu1 %v4205_v20, %s4101_s26 }
  0x15   :  { %335 = vrot.lane.b32.xlu0 %v4211_v21, %s4101_s26  ;;  %337 = vrot.lane.b32.xlu1 %v4213_v22, %s4101_s26 }
  0x19   :  { %357 = vrot.lane.b32.xlu0 %v4225_v25, %s4101_s26  ;;  %359 = vrot.lane.b32.xlu1 %v4227_v26, %s4101_s26 }
  0x1d   :  { %339 = vrot.lane.b32.xlu0 %v4239_v29, %s4101_s26  ;;  %341 = vrot.lane.b32.xlu1 %v4241_v30, %s4101_s26 }
  0x21   :  { %361 = vrot.lane.b32.xlu0 %v4253_v33, %s4101_s26  ;;  %363 = vrot.lane.b32.xlu1 %v4255_v34, %s4101_s26 }
  0x25   :  { %343 = vrot.lane.b32.xlu0 %v4267_v37, %s4101_s26  ;;  %345 = vrot.lane.b32.xlu1 %v4269_v38, %s4101_s26 }
  0x29   :  { %365 = vrot.lane.b32.xlu0 %v4281_v41, %s4101_s26  ;;  %367 = vrot.lane.b32.xlu1 %v4283_v42, %s4101_s26 }
  0x2d   :  { %347 = vrot.lane.b32.xlu0 %v4295_v45, %s4101_s26  ;;  %349 = vrot.lane.b32.xlu1 %v4297_v46, %s4101_s26 }
  0x31   :  { %369 = vrot.lane.b32.xlu0 %v4309_v49, %s4101_s26  ;;  %371 = vrot.lane.b32.xlu1 %v4311_v50, %s4101_s26 }
  0x35   :  { %373 = vrot.lane.b32.xlu0 %v4323_v53, %s4101_s26  ;;  %375 = vrot.lane.b32.xlu1 %v4325_v54, %s4101_s26 }
  0x39   :  { %964 = vrot.lane.b32.xlu0 %v4148_v3, %s4103_s1  ;;  %966 = vrot.lane.b32.xlu1 %v4159_v6, %s4103_s1 }
  0x3d   :  { %962 = vrot.lane.b32.xlu0 %v4150_v4, %s4103_s1  ;;  %968 = vrot.lane.b32.xlu1 %v4161_v7, %s4103_s1 }
  0x41   :  { %970 = vrot.lane.b32.xlu0 %v4179_v12, %s4103_s1  ;;  %990 = vrot.lane.b32.xlu1 %v4181_v13, %s4103_s1 }
  0x45   :  { %992 = vrot.lane.b32.xlu0 %v4203_v19, %s4103_s1  ;;  %988 = vrot.lane.b32.xlu1 %v4205_v20, %s4103_s1 }
  0x49   :  { %972 = vrot.lane.b32.xlu0 %v4211_v21, %s4103_s1  ;;  %974 = vrot.lane.b32.xlu1 %v4213_v22, %s4103_s1 }
  0x4d   :  { %994 = vrot.lane.b32.xlu0 %v4225_v25, %s4103_s1  ;;  %996 = vrot.lane.b32.xlu1 %v4227_v26, %s4103_s1 }
  0x51   :  { %976 = vrot.lane.b32.xlu0 %v4239_v29, %s4103_s1  ;;  %978 = vrot.lane.b32.xlu1 %v4241_v30, %s4103_s1 }
  0x55   :  { %998 = vrot.lane.b32.xlu0 %v4253_v33, %s4103_s1  ;;  %1000 = vrot.lane.b32.xlu1 %v4255_v34, %s4103_s1 }
  0x59   :  { %980 = vrot.lane.b32.xlu0 %v4267_v37, %s4103_s1  ;;  %982 = vrot.lane.b32.xlu1 %v4269_v38, %s4103_s1 }
  0x5d   :  { %1002 = vrot.lane.b32.xlu0 %v4281_v41, %s4103_s1  ;;  %1004 = vrot.lane.b32.xlu1 %v4283_v42, %s4103_s1 }
  0x61   :  { %984 = vrot.lane.b32.xlu0 %v4295_v45, %s4103_s1  ;;  %986 = vrot.lane.b32.xlu1 %v4297_v46, %s4103_s1 }
  0x65   :  { %1006 = vrot.lane.b32.xlu0 %v4309_v49, %s4103_s1  ;;  %1008 = vrot.lane.b32.xlu1 %v4311_v50, %s4103_s1 }
  0x69   :  { %1010 = vrot.lane.b32.xlu0 %v4323_v53, %s4103_s1  ;;  %1012 = vrot.lane.b32.xlu1 %v4325_v54, %s4103_s1 }
  0x6d   :  { %1358 = vrot.lane.b32.xlu0 %v4148_v3, %s4104_s2  ;;  %1360 = vrot.lane.b32.xlu1 %v4159_v6, %s4104_s2 }
  0x71   :  { %1356 = vrot.lane.b32.xlu0 %v4150_v4, %s4104_s2  ;;  %1362 = vrot.lane.b32.xlu1 %v4161_v7, %s4104_s2 }
  0x75   :  { %1364 = vrot.lane.b32.xlu0 %v4179_v12, %s4104_s2  ;;  %1384 = vrot.lane.b32.xlu1 %v4181_v13, %s4104_s2 }
  0x77   :  { %v328_v55 = vpop.permute.xlu0 %327  ;;  %v326_v56 = vpop.permute.xlu1 %325 }
  0x78   :  { %v378_v60 = vsel %vm377_vm0, %v326_v56, %v328_v55 }
  0x79   :  { %1386 = vrot.lane.b32.xlu0 %v4203_v19, %s4104_s2  ;;  %1382 = vrot.lane.b32.xlu1 %v4205_v20, %s4104_s2 }
  0x7b   :  { %v330_v57 = vpop.permute.xlu0 %329  ;;  %v332_v58 = vpop.permute.xlu1 %331 }
  0x7c   :  { %v379_v59 = vsel %vm377_vm0, %v328_v55, %v330_v57  ;;  %v380_v0 = vsel %vm377_vm0, %v330_v57, %v332_v58 }
  0x7d   :  { %430 = vmatprep.subr.bf16.mxu0 %v379_v59  ;;  %1366 = vrot.lane.b32.xlu0 %v4211_v21, %s4104_s2 }
  0x7e   :  { %1368 = vrot.lane.b32.xlu1 %v4213_v22, %s4104_s2  ;;  %431 = vmatpush1.bf16.msra.mxu0 %v378_v60 }
  0x7f   :  { %v334_v61 = vpop.permute.xlu0 %333  ;;  %v354_v62 = vpop.permute.xlu1 %353 }
  0x80   :  { %v381_v63 = vsel %vm377_vm0, %v332_v58, %v334_v61 }
  0x81   :  { %1388 = vrot.lane.b32.xlu0 %v4225_v25, %s4104_s2  ;;  %473 = vmatprep.subr.bf16.mxu1 %v381_v63 }
  0x82   :  { %1390 = vrot.lane.b32.xlu1 %v4227_v26, %s4104_s2  ;;  %474 = vmatpush1.bf16.msra.mxu1 %v380_v0 }
  0x83   :  { %v356_v1 = vpop.permute.xlu0 %355  ;;  %v352_v2 = vpop.permute.xlu1 %351 }
  0x84   :  { %v391_v5 = vsel %vm377_vm0, %v354_v62, %v356_v1  ;;  %v390_v8 = vsel %vm377_vm0, %v352_v2, %v354_v62 }
  0x85   :  { %1370 = vrot.lane.b32.xlu0 %v4239_v29, %s4104_s2  ;;  %432 = vmatprep.subr.bf16.mxu0 %v391_v5 }
  0x86   :  { %1372 = vrot.lane.b32.xlu1 %v4241_v30, %s4104_s2  ;;  %433 = vmatpush1.bf16.msra.mxu0 %v390_v8 }
  0x87   :  { %v336_v10 = vpop.permute.xlu0 %335  ;;  %v338_v11 = vpop.permute.xlu1 %337 }
  0x88   :  { %v383_v14 = vsel %vm377_vm0, %v336_v10, %v338_v11  ;;  %v382_v15 = vsel %vm377_vm0, %v334_v61, %v336_v10 }
  0x89   :  { %1392 = vrot.lane.b32.xlu0 %v4253_v33, %s4104_s2  ;;  %516 = vmatprep.subr.bf16.mxu0 %v383_v14  ;;  %v4480_v14 = vld [vmem:[%s5431_s0] sm:$0xff]  }
  0x8a   :  { %1394 = vrot.lane.b32.xlu1 %v4255_v34, %s4104_s2  ;;  %3820 = vmatmul.mubr.msk.bf16.vlgmr.msra.gmra.mrb[0].mxu0 %vm426_vm1, %v4394_v9 }
  0x8b   :  { %517 = vmatpush1.bf16.msra.mxu0 %v382_v15  ;;  %v358_v17 = vpop.permute.xlu0 %357  ;;  %v360_v18 = vpop.permute.xlu1 %359  ;;  %548 = vmatprep.mubr.bf16.mxu0 %v4102_v16 }
  0x8c   :  { %v393_v23 = vsel %vm377_vm0, %v358_v17, %v360_v18  ;;  %v392_v24 = vsel %vm377_vm0, %v356_v1, %v358_v17 }
  0x8d   :  { %1374 = vrot.lane.b32.xlu0 %v4267_v37, %s4104_s2  ;;  %475 = vmatprep.subr.bf16.mxu1 %v393_v23 }
  0x8e   :  { %1376 = vrot.lane.b32.xlu1 %v4269_v38, %s4104_s2  ;;  %476 = vmatpush1.bf16.msra.mxu1 %v392_v24 }
  0x8f   :  { %v340_v27 = vpop.permute.xlu0 %339  ;;  %v342_v28 = vpop.permute.xlu1 %341 }
  0x90   :  { %v385_v31 = vsel %vm377_vm0, %v340_v27, %v342_v28  ;;  %v384_v32 = vsel %vm377_vm0, %v338_v11, %v340_v27 }
  0x91   :  { %1396 = vrot.lane.b32.xlu0 %v4281_v41, %s4104_s2  ;;  %559 = vmatprep.subr.bf16.mxu1 %v385_v31 }
  0x92   :  { %1398 = vrot.lane.b32.xlu1 %v4283_v42, %s4104_s2  ;;  %3821 = vmatmul.mubr.msk.bf16.vlgmr.msra.gmra.mrb[0].mxu1 %vm426_vm1, %v4394_v9 }
  0x93   :  { %560 = vmatpush1.bf16.msra.mxu1 %v384_v32  ;;  %v362_v35 = vpop.permute.xlu0 %361  ;;  %v364_v36 = vpop.permute.xlu1 %363  ;;  %591 = vmatprep.mubr.bf16.mxu1 %v4102_v16 }
  0x94   :  { %v395_v39 = vsel %vm377_vm0, %v362_v35, %v364_v36  ;;  %v394_v40 = vsel %vm377_vm0, %v360_v18, %v362_v35 }
  0x95   :  { %1378 = vrot.lane.b32.xlu0 %v4295_v45, %s4104_s2  ;;  %518 = vmatprep.subr.bf16.mxu0 %v395_v39 }
  0x96   :  { %1380 = vrot.lane.b32.xlu1 %v4297_v46, %s4104_s2  ;;  %519 = vmatpush1.bf16.msra.mxu0 %v394_v40 }
  0x97   :  { %v344_v43 = vpop.permute.xlu0 %343  ;;  %v346_v44 = vpop.permute.xlu1 %345 }
  0x98   :  { %v387_v47 = vsel %vm377_vm0, %v344_v43, %v346_v44  ;;  %v386_v48 = vsel %vm377_vm0, %v342_v28, %v344_v43 }
  0x99   :  { %1400 = vrot.lane.b32.xlu0 %v4309_v49, %s4104_s2  ;;  %602 = vmatprep.subr.bf16.mxu0 %v387_v47 }
  0x9a   :  { %1402 = vrot.lane.b32.xlu1 %v4311_v50, %s4104_s2  ;;  %3822 = vmatmul.mubr.msk.bf16.vlgmr.msra.gmra.mrb[4].mxu0 %vm426_vm1, %v4394_v9 }
  0x9b   :  { %603 = vmatpush1.bf16.msra.mxu0 %v386_v48  ;;  %v366_v51 = vpop.permute.xlu0 %365  ;;  %v368_v52 = vpop.permute.xlu1 %367  ;;  %634 = vmatprep.mubr.bf16.mxu0 %v4102_v16 }
  0x9c   :  { %v397_v55 = vsel %vm377_vm0, %v366_v51, %v368_v52  ;;  %v396_v56 = vsel %vm377_vm0, %v364_v36, %v366_v51  ;;  %v4564_v51 = vld [vmem:[%s5431_s0 + $0x10] sm:$0xff]  }
  0x9d   :  { %1404 = vrot.lane.b32.xlu0 %v4323_v53, %s4104_s2  ;;  %561 = vmatprep.subr.bf16.mxu1 %v397_v55 }
  0x9e   :  { %1406 = vrot.lane.b32.xlu1 %v4325_v54, %s4104_s2  ;;  %562 = vmatpush1.bf16.msra.mxu1 %v396_v56 }
  0x9f   :  { %v348_v57 = vpop.permute.xlu0 %347  ;;  %v350_v58 = vpop.permute.xlu1 %349 }
  0xa0   :  { %v389_v59 = vsel %vm377_vm0, %v348_v57, %v350_v58  ;;  %v388_v60 = vsel %vm377_vm0, %v346_v44, %v348_v57 }
  0xa1   :  { %1752 = vrot.lane.b32.xlu0 %v4148_v3, %s4105_s28  ;;  %645 = vmatprep.subr.bf16.mxu1 %v389_v59 }
  0xa2   :  { %1754 = vrot.lane.b32.xlu1 %v4159_v6, %s4105_s28  ;;  %3823 = vmatmul.mubr.msk.bf16.vlgmr.msra.gmra.mrb[4].mxu1 %vm426_vm1, %v4394_v9 }
  0xa3   :  { %646 = vmatpush1.bf16.msra.mxu1 %v388_v60  ;;  %v370_v61 = vpop.permute.xlu0 %369  ;;  %v372_v62 = vpop.permute.xlu1 %371  ;;  %677 = vmatprep.mubr.bf16.mxu1 %v4102_v16 }
  0xa4   :  { %v399_v63 = vsel %vm377_vm0, %v370_v61, %v372_v62  ;;  %v398_v0 = vsel %vm377_vm0, %v368_v52, %v370_v61 }
  0xa5   :  { %1750 = vrot.lane.b32.xlu0 %v4150_v4, %s4105_s28  ;;  %604 = vmatprep.subr.bf16.mxu0 %v399_v63 }
  0xa6   :  { %1756 = vrot.lane.b32.xlu1 %v4161_v7, %s4105_s28  ;;  %605 = vmatpush1.bf16.msra.mxu0 %v398_v0 }
  0xa7   :  { %v374_v1 = vpop.permute.xlu0 %373  ;;  %v376_v2 = vpop.permute.xlu1 %375  ;;  %696 = vmatprep.subr.bf16.mxu0 %v4148_v3 }
  0xa8   :  { %v401_v5 = vsel %vm377_vm0, %v374_v1, %v376_v2  ;;  %v400_v8 = vsel %vm377_vm0, %v372_v62, %v374_v1 }
  0xa9   :  { %1758 = vrot.lane.b32.xlu0 %v4179_v12, %s4105_s28  ;;  %647 = vmatprep.subr.bf16.mxu1 %v401_v5 }
  0xaa   :  { %1778 = vrot.lane.b32.xlu1 %v4181_v13, %s4105_s28  ;;  %3824 = vmatmul.mubr.msk.bf16.vlgmr.msra.gmra.mrb[8].mxu0 %vm426_vm1, %v4394_v9 }
  0xab   :  { %648 = vmatpush1.bf16.msra.mxu1 %v400_v8  ;;  %697 = vmatpush1.bf16.msra.mxu0 %v4150_v4  ;;  %v965_v10 = vpop.permute.xlu0 %964  ;;  %v4466_v11 = vpop.permute.xlu1 %966 }
  0xac   :  { %698 = vmatprep.subr.bf16.mxu0 %v4181_v13  ;;  %739 = vmatprep.subr.bf16.mxu1 %v4161_v7  ;;  %v1016_v32 = vsel %vm1014_vm2, %v965_v10, %v4466_v11 }
  0xad   :  { %1780 = vrot.lane.b32.xlu0 %v4203_v19, %s4105_s28  ;;  %728 = vmatprep.mubr.bf16.mxu0 %v4102_v16 }
  0xae   :  { %1776 = vrot.lane.b32.xlu1 %v4205_v20, %s4105_s28  ;;  %3825 = vmatmul.mubr.msk.bf16.vlgmr.msra.gmra.mrb[8].mxu1 %vm426_vm1, %v4394_v9 }
  0xaf   :  { %699 = vmatpush1.bf16.msra.mxu0 %v4205_v20  ;;  %740 = vmatpush1.bf16.msra.mxu1 %v4159_v6  ;;  %v963_v15 = vpop.permute.xlu0 %962  ;;  %v4484_v17 = vpop.permute.xlu1 %968 }
  0xb0   :  { %741 = vmatprep.subr.bf16.mxu1 %v4225_v25  ;;  %782 = vmatprep.subr.bf16.mxu0 %v4211_v21  ;;  %v1015_v36 = vsel %vm1014_vm2, %v963_v15, %v965_v10  ;;  %v1017_v48 = vsel %vm1014_vm2, %v4466_v11, %v4484_v17 }
  0xb1   :  { %1760 = vrot.lane.b32.xlu0 %v4211_v21, %s4105_s28  ;;  %771 = vmatprep.mubr.bf16.mxu1 %v4102_v16 }
  0xb2   :  { %1762 = vrot.lane.b32.xlu1 %v4213_v22, %s4105_s28  ;;  %3827 = vmatmul.mubr.msk.bf16.vlgmr.msra.gmra.mrb[0].mxu0 %vm426_vm1, %v4480_v14 }
  0xb3   :  { %742 = vmatpush1.bf16.msra.mxu1 %v4203_v19  ;;  %783 = vmatpush1.bf16.msra.mxu0 %v4179_v12  ;;  %v4497_v9 = vpop.permute.xlu0 %970  ;;  %v991_v18 = vpop.permute.xlu1 %990 }
  0xb4   :  { %784 = vmatprep.subr.bf16.mxu0 %v4253_v33  ;;  %825 = vmatprep.subr.bf16.mxu1 %v4239_v29  ;;  %v1018_v43 = vsel %vm1014_vm2, %v4484_v17, %v4497_v9 }
  0xb5   :  { %1782 = vrot.lane.b32.xlu0 %v4225_v25, %s4105_s28  ;;  %814 = vmatprep.mubr.bf16.mxu0 %v4102_v16 }
  0xb6   :  { %1784 = vrot.lane.b32.xlu1 %v4227_v26, %s4105_s28  ;;  %3828 = vmatmul.mubr.msk.bf16.vlgmr.msra.gmra.mrb[0].mxu1 %vm426_vm1, %v4480_v14 }
  0xb7   :  { %785 = vmatpush1.bf16.msra.mxu0 %v4227_v26  ;;  %826 = vmatpush1.bf16.msra.mxu1 %v4213_v22  ;;  %v993_v23 = vpop.permute.xlu0 %992  ;;  %v989_v24 = vpop.permute.xlu1 %988 }
  0xb8   :  { %827 = vmatprep.subr.bf16.mxu1 %v4281_v41  ;;  %868 = vmatprep.subr.bf16.mxu0 %v4267_v37  ;;  %v1028_v40 = vsel %vm1014_vm2, %v991_v18, %v993_v23  ;;  %v1027_v47 = vsel %vm1014_vm2, %v989_v24, %v991_v18 }
  0xb9   :  { %1764 = vrot.lane.b32.xlu0 %v4239_v29, %s4105_s28  ;;  %857 = vmatprep.mubr.bf16.mxu1 %v4102_v16 }
  0xba   :  { %1766 = vrot.lane.b32.xlu1 %v4241_v30, %s4105_s28  ;;  %3829 = vmatmul.mubr.msk.bf16.vlgmr.msra.gmra.mrb[4].mxu0 %vm426_vm1, %v4480_v14 }
  0xbb   :  { %828 = vmatpush1.bf16.msra.mxu1 %v4255_v34  ;;  %869 = vmatpush1.bf16.msra.mxu0 %v4241_v30  ;;  %v973_v27 = vpop.permute.xlu0 %972  ;;  %v4521_v28 = vpop.permute.xlu1 %974 }
  0xbc   :  { %870 = vmatprep.subr.bf16.mxu0 %v4309_v49  ;;  %911 = vmatprep.subr.bf16.mxu1 %v4295_v45  ;;  %v1020_v56 = vsel %vm1014_vm2, %v973_v27, %v4521_v28  ;;  %v1019_v59 = vsel %vm1014_vm2, %v4497_v9, %v973_v27 }
  0xbd   :  { %1786 = vrot.lane.b32.xlu0 %v4253_v33, %s4105_s28  ;;  %900 = vmatprep.mubr.bf16.mxu0 %v4102_v16 }
  0xbe   :  { %1788 = vrot.lane.b32.xlu1 %v4255_v34, %s4105_s28  ;;  %3830 = vmatmul.mubr.msk.bf16.vlgmr.msra.gmra.mrb[4].mxu1 %vm426_vm1, %v4480_v14 }
  0xbf   :  { %871 = vmatpush1.bf16.msra.mxu0 %v4283_v42  ;;  %912 = vmatpush1.bf16.msra.mxu1 %v4269_v38  ;;  %v995_v31 = vpop.permute.xlu0 %994  ;;  %v997_v35 = vpop.permute.xlu1 %996 }
  0xc0   :  { %1066 = vmatprep.subr.bf16.mxu0 %v1016_v32  ;;  %913 = vmatprep.subr.bf16.mxu1 %v4323_v53  ;;  %v1030_v55 = vsel %vm1014_vm2, %v995_v31, %v997_v35  ;;  %v1029_v58 = vsel %vm1014_vm2, %v993_v23, %v995_v31 }
  0xc1   :  { %1768 = vrot.lane.b32.xlu0 %v4267_v37, %s4105_s28  ;;  %943 = vmatprep.mubr.bf16.mxu1 %v4102_v16 }
  0xc2   :  { %1770 = vrot.lane.b32.xlu1 %v4269_v38, %s4105_s28  ;;  %3831 = vmatmul.mubr.msk.bf16.vlgmr.msra.gmra.mrb[8].mxu0 %vm426_vm1, %v4480_v14 }
  0xc3   :  { %914 = vmatpush1.bf16.msra.mxu1 %v4311_v50  ;;  %1067 = vmatpush1.bf16.msra.mxu0 %v1015_v36  ;;  %v977_v39 = vpop.permute.xlu0 %976  ;;  %v979_v44 = vpop.permute.xlu1 %978 }
  0xc4   :  { %1068 = vmatprep.subr.bf16.mxu0 %v1028_v40  ;;  %1109 = vmatprep.subr.bf16.mxu1 %v1018_v43  ;;  %v1022_v62 = vsel %vm1014_vm2, %v977_v39, %v979_v44  ;;  %v1021_v1 = vsel %vm1014_vm2, %v4521_v28, %v977_v39 }
  0xc5   :  { %1790 = vrot.lane.b32.xlu0 %v4281_v41, %s4105_s28  ;;  %1098 = vmatprep.mubr.bf16.mxu0 %v4102_v16 }
  0xc6   :  { %1792 = vrot.lane.b32.xlu1 %v4283_v42, %s4105_s28  ;;  %3832 = vmatmul.mubr.msk.bf16.vlgmr.msra.gmra.mrb[8].mxu1 %vm426_vm1, %v4480_v14 }
  0xc7   :  { %1069 = vmatpush1.bf16.msra.mxu0 %v1027_v47  ;;  %1110 = vmatpush1.bf16.msra.mxu1 %v1017_v48  ;;  %v999_v52 = vpop.permute.xlu0 %998  ;;  %v1001_v57 = vpop.permute.xlu1 %1000 }
  0xc8   :  { %1111 = vmatprep.subr.bf16.mxu1 %v1030_v55  ;;  %1152 = vmatprep.subr.bf16.mxu0 %v1020_v56  ;;  %v1032_v61 = vsel %vm1014_vm2, %v999_v52, %v1001_v57  ;;  %v1031_v0 = vsel %vm1014_vm2, %v997_v35, %v999_v52 }
  0xc9   :  { %1772 = vrot.lane.b32.xlu0 %v4295_v45, %s4105_s28  ;;  %1141 = vmatprep.mubr.bf16.mxu1 %v4102_v16 }
  0xca   :  { %1774 = vrot.lane.b32.xlu1 %v4297_v46, %s4105_s28  ;;  %3836 = vmatmul.mubr.msk.bf16.vlgmr.msra.gmra.mrb[0].mxu0 %vm426_vm1, %v4564_v51 }
  0xcb   :  { %1112 = vmatpush1.bf16.msra.mxu1 %v1029_v58  ;;  %1153 = vmatpush1.bf16.msra.mxu0 %v1019_v59  ;;  %v981_v60 = vpop.permute.xlu0 %980  ;;  %v983_v63 = vpop.permute.xlu1 %982 }
  0xcc   :  { %1154 = vmatprep.subr.bf16.mxu0 %v1032_v61  ;;  %1195 = vmatprep.subr.bf16.mxu1 %v1022_v62  ;;  %v1024_v5 = vsel %vm1014_vm2, %v981_v60, %v983_v63  ;;  %v1023_v14 = vsel %vm1014_vm2, %v979_v44, %v981_v60  ;;  %v4653_v61 = vld [vmem:[%s5431_s0 + $0x18] sm:$0xff]  }
  0xcd   :  { %1794 = vrot.lane.b32.xlu0 %v4309_v49, %s4105_s28  ;;  %1184 = vmatprep.mubr.bf16.mxu0 %v4102_v16 }
  0xce   :  { %1796 = vrot.lane.b32.xlu1 %v4311_v50, %s4105_s28  ;;  %3837 = vmatmul.mubr.msk.bf16.vlgmr.msra.gmra.mrb[0].mxu1 %vm426_vm1, %v4564_v51 }
  0xcf   :  { %1155 = vmatpush1.bf16.msra.mxu0 %v1031_v0  ;;  %1196 = vmatpush1.bf16.msra.mxu1 %v1021_v1  ;;  %v1003_v2 = vpop.permute.xlu0 %1002  ;;  %v1005_v8 = vpop.permute.xlu1 %1004 }
  0xd0   :  { %1238 = vmatprep.subr.bf16.mxu0 %v1024_v5  ;;  %v1034_v10 = vsel %vm1014_vm2, %v1003_v2, %v1005_v8  ;;  %v1033_v11 = vsel %vm1014_vm2, %v1001_v57, %v1003_v2  ;;  %1227 = vmatprep.mubr.bf16.mxu1 %v4102_v16 }
  0xd1   :  { %1798 = vrot.lane.b32.xlu0 %v4323_v53, %s4105_s28  ;;  %1197 = vmatprep.subr.bf16.mxu1 %v1034_v10 }
  0xd2   :  { %1800 = vrot.lane.b32.xlu1 %v4325_v54, %s4105_s28  ;;  %3838 = vmatmul.mubr.msk.bf16.vlgmr.msra.gmra.mrb[4].mxu0 %vm426_vm1, %v4564_v51 }
  0xd3   :  { %1198 = vmatpush1.bf16.msra.mxu1 %v1033_v11  ;;  %1239 = vmatpush1.bf16.msra.mxu0 %v1023_v14  ;;  %v985_v15 = vpop.permute.xlu0 %984  ;;  %v987_v17 = vpop.permute.xlu1 %986 }
  0xd4   :  { %v1026_v9 = vsel %vm1014_vm2, %v985_v15, %v987_v17  ;;  %v1025_v18 = vsel %vm1014_vm2, %v983_v63, %v985_v15  ;;  %1270 = vmatprep.mubr.bf16.mxu0 %v4102_v16 }
  0xd5   :  { %2146 = vrot.lane.b32.xlu0 %v4148_v3, %s4106_s8  ;;  %1281 = vmatprep.subr.bf16.mxu1 %v1026_v9 }
  0xd6   :  { %2148 = vrot.lane.b32.xlu1 %v4159_v6, %s4106_s8  ;;  %3839 = vmatmul.mubr.msk.bf16.vlgmr.msra.gmra.mrb[4].mxu1 %vm426_vm1, %v4564_v51 }
  0xd7   :  { %1282 = vmatpush1.bf16.msra.mxu1 %v1025_v18  ;;  %v1007_v23 = vpop.permute.xlu0 %1006  ;;  %v1009_v24 = vpop.permute.xlu1 %1008  ;;  %1313 = vmatprep.mubr.bf16.mxu1 %v4102_v16 }
  0xd8   :  { %v1036_v27 = vsel %vm1014_vm2, %v1007_v23, %v1009_v24  ;;  %v1035_v28 = vsel %vm1014_vm2, %v1005_v8, %v1007_v23 }
  0xd9   :  { %2144 = vrot.lane.b32.xlu0 %v4150_v4, %s4106_s8  ;;  %1240 = vmatprep.subr.bf16.mxu0 %v1036_v27 }
  0xda   :  { %2150 = vrot.lane.b32.xlu1 %v4161_v7, %s4106_s8  ;;  %1241 = vmatpush1.bf16.msra.mxu0 %v1035_v28 }
  0xdb   :  { %v1011_v31 = vpop.permute.xlu0 %1010  ;;  %v1013_v32 = vpop.permute.xlu1 %1012 }
  0xdc   :  { %v1038_v35 = vsel %vm1014_vm2, %v1011_v31, %v1013_v32  ;;  %v1037_v36 = vsel %vm1014_vm2, %v1009_v24, %v1011_v31 }
  0xdd   :  { %2152 = vrot.lane.b32.xlu0 %v4179_v12, %s4106_s8  ;;  %1283 = vmatprep.subr.bf16.mxu1 %v1038_v35 }
  0xde   :  { %2172 = vrot.lane.b32.xlu1 %v4181_v13, %s4106_s8  ;;  %1284 = vmatpush1.bf16.msra.mxu1 %v1037_v36 }
  0xdf   :  { %v1359_v39 = vpop.permute.xlu0 %1358  ;;  %v1361_v40 = vpop.permute.xlu1 %1360  ;;  %3840 = vmatmul.mubr.msk.bf16.vlgmr.msra.gmra.mrb[8].mxu0 %vm426_vm1, %v4564_v51 }
  0xe0   :  { %v1410_v43 = vsel %vm1408_vm3, %v1359_v39, %v1361_v40  ;;  %1492 = vmatprep.mubr.bf16.mxu0 %v4102_v16 }
  0xe1   :  { %2174 = vrot.lane.b32.xlu0 %v4203_v19, %s4106_s8  ;;  %1460 = vmatprep.subr.bf16.mxu0 %v1410_v43 }
  0xe2   :  { %2170 = vrot.lane.b32.xlu1 %v4205_v20, %s4106_s8  ;;  %3841 = vmatmul.mubr.msk.bf16.vlgmr.msra.gmra.mrb[8].mxu1 %vm426_vm1, %v4564_v51 }
  0xe3   :  { %v1357_v44 = vpop.permute.xlu0 %1356  ;;  %v1363_v47 = vpop.permute.xlu1 %1362  ;;  %1535 = vmatprep.mubr.bf16.mxu1 %v4102_v16 }
  0xe4   :  { %v1409_v48 = vsel %vm1408_vm3, %v1357_v44, %v1359_v39  ;;  %v1411_v51 = vsel %vm1408_vm3, %v1361_v40, %v1363_v47 }
  0xe5   :  { %2154 = vrot.lane.b32.xlu0 %v4211_v21, %s4106_s8  ;;  %1461 = vmatpush1.bf16.msra.mxu0 %v1409_v48 }
  0xe6   :  { %2156 = vrot.lane.b32.xlu1 %v4213_v22, %s4106_s8 }
  0xe7   :  { %v1365_v52 = vpop.permute.xlu0 %1364  ;;  %v1385_v55 = vpop.permute.xlu1 %1384 }
  0xe8   :  { %v1412_v56 = vsel %vm1408_vm3, %v1363_v47, %v1365_v52 }
  0xe9   :  { %2176 = vrot.lane.b32.xlu0 %v4225_v25, %s4106_s8  ;;  %1503 = vmatprep.subr.bf16.mxu1 %v1412_v56 }
  0xea   :  { %2178 = vrot.lane.b32.xlu1 %v4227_v26, %s4106_s8  ;;  %1504 = vmatpush1.bf16.msra.mxu1 %v1411_v51 }
  0xeb   :  { %v1387_v57 = vpop.permute.xlu0 %1386  ;;  %v1383_v58 = vpop.permute.xlu1 %1382 }
  0xec   :  { %v1421_v59 = vsel %vm1408_vm3, %v1383_v58, %v1385_v55  ;;  %v1422_v60 = vsel %vm1408_vm3, %v1385_v55, %v1387_v57 }
  0xed   :  { %2158 = vrot.lane.b32.xlu0 %v4239_v29, %s4106_s8  ;;  %1462 = vmatprep.subr.bf16.mxu0 %v1422_v60 }
  0xee   :  { %2160 = vrot.lane.b32.xlu1 %v4241_v30, %s4106_s8  ;;  %1463 = vmatpush1.bf16.msra.mxu0 %v1421_v59 }
  0xef   :  { %v1367_v62 = vpop.permute.xlu0 %1366 }
  0xf0   :  { %v1369_v63 = vpop.permute.xlu1 %1368  ;;  %v1413_v0 = vsel %vm1408_vm3, %v1365_v52, %v1367_v62 }
  0xf1   :  { %2180 = vrot.lane.b32.xlu0 %v4253_v33, %s4106_s8  ;;  %v1414_v1 = vsel %vm1408_vm3, %v1367_v62, %v1369_v63  ;;  %3845 = vmatmul.mubr.msk.bf16.vlgmr.msra.gmra.mrb[0].mxu0 %vm426_vm1, %v4653_v61 }
  0xf2   :  { %2182 = vrot.lane.b32.xlu1 %v4255_v34, %s4106_s8  ;;  %1546 = vmatprep.subr.bf16.mxu0 %v1414_v1 }
  0xf3   :  { %1547 = vmatpush1.bf16.msra.mxu0 %v1413_v0  ;;  %v1389_v2 = vpop.permute.xlu0 %1388  ;;  %1578 = vmatprep.mubr.bf16.mxu0 %v4102_v16 }
  0xf4   :  { %v1391_v5 = vpop.permute.xlu1 %1390  ;;  %v1423_v8 = vsel %vm1408_vm3, %v1387_v57, %v1389_v2 }
  0xf5   :  { %2162 = vrot.lane.b32.xlu0 %v4267_v37, %s4106_s8  ;;  %v1424_v10 = vsel %vm1408_vm3, %v1389_v2, %v1391_v5 }
  0xf6   :  { %2164 = vrot.lane.b32.xlu1 %v4269_v38, %s4106_s8  ;;  %1505 = vmatprep.subr.bf16.mxu1 %v1424_v10 }
  0xf7   :  { %1506 = vmatpush1.bf16.msra.mxu1 %v1423_v8  ;;  %v1371_v11 = vpop.permute.xlu0 %1370 }
  0xf8   :  { %v1373_v14 = vpop.permute.xlu1 %1372  ;;  %v1415_v17 = vsel %vm1408_vm3, %v1369_v63, %v1371_v11 }
  0xf9   :  { %2184 = vrot.lane.b32.xlu0 %v4281_v41, %s4106_s8  ;;  %v1416_v15 = vsel %vm1408_vm3, %v1371_v11, %v1373_v14 }
  0xfa   :  { %2186 = vrot.lane.b32.xlu1 %v4283_v42, %s4106_s8  ;;  %1589 = vmatprep.subr.bf16.mxu1 %v1416_v15 }
  0xfb   :  { %3846 = vmatmul.mubr.msk.bf16.vlgmr.msra.gmra.mrb[0].mxu1 %vm426_vm1, %v4653_v61  ;;  %v1393_v9 = vpop.permute.xlu0 %1392 }
  0xfc   :  { %1590 = vmatpush1.bf16.msra.mxu1 %v1415_v17  ;;  %v1395_v18 = vpop.permute.xlu1 %1394  ;;  %v1425_v23 = vsel %vm1408_vm3, %v1391_v5, %v1393_v9  ;;  %1621 = vmatprep.mubr.bf16.mxu1 %v4102_v16 }
  0xfd   :  { %2166 = vrot.lane.b32.xlu0 %v4295_v45, %s4106_s8  ;;  %v1426_v24 = vsel %vm1408_vm3, %v1393_v9, %v1395_v18 }
  0xfe   :  { %2168 = vrot.lane.b32.xlu1 %v4297_v46, %s4106_s8  ;;  %1548 = vmatprep.subr.bf16.mxu0 %v1426_v24 }
  0xff   :  { %1549 = vmatpush1.bf16.msra.mxu0 %v1425_v23  ;;  %v1375_v27 = vpop.permute.xlu0 %1374 }
 0x100   :  { %v1377_v28 = vpop.permute.xlu1 %1376  ;;  %v1417_v32 = vsel %vm1408_vm3, %v1373_v14, %v1375_v27 }
 0x101   :  { %2188 = vrot.lane.b32.xlu0 %v4309_v49, %s4106_s8  ;;  %v1418_v31 = vsel %vm1408_vm3, %v1375_v27, %v1377_v28 }
 0x102   :  { %2190 = vrot.lane.b32.xlu1 %v4311_v50, %s4106_s8  ;;  %1632 = vmatprep.subr.bf16.mxu0 %v1418_v31 }
 0x103   :  { %3847 = vmatmul.mubr.msk.bf16.vlgmr.msra.gmra.mrb[4].mxu0 %vm426_vm1, %v4653_v61  ;;  %v1397_v35 = vpop.permute.xlu0 %1396 }
 0x104   :  { %1633 = vmatpush1.bf16.msra.mxu0 %v1417_v32  ;;  %v1399_v36 = vpop.permute.xlu1 %1398  ;;  %v1427_v39 = vsel %vm1408_vm3, %v1395_v18, %v1397_v35  ;;  %1664 = vmatprep.mubr.bf16.mxu0 %v4102_v16  ;;  %v4752_v18 = vld [vmem:[%s5431_s0 + $0x20] sm:$0xff]  }
 0x105   :  { %2192 = vrot.lane.b32.xlu0 %v4323_v53, %s4106_s8  ;;  %v1428_v40 = vsel %vm1408_vm3, %v1397_v35, %v1399_v36 }
 0x106   :  { %2194 = vrot.lane.b32.xlu1 %v4325_v54, %s4106_s8  ;;  %1591 = vmatprep.subr.bf16.mxu1 %v1428_v40 }
 0x107   :  { %1592 = vmatpush1.bf16.msra.mxu1 %v1427_v39  ;;  %v1379_v43 = vpop.permute.xlu0 %1378 }
 0x108   :  { %v1381_v44 = vpop.permute.xlu1 %1380  ;;  %v1419_v48 = vsel %vm1408_vm3, %v1377_v28, %v1379_v43 }
 0x109   :  { %2540 = vrot.lane.b32.xlu0 %v4148_v3, %s4107_s11  ;;  %v1420_v47 = vsel %vm1408_vm3, %v1379_v43, %v1381_v44 }
 0x10a   :  { %2542 = vrot.lane.b32.xlu1 %v4159_v6, %s4107_s11  ;;  %1675 = vmatprep.subr.bf16.mxu1 %v1420_v47 }
 0x10b   :  { %3848 = vmatmul.mubr.msk.bf16.vlgmr.msra.gmra.mrb[4].mxu1 %vm426_vm1, %v4653_v61  ;;  %v1401_v52 = vpop.permute.xlu0 %1400 }
 0x10c   :  { %1676 = vmatpush1.bf16.msra.mxu1 %v1419_v48  ;;  %v1403_v55 = vpop.permute.xlu1 %1402  ;;  %v1429_v56 = vsel %vm1408_vm3, %v1399_v36, %v1401_v52  ;;  %1707 = vmatprep.mubr.bf16.mxu1 %v4102_v16 }
 0x10d   :  { %2538 = vrot.lane.b32.xlu0 %v4150_v4, %s4107_s11  ;;  %v1430_v51 = vsel %vm1408_vm3, %v1401_v52, %v1403_v55 }
 0x10e   :  { %2544 = vrot.lane.b32.xlu1 %v4161_v7, %s4107_s11  ;;  %1634 = vmatprep.subr.bf16.mxu0 %v1430_v51 }
 0x10f   :  { %1635 = vmatpush1.bf16.msra.mxu0 %v1429_v56  ;;  %v1405_v57 = vpop.permute.xlu0 %1404 }
 0x110   :  { %v1407_v58 = vpop.permute.xlu1 %1406  ;;  %v1431_v59 = vsel %vm1408_vm3, %v1403_v55, %v1405_v57 }
 0x111   :  { %2546 = vrot.lane.b32.xlu0 %v4179_v12, %s4107_s11  ;;  %v1432_v60 = vsel %vm1408_vm3, %v1405_v57, %v1407_v58 }
 0x112   :  { %2566 = vrot.lane.b32.xlu1 %v4181_v13, %s4107_s11  ;;  %1677 = vmatprep.subr.bf16.mxu1 %v1432_v60 }
 0x113   :  { %1678 = vmatpush1.bf16.msra.mxu1 %v1431_v59  ;;  %v1753_v62 = vpop.permute.xlu0 %1752  ;;  %3849 = vmatmul.mubr.msk.bf16.vlgmr.msra.gmra.mrb[8].mxu0 %vm426_vm1, %v4653_v61 }
 0x114   :  { %v1755_v63 = vpop.permute.xlu1 %1754  ;;  %1886 = vmatprep.mubr.bf16.mxu0 %v4102_v16 }
 0x115   :  { %2568 = vrot.lane.b32.xlu0 %v4203_v19, %s4107_s11  ;;  %v1804_v0 = vsel %vm1802_vm4, %v1753_v62, %v1755_v63 }
 0x116   :  { %2564 = vrot.lane.b32.xlu1 %v4205_v20, %s4107_s11  ;;  %1854 = vmatprep.subr.bf16.mxu0 %v1804_v0 }
 0x117   :  { %v1751_v1 = vpop.permute.xlu0 %1750  ;;  %3850 = vmatmul.mubr.msk.bf16.vlgmr.msra.gmra.mrb[8].mxu1 %vm426_vm1, %v4653_v61 }
 0x118   :  { %v1803_v2 = vsel %vm1802_vm4, %v1751_v1, %v1753_v62  ;;  %v1757_v5 = vpop.permute.xlu1 %1756  ;;  %1929 = vmatprep.mubr.bf16.mxu1 %v4102_v16 }
 0x119   :  { %2548 = vrot.lane.b32.xlu0 %v4211_v21, %s4107_s11  ;;  %1855 = vmatpush1.bf16.msra.mxu0 %v1803_v2  ;;  %v1805_v61 = vsel %vm1802_vm4, %v1755_v63, %v1757_v5 }
 0x11a   :  { %2550 = vrot.lane.b32.xlu1 %v4213_v22, %s4107_s11 }
 0x11b   :  { %v1759_v8 = vpop.permute.xlu0 %1758 }
 0x11c   :  { %v1779_v10 = vpop.permute.xlu1 %1778  ;;  %v1806_v11 = vsel %vm1802_vm4, %v1757_v5, %v1759_v8 }
 0x11d   :  { %2570 = vrot.lane.b32.xlu0 %v4225_v25, %s4107_s11  ;;  %1897 = vmatprep.subr.bf16.mxu1 %v1806_v11 }
 0x11e   :  { %2572 = vrot.lane.b32.xlu1 %v4227_v26, %s4107_s11  ;;  %1898 = vmatpush1.bf16.msra.mxu1 %v1805_v61 }
 0x11f   :  { %v1781_v14 = vpop.permute.xlu0 %1780 }
 0x120   :  { %v1777_v15 = vpop.permute.xlu1 %1776  ;;  %v1816_v17 = vsel %vm1802_vm4, %v1779_v10, %v1781_v14 }
 0x121   :  { %v1815_v9 = vsel %vm1802_vm4, %v1777_v15, %v1779_v10  ;;  %2552 = vrot.lane.b32.xlu0 %v4239_v29, %s4107_s11  ;;  %1856 = vmatprep.subr.bf16.mxu0 %v1816_v17 }
 0x122   :  { %2554 = vrot.lane.b32.xlu1 %v4241_v30, %s4107_s11  ;;  %1857 = vmatpush1.bf16.msra.mxu0 %v1815_v9 }
 0x123   :  { %v1761_v23 = vpop.permute.xlu0 %1760 }
 0x124   :  { %v1763_v24 = vpop.permute.xlu1 %1762  ;;  %v1807_v27 = vsel %vm1802_vm4, %v1759_v8, %v1761_v23 }
 0x125   :  { %2574 = vrot.lane.b32.xlu0 %v4253_v33, %s4107_s11  ;;  %v1808_v28 = vsel %vm1802_vm4, %v1761_v23, %v1763_v24  ;;  %3854 = vmatmul.mubr.msk.bf16.vlgmr.msra.gmra.mrb[0].mxu0 %vm426_vm1, %v4752_v18 }
 0x126   :  { %2576 = vrot.lane.b32.xlu1 %v4255_v34, %s4107_s11  ;;  %1940 = vmatprep.subr.bf16.mxu0 %v1808_v28  ;;  %v4851_v28 = vld [vmem:[%s5431_s0 + $0x28] sm:$0xff]  }
 0x127   :  { %1941 = vmatpush1.bf16.msra.mxu0 %v1807_v27  ;;  %v1783_v31 = vpop.permute.xlu0 %1782  ;;  %1972 = vmatprep.mubr.bf16.mxu0 %v4102_v16 }
 0x128   :  { %v1785_v32 = vpop.permute.xlu1 %1784  ;;  %v1817_v35 = vsel %vm1802_vm4, %v1781_v14, %v1783_v31 }
 0x129   :  { %2556 = vrot.lane.b32.xlu0 %v4267_v37, %s4107_s11  ;;  %v1818_v36 = vsel %vm1802_vm4, %v1783_v31, %v1785_v32 }
 0x12a   :  { %2558 = vrot.lane.b32.xlu1 %v4269_v38, %s4107_s11  ;;  %1899 = vmatprep.subr.bf16.mxu1 %v1818_v36 }
 0x12b   :  { %1900 = vmatpush1.bf16.msra.mxu1 %v1817_v35  ;;  %v1765_v39 = vpop.permute.xlu0 %1764 }
 0x12c   :  { %v1767_v40 = vpop.permute.xlu1 %1766  ;;  %v1809_v43 = vsel %vm1802_vm4, %v1763_v24, %v1765_v39 }
 0x12d   :  { %2578 = vrot.lane.b32.xlu0 %v4281_v41, %s4107_s11  ;;  %v1810_v44 = vsel %vm1802_vm4, %v1765_v39, %v1767_v40 }
 0x12e   :  { %2580 = vrot.lane.b32.xlu1 %v4283_v42, %s4107_s11  ;;  %1983 = vmatprep.subr.bf16.mxu1 %v1810_v44 }
 0x12f   :  { %3855 = vmatmul.mubr.msk.bf16.vlgmr.msra.gmra.mrb[0].mxu1 %vm426_vm1, %v4752_v18  ;;  %v1787_v47 = vpop.permute.xlu0 %1786 }
 0x130   :  { %1984 = vmatpush1.bf16.msra.mxu1 %v1809_v43  ;;  %v1819_v48 = vsel %vm1802_vm4, %v1785_v32, %v1787_v47  ;;  %v1789_v52 = vpop.permute.xlu1 %1788  ;;  %2015 = vmatprep.mubr.bf16.mxu1 %v4102_v16 }
 0x131   :  { %2560 = vrot.lane.b32.xlu0 %v4295_v45, %s4107_s11  ;;  %v1820_v55 = vsel %vm1802_vm4, %v1787_v47, %v1789_v52 }
 0x132   :  { %2562 = vrot.lane.b32.xlu1 %v4297_v46, %s4107_s11  ;;  %1942 = vmatprep.subr.bf16.mxu0 %v1820_v55 }
 0x133   :  { %1943 = vmatpush1.bf16.msra.mxu0 %v1819_v48  ;;  %v1769_v56 = vpop.permute.xlu0 %1768 }
 0x134   :  { %v1771_v51 = vpop.permute.xlu1 %1770  ;;  %v1811_v57 = vsel %vm1802_vm4, %v1767_v40, %v1769_v56 }
 0x135   :  { %2582 = vrot.lane.b32.xlu0 %v4309_v49, %s4107_s11  ;;  %v1812_v58 = vsel %vm1802_vm4, %v1769_v56, %v1771_v51 }
 0x136   :  { %2584 = vrot.lane.b32.xlu1 %v4311_v50, %s4107_s11  ;;  %2026 = vmatprep.subr.bf16.mxu0 %v1812_v58 }
 0x137   :  { %3856 = vmatmul.mubr.msk.bf16.vlgmr.msra.gmra.mrb[4].mxu0 %vm426_vm1, %v4752_v18  ;;  %v1791_v59 = vpop.permute.xlu0 %1790 }
 0x138   :  { %2027 = vmatpush1.bf16.msra.mxu0 %v1811_v57  ;;  %v1821_v60 = vsel %vm1802_vm4, %v1789_v52, %v1791_v59  ;;  %v1793_v62 = vpop.permute.xlu1 %1792  ;;  %2058 = vmatprep.mubr.bf16.mxu0 %v4102_v16 }
 0x139   :  { %2586 = vrot.lane.b32.xlu0 %v4323_v53, %s4107_s11  ;;  %v1822_v63 = vsel %vm1802_vm4, %v1791_v59, %v1793_v62 }
 0x13a   :  { %2588 = vrot.lane.b32.xlu1 %v4325_v54, %s4107_s11  ;;  %1985 = vmatprep.subr.bf16.mxu1 %v1822_v63 }
 0x13b   :  { %1986 = vmatpush1.bf16.msra.mxu1 %v1821_v60  ;;  %v1773_v0 = vpop.permute.xlu0 %1772 }
 0x13c   :  { %v1775_v1 = vpop.permute.xlu1 %1774  ;;  %v1813_v2 = vsel %vm1802_vm4, %v1771_v51, %v1773_v0 }
 0x13d   :  { %2934 = vrot.lane.b32.xlu0 %v4148_v3, %s4108_s14  ;;  %v1814_v5 = vsel %vm1802_vm4, %v1773_v0, %v1775_v1 }
 0x13e   :  { %2936 = vrot.lane.b32.xlu1 %v4159_v6, %s4108_s14  ;;  %2069 = vmatprep.subr.bf16.mxu1 %v1814_v5 }
 0x13f   :  { %3857 = vmatmul.mubr.msk.bf16.vlgmr.msra.gmra.mrb[4].mxu1 %vm426_vm1, %v4752_v18  ;;  %v1795_v8 = vpop.permute.xlu0 %1794 }
 0x140   :  { %2070 = vmatpush1.bf16.msra.mxu1 %v1813_v2  ;;  %v1823_v10 = vsel %vm1802_vm4, %v1793_v62, %v1795_v8  ;;  %v1797_v11 = vpop.permute.xlu1 %1796  ;;  %2101 = vmatprep.mubr.bf16.mxu1 %v4102_v16 }
 0x141   :  { %2932 = vrot.lane.b32.xlu0 %v4150_v4, %s4108_s14  ;;  %v1824_v3 = vsel %vm1802_vm4, %v1795_v8, %v1797_v11 }
 0x142   :  { %2938 = vrot.lane.b32.xlu1 %v4161_v7, %s4108_s14  ;;  %2028 = vmatprep.subr.bf16.mxu0 %v1824_v3 }
 0x143   :  { %2029 = vmatpush1.bf16.msra.mxu0 %v1823_v10  ;;  %v1799_v6 = vpop.permute.xlu0 %1798 }
 0x144   :  { %v1825_v61 = vsel %vm1802_vm4, %v1797_v11, %v1799_v6  ;;  %v1801_v14 = vpop.permute.xlu1 %1800 }
 0x145   :  { %2940 = vrot.lane.b32.xlu0 %v4179_v12, %s4108_s14  ;;  %v1826_v15 = vsel %vm1802_vm4, %v1799_v6, %v1801_v14 }
 0x146   :  { %2960 = vrot.lane.b32.xlu1 %v4181_v13, %s4108_s14  ;;  %2071 = vmatprep.subr.bf16.mxu1 %v1826_v15 }
 0x147   :  { %2072 = vmatpush1.bf16.msra.mxu1 %v1825_v61  ;;  %v2147_v4 = vpop.permute.xlu0 %2146  ;;  %3858 = vmatmul.mubr.msk.bf16.vlgmr.msra.gmra.mrb[8].mxu0 %vm426_vm1, %v4752_v18 }
 0x148   :  { %v2149_v7 = vpop.permute.xlu1 %2148  ;;  %2280 = vmatprep.mubr.bf16.mxu0 %v4102_v16 }
 0x149   :  { %2962 = vrot.lane.b32.xlu0 %v4203_v19, %s4108_s14  ;;  %v2198_v12 = vsel %vm2196_vm5, %v2147_v4, %v2149_v7 }
 0x14a   :  { %2958 = vrot.lane.b32.xlu1 %v4205_v20, %s4108_s14  ;;  %2248 = vmatprep.subr.bf16.mxu0 %v2198_v12 }
 0x14b   :  { %v2145_v13 = vpop.permute.xlu0 %2144  ;;  %3859 = vmatmul.mubr.msk.bf16.vlgmr.msra.gmra.mrb[8].mxu1 %vm426_vm1, %v4752_v18 }
 0x14c   :  { %v2197_v17 = vsel %vm2196_vm5, %v2145_v13, %v2147_v4  ;;  %v2151_v9 = vpop.permute.xlu1 %2150  ;;  %2323 = vmatprep.mubr.bf16.mxu1 %v4102_v16 }
 0x14d   :  { %2942 = vrot.lane.b32.xlu0 %v4211_v21, %s4108_s14  ;;  %2249 = vmatpush1.bf16.msra.mxu0 %v2197_v17  ;;  %v2199_v24 = vsel %vm2196_vm5, %v2149_v7, %v2151_v9  ;;  %v4930_v17 = vld [vmem:[%s5431_s0 + $0x30] sm:$0xff]  }
 0x14e   :  { %2944 = vrot.lane.b32.xlu1 %v4213_v22, %s4108_s14 }
 0x14f   :  { %v2153_v19 = vpop.permute.xlu0 %2152 }
 0x150   :  { %v2173_v23 = vpop.permute.xlu1 %2172  ;;  %v2200_v20 = vsel %vm2196_vm5, %v2151_v9, %v2153_v19 }
 0x151   :  { %2964 = vrot.lane.b32.xlu0 %v4225_v25, %s4108_s14  ;;  %2291 = vmatprep.subr.bf16.mxu1 %v2200_v20 }
 0x152   :  { %2966 = vrot.lane.b32.xlu1 %v4227_v26, %s4108_s14  ;;  %2292 = vmatpush1.bf16.msra.mxu1 %v2199_v24 }
 0x153   :  { %v2175_v18 = vpop.permute.xlu0 %2174 }
 0x154   :  { %v2171_v21 = vpop.permute.xlu1 %2170  ;;  %v2210_v27 = vsel %vm2196_vm5, %v2173_v23, %v2175_v18 }
 0x155   :  { %v2209_v22 = vsel %vm2196_vm5, %v2171_v21, %v2173_v23  ;;  %2946 = vrot.lane.b32.xlu0 %v4239_v29, %s4108_s14  ;;  %2250 = vmatprep.subr.bf16.mxu0 %v2210_v27 }
 0x156   :  { %2948 = vrot.lane.b32.xlu1 %v4241_v30, %s4108_s14  ;;  %2251 = vmatpush1.bf16.msra.mxu0 %v2209_v22 }
 0x157   :  { %v2155_v25 = vpop.permute.xlu0 %2154 }
 0x158   :  { %v2201_v26 = vsel %vm2196_vm5, %v2153_v19, %v2155_v25  ;;  %v2157_v31 = vpop.permute.xlu1 %2156 }
 0x159   :  { %2968 = vrot.lane.b32.xlu0 %v4253_v33, %s4108_s14  ;;  %v2202_v32 = vsel %vm2196_vm5, %v2155_v25, %v2157_v31  ;;  %3863 = vmatmul.mubr.msk.bf16.vlgmr.msra.gmra.mrb[0].mxu0 %vm426_vm1, %v4851_v28 }
 0x15a   :  { %2970 = vrot.lane.b32.xlu1 %v4255_v34, %s4108_s14  ;;  %2334 = vmatprep.subr.bf16.mxu0 %v2202_v32 }
 0x15b   :  { %2335 = vmatpush1.bf16.msra.mxu0 %v2201_v26  ;;  %v2177_v29 = vpop.permute.xlu0 %2176  ;;  %2366 = vmatprep.mubr.bf16.mxu0 %v4102_v16 }
 0x15c   :  { %v2211_v30 = vsel %vm2196_vm5, %v2175_v18, %v2177_v29  ;;  %v2179_v35 = vpop.permute.xlu1 %2178 }
 0x15d   :  { %2950 = vrot.lane.b32.xlu0 %v4267_v37, %s4108_s14  ;;  %v2212_v33 = vsel %vm2196_vm5, %v2177_v29, %v2179_v35 }
 0x15e   :  { %2952 = vrot.lane.b32.xlu1 %v4269_v38, %s4108_s14  ;;  %2293 = vmatprep.subr.bf16.mxu1 %v2212_v33 }
 0x15f   :  { %2294 = vmatpush1.bf16.msra.mxu1 %v2211_v30  ;;  %v2159_v36 = vpop.permute.xlu0 %2158 }
 0x160   :  { %v2161_v34 = vpop.permute.xlu1 %2160  ;;  %v2203_v39 = vsel %vm2196_vm5, %v2157_v31, %v2159_v36 }
 0x161   :  { %2972 = vrot.lane.b32.xlu0 %v4281_v41, %s4108_s14  ;;  %v2204_v40 = vsel %vm2196_vm5, %v2159_v36, %v2161_v34 }
 0x162   :  { %2974 = vrot.lane.b32.xlu1 %v4283_v42, %s4108_s14  ;;  %2377 = vmatprep.subr.bf16.mxu1 %v2204_v40 }
 0x163   :  { %3864 = vmatmul.mubr.msk.bf16.vlgmr.msra.gmra.mrb[0].mxu1 %vm426_vm1, %v4851_v28  ;;  %v2181_v37 = vpop.permute.xlu0 %2180 }
 0x164   :  { %2378 = vmatpush1.bf16.msra.mxu1 %v2203_v39  ;;  %v2213_v38 = vsel %vm2196_vm5, %v2179_v35, %v2181_v37  ;;  %v2183_v43 = vpop.permute.xlu1 %2182  ;;  %2409 = vmatprep.mubr.bf16.mxu1 %v4102_v16 }
 0x165   :  { %2954 = vrot.lane.b32.xlu0 %v4295_v45, %s4108_s14  ;;  %v2214_v41 = vsel %vm2196_vm5, %v2181_v37, %v2183_v43 }
 0x166   :  { %2956 = vrot.lane.b32.xlu1 %v4297_v46, %s4108_s14  ;;  %2336 = vmatprep.subr.bf16.mxu0 %v2214_v41 }
 0x167   :  { %2337 = vmatpush1.bf16.msra.mxu0 %v2213_v38  ;;  %v2163_v42 = vpop.permute.xlu0 %2162 }
 0x168   :  { %v2165_v44 = vpop.permute.xlu1 %2164  ;;  %v2205_v47 = vsel %vm2196_vm5, %v2161_v34, %v2163_v42 }
 0x169   :  { %2976 = vrot.lane.b32.xlu0 %v4309_v49, %s4108_s14  ;;  %v2206_v48 = vsel %vm2196_vm5, %v2163_v42, %v2165_v44 }
 0x16a   :  { %2978 = vrot.lane.b32.xlu1 %v4311_v50, %s4108_s14  ;;  %2420 = vmatprep.subr.bf16.mxu0 %v2206_v48  ;;  %v3318_v50 = vld [vmem:[%s5434_s3] sm:$0xff] }
 0x16b   :  { %3865 = vmatmul.mubr.msk.bf16.vlgmr.msra.gmra.mrb[4].mxu0 %vm426_vm1, %v4851_v28  ;;  %v2185_v45 = vpop.permute.xlu0 %2184 }
 0x16c   :  { %2421 = vmatpush1.bf16.msra.mxu0 %v2205_v47  ;;  %v2215_v46 = vsel %vm2196_vm5, %v2183_v43, %v2185_v45  ;;  %v2187_v52 = vpop.permute.xlu1 %2186  ;;  %2452 = vmatprep.mubr.bf16.mxu0 %v4102_v16 }
 0x16d   :  { %2980 = vrot.lane.b32.xlu0 %v4323_v53, %s4108_s14  ;;  %v2216_v49 = vsel %vm2196_vm5, %v2185_v45, %v2187_v52  ;;  %v3319_v53 = vld [vmem:[%s5434_s3 + $0x8] sm:$0xff] }
 0x16e   :  { %2982 = vrot.lane.b32.xlu1 %v4325_v54, %s4108_s14  ;;  %2379 = vmatprep.subr.bf16.mxu1 %v2216_v49 }
 0x16f   :  { %2380 = vmatpush1.bf16.msra.mxu1 %v2215_v46  ;;  %v2167_v55 = vpop.permute.xlu0 %2166 }
 0x170   :  { %v2207_v56 = vsel %vm2196_vm5, %v2165_v44, %v2167_v55  ;;  %v2169_v51 = vpop.permute.xlu1 %2168 }
 0x171   :  { %v2208_v57 = vsel %vm2196_vm5, %v2167_v55, %v2169_v51  ;;  %3322 = vperm.xlu0 %4087, %v3318_v50  }
 0x172   :  { %2463 = vmatprep.subr.bf16.mxu1 %v2208_v57  ;;  %3866 = vmatmul.mubr.msk.bf16.vlgmr.msra.gmra.mrb[4].mxu1 %vm426_vm1, %v4851_v28 }
 0x173   :  { %2464 = vmatpush1.bf16.msra.mxu1 %v2207_v56  ;;  %v2189_v54 = vpop.permute.xlu0 %2188  ;;  %2495 = vmatprep.mubr.bf16.mxu1 %v4102_v16 }
 0x174   :  { %v2217_v58 = vsel %vm2196_vm5, %v2187_v52, %v2189_v54  ;;  %v2191_v59 = vpop.permute.xlu1 %2190  ;;  %3327 = vperm.xlu1 %4088, %v3319_v53  }
 0x175   :  { %v2218_v60 = vsel %vm2196_vm5, %v2189_v54, %v2191_v59 }
 0x176   :  { %2422 = vmatprep.subr.bf16.mxu0 %v2218_v60 }
 0x177   :  { %2423 = vmatpush1.bf16.msra.mxu0 %v2217_v58  ;;  %v2193_v62 = vpop.permute.xlu0 %2192 }
 0x178   :  { %v2219_v63 = vsel %vm2196_vm5, %v2191_v59, %v2193_v62  ;;  %v2195_v0 = vpop.permute.xlu1 %2194 }
 0x179   :  { %v2220_v1 = vsel %vm2196_vm5, %v2193_v62, %v2195_v0 }
 0x17a   :  { %2465 = vmatprep.subr.bf16.mxu1 %v2220_v1  ;;  %3867 = vmatmul.mubr.msk.bf16.vlgmr.msra.gmra.mrb[8].mxu0 %vm426_vm1, %v4851_v28 }
 0x17b   :  { %2466 = vmatpush1.bf16.msra.mxu1 %v2219_v63  ;;  %v2541_v2 = vpop.permute.xlu0 %2540  ;;  %2674 = vmatprep.mubr.bf16.mxu0 %v4102_v16 }
 0x17c   :  { %v2543_v5 = vpop.permute.xlu1 %2542 }
 0x17d   :  { %v2592_v8 = vsel %vm2590_vm6, %v2541_v2, %v2543_v5 }
 0x17e   :  { %2642 = vmatprep.subr.bf16.mxu0 %v2592_v8  ;;  %3868 = vmatmul.mubr.msk.bf16.vlgmr.msra.gmra.mrb[8].mxu1 %vm426_vm1, %v4851_v28  ;;  %v4977_v8 = vld [vmem:[%s5431_s0 + $0x38] sm:$0xff]  }
 0x17f   :  { %v2539_v10 = vpop.permute.xlu0 %2538  ;;  %2717 = vmatprep.mubr.bf16.mxu1 %v4102_v16 }
 0x180   :  { %v2591_v11 = vsel %vm2590_vm6, %v2539_v10, %v2541_v2  ;;  %v2545_v3 = vpop.permute.xlu1 %2544 }
 0x181   :  { %2643 = vmatpush1.bf16.msra.mxu0 %v2591_v11  ;;  %v2593_v15 = vsel %vm2590_vm6, %v2543_v5, %v2545_v3 }
 0x183   :  { %v2547_v6 = vpop.permute.xlu0 %2546 }
 0x184   :  { %v2567_v61 = vpop.permute.xlu1 %2566  ;;  %v2594_v14 = vsel %vm2590_vm6, %v2545_v3, %v2547_v6 }
 0x185   :  { %2685 = vmatprep.subr.bf16.mxu1 %v2594_v14 }
 0x186   :  { %2686 = vmatpush1.bf16.msra.mxu1 %v2593_v15 }
 0x187   :  { %v2569_v4 = vpop.permute.xlu0 %2568 }
 0x188   :  { %v2565_v7 = vpop.permute.xlu1 %2564  ;;  %v2604_v12 = vsel %vm2590_vm6, %v2567_v61, %v2569_v4 }
 0x189   :  { %v2603_v13 = vsel %vm2590_vm6, %v2565_v7, %v2567_v61  ;;  %2644 = vmatprep.subr.bf16.mxu0 %v2604_v12 }
 0x18a   :  { %2645 = vmatpush1.bf16.msra.mxu0 %v2603_v13 }
 0x18b   :  { %v2549_v9 = vpop.permute.xlu0 %2548 }
 0x18c   :  { %v2595_v19 = vsel %vm2590_vm6, %v2547_v6, %v2549_v9  ;;  %v2551_v23 = vpop.permute.xlu1 %2550 }
 0x18d   :  { %v2596_v20 = vsel %vm2590_vm6, %v2549_v9, %v2551_v23  ;;  %3872 = vmatmul.mubr.msk.bf16.vlgmr.msra.gmra.mrb[0].mxu0 %vm426_vm1, %v4930_v17 }
 0x18e   :  { %2728 = vmatprep.subr.bf16.mxu0 %v2596_v20  ;;  %2760 = vmatprep.mubr.bf16.mxu0 %v4102_v16 }
 0x18f   :  { %2729 = vmatpush1.bf16.msra.mxu0 %v2595_v19  ;;  %v2571_v24 = vpop.permute.xlu0 %2570 }
 0x190   :  { %v2605_v18 = vsel %vm2590_vm6, %v2569_v4, %v2571_v24  ;;  %v2573_v21 = vpop.permute.xlu1 %2572 }
 0x191   :  { %v2606_v27 = vsel %vm2590_vm6, %v2571_v24, %v2573_v21 }
 0x192   :  { %2687 = vmatprep.subr.bf16.mxu1 %v2606_v27 }
 0x193   :  { %2688 = vmatpush1.bf16.msra.mxu1 %v2605_v18  ;;  %v2553_v22 = vpop.permute.xlu0 %2552 }
 0x194   :  { %v2597_v28 = vsel %vm2590_vm6, %v2551_v23, %v2553_v22  ;;  %v2555_v25 = vpop.permute.xlu1 %2554 }
 0x195   :  { %v2598_v26 = vsel %vm2590_vm6, %v2553_v22, %v2555_v25 }
 0x196   :  { %2771 = vmatprep.subr.bf16.mxu1 %v2598_v26  ;;  %3873 = vmatmul.mubr.msk.bf16.vlgmr.msra.gmra.mrb[0].mxu1 %vm426_vm1, %v4930_v17 }
 0x197   :  { %2772 = vmatpush1.bf16.msra.mxu1 %v2597_v28  ;;  %v2575_v31 = vpop.permute.xlu0 %2574  ;;  %2803 = vmatprep.mubr.bf16.mxu1 %v4102_v16 }
 0x198   :  { %v2607_v32 = vsel %vm2590_vm6, %v2573_v21, %v2575_v31  ;;  %v2577_v29 = vpop.permute.xlu1 %2576 }
 0x199   :  { %v2608_v30 = vsel %vm2590_vm6, %v2575_v31, %v2577_v29 }
 0x19a   :  { %2730 = vmatprep.subr.bf16.mxu0 %v2608_v30 }
 0x19b   :  { %2731 = vmatpush1.bf16.msra.mxu0 %v2607_v32  ;;  %v2557_v35 = vpop.permute.xlu0 %2556 }
 0x19c   :  { %v2599_v33 = vsel %vm2590_vm6, %v2555_v25, %v2557_v35  ;;  %v2559_v36 = vpop.permute.xlu1 %2558 }
 0x19d   :  { %v2600_v34 = vsel %vm2590_vm6, %v2557_v35, %v2559_v36 }
 0x19e   :  { %2814 = vmatprep.subr.bf16.mxu0 %v2600_v34  ;;  %3874 = vmatmul.mubr.msk.bf16.vlgmr.msra.gmra.mrb[4].mxu0 %vm426_vm1, %v4930_v17 }
 0x19f   :  { %2815 = vmatpush1.bf16.msra.mxu0 %v2599_v33  ;;  %v2579_v39 = vpop.permute.xlu0 %2578  ;;  %2846 = vmatprep.mubr.bf16.mxu0 %v4102_v16 }
 0x1a0   :  { %v2609_v40 = vsel %vm2590_vm6, %v2577_v29, %v2579_v39  ;;  %v2581_v37 = vpop.permute.xlu1 %2580 }
 0x1a1   :  { %v2610_v38 = vsel %vm2590_vm6, %v2579_v39, %v2581_v37 }
 0x1a2   :  { %2773 = vmatprep.subr.bf16.mxu1 %v2610_v38 }
 0x1a3   :  { %2774 = vmatpush1.bf16.msra.mxu1 %v2609_v40  ;;  %v2561_v43 = vpop.permute.xlu0 %2560 }
 0x1a4   :  { %v2601_v41 = vsel %vm2590_vm6, %v2559_v36, %v2561_v43  ;;  %v2563_v42 = vpop.permute.xlu1 %2562 }
 0x1a5   :  { %v2602_v44 = vsel %vm2590_vm6, %v2561_v43, %v2563_v42 }
 0x1a6   :  { %2857 = vmatprep.subr.bf16.mxu1 %v2602_v44  ;;  %3875 = vmatmul.mubr.msk.bf16.vlgmr.msra.gmra.mrb[4].mxu1 %vm426_vm1, %v4930_v17 }
 0x1a7   :  { %2858 = vmatpush1.bf16.msra.mxu1 %v2601_v41  ;;  %v2583_v47 = vpop.permute.xlu0 %2582  ;;  %2889 = vmatprep.mubr.bf16.mxu1 %v4102_v16 }
 0x1a8   :  { %v2611_v48 = vsel %vm2590_vm6, %v2581_v37, %v2583_v47  ;;  %v2585_v45 = vpop.permute.xlu1 %2584 }
 0x1a9   :  { %v2612_v46 = vsel %vm2590_vm6, %v2583_v47, %v2585_v45 }
 0x1aa   :  { %2816 = vmatprep.subr.bf16.mxu0 %v2612_v46 }
 0x1ab   :  { %2817 = vmatpush1.bf16.msra.mxu0 %v2611_v48  ;;  %v2587_v52 = vpop.permute.xlu0 %2586 }
 0x1ac   :  { %v2613_v49 = vsel %vm2590_vm6, %v2585_v45, %v2587_v52  ;;  %v2589_v50 = vpop.permute.xlu1 %2588 }
 0x1ad   :  { %v2614_v55 = vsel %vm2590_vm6, %v2587_v52, %v2589_v50  ;;  %v3354_v52 = vld [vmem:[%s5435_s4] sm:$0xff] }
 0x1ae   :  { %2859 = vmatprep.subr.bf16.mxu1 %v2614_v55  ;;  %3876 = vmatmul.mubr.msk.bf16.vlgmr.msra.gmra.mrb[8].mxu0 %vm426_vm1, %v4930_v17 }
 0x1af   :  { %2860 = vmatpush1.bf16.msra.mxu1 %v2613_v49  ;;  %v2935_v56 = vpop.permute.xlu0 %2934  ;;  %3068 = vmatprep.mubr.bf16.mxu0 %v4102_v16 }
 0x1b0   :  { %v2937_v51 = vpop.permute.xlu1 %2936 }
 0x1b1   :  { %v2986_v57 = vsel %vm2984_vm7, %v2935_v56, %v2937_v51 }
 0x1b2   :  { %3036 = vmatprep.subr.bf16.mxu0 %v2986_v57  ;;  %3877 = vmatmul.mubr.msk.bf16.vlgmr.msra.gmra.mrb[8].mxu1 %vm426_vm1, %v4930_v17 }
 0x1b3   :  { %v2933_v53 = vpop.permute.xlu0 %2932  ;;  %3111 = vmatprep.mubr.bf16.mxu1 %v4102_v16 }
 0x1b4   :  { %v2985_v54 = vsel %vm2984_vm7, %v2933_v53, %v2935_v56  ;;  %v2939_v58 = vpop.permute.xlu1 %2938 }
 0x1b5   :  { %3037 = vmatpush1.bf16.msra.mxu0 %v2985_v54  ;;  %v2987_v63 = vsel %vm2984_vm7, %v2937_v51, %v2939_v58 }
 0x1b7   :  { %v2941_v59 = vpop.permute.xlu0 %2940 }
 0x1b8   :  { %v2961_v60 = vpop.permute.xlu1 %2960  ;;  %v2988_v62 = vsel %vm2984_vm7, %v2939_v58, %v2941_v59 }
 0x1b9   :  { %3079 = vmatprep.subr.bf16.mxu1 %v2988_v62 }
 0x1ba   :  { %3080 = vmatpush1.bf16.msra.mxu1 %v2987_v63 }
 0x1bb   :  { %v2963_v0 = vpop.permute.xlu0 %2962 }
 0x1bc   :  { %v2959_v1 = vpop.permute.xlu1 %2958  ;;  %v2998_v2 = vsel %vm2984_vm7, %v2961_v60, %v2963_v0 }
 0x1bd   :  { %v2997_v5 = vsel %vm2984_vm7, %v2959_v1, %v2961_v60  ;;  %3038 = vmatprep.subr.bf16.mxu0 %v2998_v2 }
 0x1be   :  { %3039 = vmatpush1.bf16.msra.mxu0 %v2997_v5 }
 0x1bf   :  { %v2943_v10 = vpop.permute.xlu0 %2942 }
 0x1c0   :  { %v2989_v11 = vsel %vm2984_vm7, %v2941_v59, %v2943_v10  ;;  %v2945_v3 = vpop.permute.xlu1 %2944 }
 0x1c1   :  { %3881 = vmatmul.mubr.msk.bf16.vlgmr.msra.gmra.mrb[0].mxu0 %vm426_vm1, %v4977_v8  ;;  %v2990_v6 = vsel %vm2984_vm7, %v2943_v10, %v2945_v3 }
 0x1c2   :  { %3122 = vmatprep.subr.bf16.mxu0 %v2990_v6  ;;  %3154 = vmatprep.mubr.bf16.mxu0 %v4102_v16 }
 0x1c3   :  { %3123 = vmatpush1.bf16.msra.mxu0 %v2989_v11  ;;  %v2965_v61 = vpop.permute.xlu0 %2964 }
 0x1c4   :  { %v2999_v14 = vsel %vm2984_vm7, %v2963_v0, %v2965_v61  ;;  %v2967_v15 = vpop.permute.xlu1 %2966 }
 0x1c5   :  { %v3000_v4 = vsel %vm2984_vm7, %v2965_v61, %v2967_v15 }
 0x1c6   :  { %3081 = vmatprep.subr.bf16.mxu1 %v3000_v4 }
 0x1c7   :  { %3082 = vmatpush1.bf16.msra.mxu1 %v2999_v14  ;;  %v2947_v7 = vpop.permute.xlu0 %2946 }
 0x1c8   :  { %v2991_v12 = vsel %vm2984_vm7, %v2945_v3, %v2947_v7  ;;  %v2949_v13 = vpop.permute.xlu1 %2948 }
 0x1c9   :  { %v2992_v17 = vsel %vm2984_vm7, %v2947_v7, %v2949_v13 }
 0x1ca   :  { %3882 = vmatmul.mubr.msk.bf16.vlgmr.msra.gmra.mrb[0].mxu1 %vm426_vm1, %v4977_v8  ;;  %3165 = vmatprep.subr.bf16.mxu1 %v2992_v17 }
 0x1cb   :  { %3166 = vmatpush1.bf16.msra.mxu1 %v2991_v12  ;;  %v2969_v9 = vpop.permute.xlu0 %2968  ;;  %3197 = vmatprep.mubr.bf16.mxu1 %v4102_v16 }
 0x1cc   :  { %v3001_v19 = vsel %vm2984_vm7, %v2967_v15, %v2969_v9  ;;  %v2971_v23 = vpop.permute.xlu1 %2970 }
 0x1cd   :  { %v3002_v20 = vsel %vm2984_vm7, %v2969_v9, %v2971_v23 }
 0x1ce   :  { %3124 = vmatprep.subr.bf16.mxu0 %v3002_v20 }
 0x1cf   :  { %3125 = vmatpush1.bf16.msra.mxu0 %v3001_v19  ;;  %v2951_v24 = vpop.permute.xlu0 %2950 }
 0x1d0   :  { %v2993_v18 = vsel %vm2984_vm7, %v2949_v13, %v2951_v24  ;;  %v2953_v21 = vpop.permute.xlu1 %2952 }
 0x1d1   :  { %v2994_v27 = vsel %vm2984_vm7, %v2951_v24, %v2953_v21 }
 0x1d2   :  { %3883 = vmatmul.mubr.msk.bf16.vlgmr.msra.gmra.mrb[4].mxu0 %vm426_vm1, %v4977_v8  ;;  %3208 = vmatprep.subr.bf16.mxu0 %v2994_v27 }
 0x1d3   :  { %3209 = vmatpush1.bf16.msra.mxu0 %v2993_v18  ;;  %v2973_v22 = vpop.permute.xlu0 %2972  ;;  %3240 = vmatprep.mubr.bf16.mxu0 %v4102_v16 }
 0x1d4   :  { %v3003_v28 = vsel %vm2984_vm7, %v2971_v23, %v2973_v22  ;;  %v2975_v25 = vpop.permute.xlu1 %2974 }
 0x1d5   :  { %v3004_v26 = vsel %vm2984_vm7, %v2973_v22, %v2975_v25 }
 0x1d6   :  { %3167 = vmatprep.subr.bf16.mxu1 %v3004_v26 }
 0x1d7   :  { %3168 = vmatpush1.bf16.msra.mxu1 %v3003_v28  ;;  %v2955_v31 = vpop.permute.xlu0 %2954 }
 0x1d8   :  { %v2995_v32 = vsel %vm2984_vm7, %v2953_v21, %v2955_v31  ;;  %v2957_v29 = vpop.permute.xlu1 %2956 }
 0x1d9   :  { %v2996_v30 = vsel %vm2984_vm7, %v2955_v31, %v2957_v29 }
 0x1da   :  { %3884 = vmatmul.mubr.msk.bf16.vlgmr.msra.gmra.mrb[4].mxu1 %vm426_vm1, %v4977_v8  ;;  %3251 = vmatprep.subr.bf16.mxu1 %v2996_v30 }
 0x1db   :  { %3252 = vmatpush1.bf16.msra.mxu1 %v2995_v32  ;;  %v2977_v35 = vpop.permute.xlu0 %2976  ;;  %3283 = vmatprep.mubr.bf16.mxu1 %v4102_v16  ;;  %v3358_v16 = vlaneseq }
 0x1dc   :  { %v3005_v33 = vsel %vm2984_vm7, %v2975_v25, %v2977_v35  ;;  %v2979_v36 = vpop.permute.xlu1 %2978 }
 0x1dd   :  { %v3006_v34 = vsel %vm2984_vm7, %v2977_v35, %v2979_v36  ;;  %v5013_v42 = vshrl.u32 %v3358_v16, 7 }
 0x1de   :  { %3210 = vmatprep.subr.bf16.mxu0 %v3006_v34 }
 0x1df   :  { %3211 = vmatpush1.bf16.msra.mxu0 %v3005_v33  ;;  %v2981_v39 = vpop.permute.xlu0 %2980  ;;  %v3360_v48 = vsub.s32 0, %v5013_v42  ;;  %v3364_v45 = vsub.s32 1, %v5013_v42  ;;  %v3368_v49 = vsub.s32 2, %v5013_v42  ;;  %v3372_v58 = vsub.s32 3, %v5013_v42 }
 0x1e0   :  { %v3007_v40 = vsel %vm2984_vm7, %v2979_v36, %v2981_v39  ;;  %v2983_v37 = vpop.permute.xlu1 %2982  ;;  %v3376_v2 = vsub.s32 4, %v5013_v42  ;;  %v3380_v7 = vsub.s32 5, %v5013_v42  ;;  %v3384_v20 = vsub.s32 6, %v5013_v42 }
 0x1e1   :  { %v3008_v38 = vsel %vm2984_vm7, %v2981_v39, %v2983_v37  ;;  %v5030_v51 = vrot.slane %v3354_v52, %v3360_v48  ;;  %v5037_v53 = vrot.slane %v3354_v52, %v3364_v45  ;;  %v5051_v0 = vrot.slane %v3354_v52, %v3368_v49 }
 0x1e2   :  { %3885 = vmatmul.mubr.msk.bf16.vlgmr.msra.gmra.mrb[8].mxu0 %vm426_vm1, %v4977_v8  ;;  %3253 = vmatprep.subr.bf16.mxu1 %v3008_v38  ;;  %v5063_v11 = vrot.slane %v3354_v52, %v3372_v58  ;;  %v5074_v4 = vrot.slane %v3354_v52, %v3376_v2  ;;  %v5091_v28 = vrot.slane %v3354_v52, %v3380_v7  ;;  %v3388_v30 = vsub.s32 7, %v5013_v42  ;;  %v3355_v2 = vld [vmem:[%s5435_s4 + $0x8] sm:$0xf] }
 0x1e3   :  { %3254 = vmatpush1.bf16.msra.mxu1 %v3007_v40  ;;  %v5106_v36 = vrot.slane %v3354_v52, %v3384_v20 }
 0x1e6   :  { %3886 = vmatmul.mubr.msk.bf16.vlgmr.msra.gmra.mrb[8].mxu1 %vm426_vm1, %v4977_v8 }
 0x1f0   :  { %v5017_v46 = vpop.permute.xlu0 %3322 }
 0x1f3   :  { %v5023_v50 = vpop.permute.xlu1 %3327 }
 0x294   :  { %v3070_v43 = vpop.f32.mrb[0].mxu0 }
 0x295   :  { %v3072_v41 = vpop.f32.mrb[1].mxu0  ;;  %v5026_v56 = vadd.f32 %v5017_v46, %v3070_v43 }
 0x296   :  { %v3074_v44 = vpop.f32.mrb[2].mxu0  ;;  %v5033_v57 = vadd.f32 %v5017_v46, %v3072_v41  ;;  %v5115_v41 = vrot.slane %v3354_v52, %v3388_v30 }
 0x297   :  { %v3076_v47 = vpop.f32.mrb[3].mxu0  ;;  %v5041_v60 = vadd.f32 %v5023_v50, %v3074_v44  ;;  %v3418_v5 = vmul.f32 %v5030_v51, %v5026_v56 }
 0x298   :  { %v5044_v62 = vadd.f32 %v5023_v50, %v3076_v47  ;;  %v3419_v8 = vmul.f32 %v5037_v53, %v5033_v57 }
 0x299   :  { %v3430_v3 = vmul.f32 %v5030_v51, %v5041_v60 }
 0x29a   :  { %v3431_v6 = vmul.f32 %v5037_v53, %v5044_v62  ;;  %v3442_v12 = vadd.f32 %v3419_v8, %v3418_v5 }
 0x29c   :  { %v3455_v24 = vadd.f32 %v3431_v6, %v3430_v3 }
 0x29d   :  { %v3113_v55 = vpop.f32.mrb[0].mxu1 }
 0x29e   :  { %v3115_v54 = vpop.f32.mrb[1].mxu1  ;;  %v5047_v63 = vadd.f32 %v5017_v46, %v3113_v55 }
 0x29f   :  { %v3117_v59 = vpop.f32.mrb[2].mxu1  ;;  %v5072_v14 = vadd.f32 %v5017_v46, %v3115_v54 }
 0x2a0   :  { %v3119_v1 = vpop.f32.mrb[3].mxu1  ;;  %v5059_v10 = vadd.f32 %v5023_v50, %v3117_v59  ;;  %v3420_v61 = vmul.f32 %v5051_v0, %v5047_v63 }
 0x2a1   :  { %v5080_v17 = vadd.f32 %v5023_v50, %v3119_v1  ;;  %v3421_v21 = vmul.f32 %v5063_v11, %v5072_v14 }
 0x2a2   :  { %v3432_v13 = vmul.f32 %v5051_v0, %v5059_v10  ;;  %v3443_v18 = vadd.f32 %v3442_v12, %v3420_v61  ;;  %v5141_v12 = vrot.slane %v3355_v2, %v3364_v45 }
 0x2a3   :  { %v3433_v26 = vmul.f32 %v5063_v11, %v5080_v17 }
 0x2a4   :  { %v3456_v25 = vadd.f32 %v3455_v24, %v3432_v13  ;;  %v3444_v35 = vadd.f32 %v3443_v18, %v3421_v21 }
 0x2a5   :  { %v3156_v15 = vpop.f32.mrb[4].mxu0 }
 0x2a6   :  { %v5083_v9 = vadd.f32 %v5017_v46, %v3156_v15  ;;  %v3158_v19 = vpop.f32.mrb[5].mxu0  ;;  %v3457_v39 = vadd.f32 %v3456_v25, %v3433_v26  ;;  %v5137_v15 = vrot.slane %v3355_v2, %v3360_v48  ;;  %v5158_v25 = vrot.slane %v3355_v2, %v3368_v49 }
 0x2a7   :  { %v3160_v23 = vpop.f32.mrb[6].mxu0  ;;  %v5098_v32 = vadd.f32 %v5017_v46, %v3158_v19 }
 0x2a8   :  { %v5089_v27 = vadd.f32 %v5023_v50, %v3160_v23  ;;  %v3162_v22 = vpop.f32.mrb[7].mxu0  ;;  %v3422_v31 = vmul.f32 %v5074_v4, %v5083_v9 }
 0x2a9   :  { %v5101_v29 = vadd.f32 %v5023_v50, %v3162_v22  ;;  %v3423_v37 = vmul.f32 %v5091_v28, %v5098_v32 }
 0x2aa   :  { %v3434_v33 = vmul.f32 %v5074_v4, %v5089_v27  ;;  %v3445_v40 = vadd.f32 %v3444_v35, %v3422_v31  ;;  %v5167_v35 = vrot.slane %v3355_v2, %v3372_v58 }
 0x2ab   :  { %v3435_v43 = vmul.f32 %v5091_v28, %v5101_v29 }
 0x2ac   :  { %v3458_v47 = vadd.f32 %v3457_v39, %v3434_v33  ;;  %v3446_v5 = vadd.f32 %v3445_v40, %v3423_v37 }
 0x2ad   :  { %v3199_v34 = vpop.f32.mrb[4].mxu1 }
 0x2ae   :  { %v5111_v38 = vadd.f32 %v5017_v46, %v3199_v34  ;;  %v3201_v16 = vpop.f32.mrb[5].mxu1  ;;  %v3459_v3 = vadd.f32 %v3458_v47, %v3435_v43 }
 0x2af   :  { %v3203_v44 = vpop.f32.mrb[6].mxu1  ;;  %v5120_v54 = vadd.f32 %v5017_v46, %v3201_v16 }
 0x2b0   :  { %v3424_v55 = vmul.f32 %v5106_v36, %v5111_v38  ;;  %v5123_v59 = vadd.f32 %v5023_v50, %v3203_v44  ;;  %v3205_v1 = vpop.f32.mrb[7].mxu1 }
 0x2b1   :  { %v5131_v8 = vadd.f32 %v5023_v50, %v3205_v1  ;;  %v3425_v61 = vmul.f32 %v5115_v41, %v5120_v54 }
 0x2b2   :  { %v3436_v52 = vmul.f32 %v5106_v36, %v5123_v59  ;;  %v3447_v6 = vadd.f32 %v3446_v5, %v3424_v55 }
 0x2b3   :  { %v3437_v19 = vmul.f32 %v5115_v41, %v5131_v8 }
 0x2b4   :  { %v3460_v13 = vadd.f32 %v3459_v3, %v3436_v52  ;;  %v3448_v21 = vadd.f32 %v3447_v6, %v3425_v61 }
 0x2b5   :  { %v3242_v7 = vpop.f32.mrb[8].mxu0 }
 0x2b6   :  { %v5146_v23 = vadd.f32 %v5017_v46, %v3242_v7  ;;  %v3244_v20 = vpop.f32.mrb[9].mxu0  ;;  %v3461_v33 = vadd.f32 %v3460_v13, %v3437_v19 }
 0x2b7   :  { %v5149_v24 = vadd.f32 %v5017_v46, %v3244_v20  ;;  %v3246_v18 = vpop.f32.mrb[10].mxu0 }
 0x2b8   :  { %v3426_v48 = vmul.f32 %v5137_v15, %v5146_v23  ;;  %v5154_v22 = vadd.f32 %v5023_v50, %v3246_v18  ;;  %v3248_v45 = vpop.f32.mrb[11].mxu0 }
 0x2b9   :  { %v3427_v26 = vmul.f32 %v5141_v12, %v5149_v24  ;;  %v5163_v31 = vadd.f32 %v5023_v50, %v3248_v45  ;;  %v3285_v30 = vpop.f32.mrb[8].mxu1 }
 0x2ba   :  { %v3449_v34 = vadd.f32 %v3448_v21, %v3426_v48  ;;  %v3438_v39 = vmul.f32 %v5137_v15, %v5154_v22  ;;  %v3340_v40 = vadd.f32 %v5017_v46, %v3285_v30  ;;  %v3287_v49 = vpop.f32.mrb[9].mxu1 }
 0x2bb   :  { %v3439_v37 = vmul.f32 %v5141_v12, %v5163_v31  ;;  %v5175_v16 = vadd.f32 %v5017_v46, %v3287_v49  ;;  %v3289_v43 = vpop.f32.mrb[10].mxu1 }
 0x2bc   :  { %v3450_v44 = vadd.f32 %v3449_v34, %v3427_v26  ;;  %v3462_v47 = vadd.f32 %v3461_v33, %v3438_v39  ;;  %v3428_v42 = vmul.f32 %v5158_v25, %v3340_v40  ;;  %v5179_v58 = vadd.f32 %v5023_v50, %v3289_v43  ;;  %v3291_v55 = vpop.f32.mrb[11].mxu1 }
 0x2bd   :  { %v3429_v1 = vmul.f32 %v5167_v35, %v5175_v16  ;;  %v5184_v2 = vadd.f32 %v5023_v50, %v3291_v55 }
 0x2be   :  { %v3463_v5 = vadd.f32 %v3462_v47, %v3439_v37  ;;  %v3451_v52 = vadd.f32 %v3450_v44, %v3428_v42  ;;  %v3440_v46 = vmul.f32 %v5158_v25, %v5179_v58 }
 0x2bf   :  { %v3441_v3 = vmul.f32 %v5167_v35, %v5184_v2 }
 0x2c0   :  { %v3464_v6 = vadd.f32 %v3463_v5, %v3440_v46  ;;  %v3452_v61 = vadd.f32 %v3451_v52, %v3429_v1 }
 0x2c2   :  { %3453 = vadd.xlane.f32.xlu1 %v3452_v61  ;;  %v3465_v7 = vadd.f32 %v3464_v6, %v3441_v3 }
 0x2c4   :  { %3466 = vadd.xlane.f32.xlu0 %v3465_v7 }
 0x34f   :  { %v3454_v13 = vpop.xlane.xlu1 %3453 }
 0x350   :  { %v3468_v19 = vmul.f32 0.0009765625, %v3454_v13 }
 0x351   :  { %v3467_v21 = vpop.xlane.xlu0 %3466 }
 0x352   :  { %v5191_v20 = vsub.f32 %v5026_v56, %v3468_v19  ;;  %v5194_v50 = vsub.f32 %v5033_v57, %v3468_v19  ;;  %v5197_v18 = vsub.f32 %v5047_v63, %v3468_v19  ;;  %v5200_v48 = vsub.f32 %v5072_v14, %v3468_v19 }
 0x353   :  { %v5207_v30 = vsub.f32 %v5083_v9, %v3468_v19  ;;  %v5209_v56 = vmul.f32 0.0009765625, %v3467_v21  ;;  %v5216_v14 = vsub.f32 %v5098_v32, %v3468_v19  ;;  %v5221_v39 = vsub.f32 %v5111_v38, %v3468_v19 }
 0x354   :  { %v3494_v45 = vmul.f32 %v5191_v20, %v5191_v20  ;;  %v3495_v26 = vmul.f32 %v5194_v50, %v5194_v50  ;;  %v3496_v57 = vmul.f32 %v5197_v18, %v5197_v18  ;;  %v3497_v34 = vmul.f32 %v5200_v48, %v5200_v48 }
 0x355   :  { %v3498_v9 = vmul.f32 %v5207_v30, %v5207_v30  ;;  %v5228_v43 = vsub.f32 %v5041_v60, %v5209_v56  ;;  %v5232_v32 = vsub.f32 %v5044_v62, %v5209_v56  ;;  %v5235_v44 = vsub.f32 %v5120_v54, %v3468_v19 }
 0x356   :  { %v3518_v63 = vmul.f32 %v3494_v45, %v5030_v51  ;;  %v3519_v33 = vmul.f32 %v3495_v26, %v5037_v53  ;;  %v3520_v49 = vmul.f32 %v3496_v57, %v5051_v0  ;;  %v3499_v38 = vmul.f32 %v5216_v14, %v5216_v14 }
 0x357   :  { %v3521_v47 = vmul.f32 %v3497_v34, %v5063_v11  ;;  %v5242_v55 = vsub.f32 %v5059_v10, %v5209_v56  ;;  %v5245_v60 = vsub.f32 %v5146_v23, %v3468_v19  ;;  %v3500_v62 = vmul.f32 %v5221_v39, %v5221_v39 }
 0x358   :  { %v3542_v37 = vadd.f32 %v3519_v33, %v3518_v63  ;;  %v3506_v54 = vmul.f32 %v5228_v43, %v5228_v43  ;;  %v3522_v1 = vmul.f32 %v3498_v9, %v5074_v4  ;;  %v5254_v52 = vsub.f32 %v5080_v17, %v5209_v56 }
 0x359   :  { %v3507_v10 = vmul.f32 %v5232_v32, %v5232_v32  ;;  %v5259_v46 = vsub.f32 %v5149_v24, %v3468_v19  ;;  %v3501_v23 = vmul.f32 %v5235_v44, %v5235_v44  ;;  %v3523_v3 = vmul.f32 %v3499_v38, %v5091_v28 }
 0x35a   :  { %v3543_v42 = vadd.f32 %v3542_v37, %v3520_v49  ;;  %v5266_v61 = vsub.f32 %v5089_v27, %v5209_v56  ;;  %v3508_v17 = vmul.f32 %v5242_v55, %v5242_v55  ;;  %v5270_v7 = vsub.f32 %v3340_v40, %v3468_v19 }
 0x35b   :  { %v3502_v13 = vmul.f32 %v5245_v60, %v5245_v60  ;;  %v3530_v24 = vmul.f32 %v3506_v54, %v5030_v51  ;;  %v3531_v21 = vmul.f32 %v3507_v10, %v5037_v53  ;;  %v3524_v45 = vmul.f32 %v3500_v62, %v5106_v36 }
 0x35c   :  { %v3544_v5 = vadd.f32 %v3543_v42, %v3521_v47  ;;  %v5279_v57 = vsub.f32 %v5101_v29, %v5209_v56  ;;  %v3509_v27 = vmul.f32 %v5254_v52, %v5254_v52  ;;  %v5284_v40 = vsub.f32 %v5175_v16, %v3468_v19 }
 0x35d   :  { %v3503_v63 = vmul.f32 %v5259_v46, %v5259_v46  ;;  %v3525_v51 = vmul.f32 %v3501_v23, %v5115_v41  ;;  %v5291_v53 = vsub.f32 %v5123_v59, %v5209_v56  ;;  %v3510_v29 = vmul.f32 %v5266_v61, %v5266_v61 }
 0x35e   :  { %v3545_v6 = vadd.f32 %v3544_v5, %v3522_v1  ;;  %v3532_v34 = vmul.f32 %v3508_v17, %v5051_v0  ;;  %v3555_v9 = vadd.f32 %v3531_v21, %v3530_v24  ;;  %v3504_v16 = vmul.f32 %v5270_v7, %v5270_v7 }
 0x35f   :  { %v3526_v19 = vmul.f32 %v3502_v13, %v5137_v15  ;;  %v5301_v49 = vsub.f32 %v5131_v8, %v5209_v56  ;;  %v3511_v59 = vmul.f32 %v5279_v57, %v5279_v57  ;;  %v3533_v38 = vmul.f32 %v3509_v27, %v5063_v11 }
 0x360   :  { %v3546_v26 = vadd.f32 %v3545_v6, %v3523_v3  ;;  %v3556_v47 = vadd.f32 %v3555_v9, %v3532_v34  ;;  %v3505_v0 = vmul.f32 %v5284_v40, %v5284_v40  ;;  %v3527_v42 = vmul.f32 %v3503_v63, %v5141_v12 }
 0x361   :  { %v5311_v62 = vsub.f32 %v5154_v22, %v5209_v56  ;;  %v3512_v8 = vmul.f32 %v5291_v53, %v5291_v53  ;;  %v3534_v1 = vmul.f32 %v3510_v29, %v5074_v4  ;;  %v3528_v10 = vmul.f32 %v3504_v16, %v5158_v25 }
 0x362   :  { %v3547_v33 = vadd.f32 %v3546_v26, %v3524_v45  ;;  %v3557_v5 = vadd.f32 %v3556_v47, %v3533_v38  ;;  %v5319_v11 = vsub.f32 %v5163_v31, %v5209_v56  ;;  %v3513_v3 = vmul.f32 %v5301_v49, %v5301_v49 }
 0x363   :  { %v3535_v22 = vmul.f32 %v3511_v59, %v5091_v28  ;;  %v3529_v17 = vmul.f32 %v3505_v0, %v5167_v35  ;;  %v5327_v13 = vsub.f32 %v5179_v58, %v5209_v56  ;;  %v3514_v24 = vmul.f32 %v5311_v62, %v5311_v62 }
 0x364   :  { %v3548_v37 = vadd.f32 %v3547_v33, %v3525_v51  ;;  %v3558_v6 = vadd.f32 %v3557_v5, %v3534_v1  ;;  %v3536_v31 = vmul.f32 %v3512_v8, %v5106_v36  ;;  %v5334_v45 = vsub.f32 %v5184_v2, %v5209_v56 }
 0x365   :  { %v3515_v28 = vmul.f32 %v5319_v11, %v5319_v11  ;;  %v3537_v27 = vmul.f32 %v3513_v3, %v5115_v41  ;;  %v3516_v58 = vmul.f32 %v5327_v13, %v5327_v13  ;;  %v3538_v51 = vmul.f32 %v3514_v24, %v5137_v15 }
 0x366   :  { %v3549_v54 = vadd.f32 %v3548_v37, %v3526_v19  ;;  %v3559_v21 = vadd.f32 %v3558_v6, %v3535_v22  ;;  %v3517_v36 = vmul.f32 %v5334_v45, %v5334_v45 }
 0x367   :  { %v3539_v2 = vmul.f32 %v3515_v28, %v5141_v12  ;;  %v3540_v29 = vmul.f32 %v3516_v58, %v5158_v25 }
 0x368   :  { %v3550_v23 = vadd.f32 %v3549_v54, %v3527_v42  ;;  %v3560_v63 = vadd.f32 %v3559_v21, %v3536_v31  ;;  %v3541_v9 = vmul.f32 %v3517_v36, %v5167_v35 }
 0x36a   :  { %v3551_v4 = vadd.f32 %v3550_v23, %v3528_v10  ;;  %v3561_v33 = vadd.f32 %v3560_v63, %v3537_v27 }
 0x36c   :  { %v3552_v26 = vadd.f32 %v3551_v4, %v3529_v17  ;;  %v3562_v56 = vadd.f32 %v3561_v33, %v3538_v51 }
 0x36e   :  { %3553 = vadd.xlane.f32.xlu0 %v3552_v26  ;;  %v3563_v34 = vadd.f32 %v3562_v56, %v3539_v2 }
 0x370   :  { %v3564_v41 = vadd.f32 %v3563_v34, %v3540_v29 }
 0x372   :  { %v3565_v16 = vadd.f32 %v3564_v41, %v3541_v9 }
 0x374   :  { %3566 = vadd.xlane.f32.xlu1 %v3565_v16 }
 0x3fb   :  { %v3554_v19 = vpop.xlane.xlu0 %3553 }
 0x3fc   :  { %v3568_v37 = vmul.f32 0.0009765625, %v3554_v19 }
 0x3fe   :  { %v3570_v59 = vadd.f32 1e-05, %v3568_v37 }
 0x400   :  { %4097 = vrsqrt.f32 %v3570_v59 }
 0x401   :  { %v3567_v15 = vpop.xlane.xlu1 %3566 }
 0x402   :  { %v3569_v38 = vmul.f32 0.0009765625, %v3567_v15 }
 0x404   :  { %v3571_v47 = vadd.f32 1e-05, %v3569_v38 }
 0x406   :  { %4099 = vrsqrt.f32 %v3571_v47 }
 0x40a   :  { %v4098_v0 = vpop.eup %4097 }
 0x40b   :  { %v3574_v12 = vmul.f32 %v4098_v0, %v5191_v20  ;;  %v3575_v42 = vmul.f32 %v4098_v0, %v5194_v50  ;;  %v3576_v25 = vmul.f32 %v4098_v0, %v5197_v18  ;;  %v3577_v35 = vmul.f32 %v4098_v0, %v5200_v48 }
 0x40c   :  { %v3578_v54 = vmul.f32 %v4098_v0, %v5207_v30  ;;  %v3579_v8 = vmul.f32 %v4098_v0, %v5216_v14  ;;  %v3580_v1 = vmul.f32 %v4098_v0, %v5221_v39  ;;  %v3581_v5 = vmul.f32 %v4098_v0, %v5235_v44 }
 0x40d   :  { %v3582_v10 = vmul.f32 %v4098_v0, %v5245_v60  ;;  %v3583_v23 = vmul.f32 %v4098_v0, %v5259_v46  ;;  %v3584_v20 = vmul.f32 %v4098_v0, %v5270_v7  ;;  %v3585_v50 = vmul.f32 %v4098_v0, %v5284_v40 }
 0x40e   :  { %vm3598_vm8 = vcmp.gt.f32.partialorder %v3574_v12, 0.0  ;;  %vm3599_vm9 = vcmp.gt.f32.partialorder %v3575_v42, 0.0  ;;  %vm3600_vm10 = vcmp.gt.f32.partialorder %v3576_v25, 0.0  ;;  %vm3601_vm11 = vcmp.gt.f32.partialorder %v3577_v35, 0.0 }
 0x40f   :  { %vm3602_vm12 = vcmp.gt.f32.partialorder %v3578_v54, 0.0  ;;  %vm3603_vm13 = vcmp.gt.f32.partialorder %v3579_v8, 0.0  ;;  %vm3604_vm14 = vcmp.gt.f32.partialorder %v3580_v1, 0.0  ;;  %vm3605_vm15 = vcmp.gt.f32.partialorder %v3581_v5, 0.0 }
 0x410   :  { %vm3606_vm0 = vcmp.gt.f32.partialorder %v3582_v10, 0.0  ;;  %vm3607_vm1 = vcmp.gt.f32.partialorder %v3583_v23, 0.0  ;;  %vm3608_vm2 = vcmp.gt.f32.partialorder %v3584_v20, 0.0  ;;  %vm3609_vm3 = vcmp.gt.f32.partialorder %v3585_v50, 0.0  ;;  %v4100_v3 = vpop.eup %4099 }
 0x411   :  { %v3622_v18 = vmul.f32 0.2, %v3574_v12  ;;  %v3623_v48 = vmul.f32 0.2, %v3575_v42  ;;  %v3624_v30 = vmul.f32 0.2, %v3576_v25  ;;  %v3586_v41 = vmul.f32 %v4100_v3, %v5228_v43 }
 0x412   :  { %v3625_v14 = vmul.f32 0.2, %v3577_v35  ;;  %v3626_v39 = vmul.f32 0.2, %v3578_v54  ;;  %v3627_v44 = vmul.f32 0.2, %v3579_v8  ;;  %v3587_v16 = vmul.f32 %v4100_v3, %v5232_v32 }
 0x413   :  { %v3628_v60 = vmul.f32 0.2, %v3580_v1  ;;  %v3629_v46 = vmul.f32 0.2, %v3581_v5  ;;  %v3630_v7 = vmul.f32 0.2, %v3582_v10  ;;  %v3646_v40 = vsel %vm3598_vm8, %v3574_v12, %v3622_v18 }
 0x414   :  { %v3631_v22 = vmul.f32 0.2, %v3583_v23  ;;  %v3632_v6 = vmul.f32 0.2, %v3584_v20  ;;  %v3633_v17 = vmul.f32 0.2, %v3585_v50  ;;  %v3647_v4 = vsel %vm3599_vm9, %v3575_v42, %v3623_v48 }
 0x415   :  { %v3648_v24 = vsel %vm3600_vm10, %v3576_v25, %v3624_v30  ;;  %v3649_v31 = vsel %vm3601_vm11, %v3577_v35, %v3625_v14  ;;  %v3650_v21 = vsel %vm3602_vm12, %v3578_v54, %v3626_v39  ;;  %v3651_v26 = vsel %vm3603_vm13, %v3579_v8, %v3627_v44 }
 0x416   :  { %v3652_v28 = vsel %vm3604_vm14, %v3580_v1, %v3628_v60  ;;  %v3653_v27 = vsel %vm3605_vm15, %v3581_v5, %v3629_v46  ;;  %v3654_v63 = vsel %vm3606_vm0, %v3582_v10, %v3630_v7  ;;  %v3655_v58 = vsel %vm3607_vm1, %v3583_v23, %v3631_v22 }
 0x417   :  { %v3656_v51 = vsel %vm3608_vm2, %v3584_v20, %v3632_v6  ;;  %v3657_v33 = vsel %vm3609_vm3, %v3585_v50, %v3633_v17  ;;  %v3899_v36 = vpack.c.bf16 %v3647_v4, %v3646_v40  ;;  %v3900_v2 = vpack.c.bf16 %v3649_v31, %v3648_v24 }
 0x418   :  { %v3901_v56 = vpack.c.bf16 %v3651_v26, %v3650_v21  ;;  %v3902_v29 = vpack.c.bf16 %v3653_v27, %v3652_v28  ;;  %v3903_v34 = vpack.c.bf16 %v3655_v58, %v3654_v63  ;;  %v3904_v9 = vpack.c.bf16 %v3657_v33, %v3656_v51 }
 0x419   :  { %3742 = vst [vmem:[%s5436_s5] sm:$0xff] %v3899_v36  ;;  %3743 = vst [vmem:[%s5436_s5 + $0x8] sm:$0xff] %v3900_v2  ;;  %v3588_v19 = vmul.f32 %v4100_v3, %v5242_v55  ;;  %v3589_v37 = vmul.f32 %v4100_v3, %v5254_v52  ;;  %v3590_v43 = vmul.f32 %v4100_v3, %v5266_v61  ;;  %vm3610_vm4 = vcmp.gt.f32.partialorder %v3586_v41, 0.0 }
 0x41a   :  { %3744 = vst [vmem:[%s5436_s5 + $0x10] sm:$0xff] %v3901_v56  ;;  %3745 = vst [vmem:[%s5436_s5 + $0x18] sm:$0xff] %v3902_v29  ;;  %v3591_v32 = vmul.f32 %v4100_v3, %v5279_v57  ;;  %v3592_v55 = vmul.f32 %v4100_v3, %v5291_v53  ;;  %v3593_v52 = vmul.f32 %v4100_v3, %v5301_v49  ;;  %vm3611_vm5 = vcmp.gt.f32.partialorder %v3587_v16, 0.0 }
 0x41b   :  { %3746 = vst [vmem:[%s5436_s5 + $0x20] sm:$0xff] %v3903_v34  ;;  %3747 = vst [vmem:[%s5436_s5 + $0x28] sm:$0xff] %v3904_v9  ;;  %v3594_v59 = vmul.f32 %v4100_v3, %v5311_v62  ;;  %v3595_v15 = vmul.f32 %v4100_v3, %v5319_v11  ;;  %v3596_v38 = vmul.f32 %v4100_v3, %v5327_v13  ;;  %vm3612_vm6 = vcmp.gt.f32.partialorder %v3588_v19, 0.0 }
 0x41c   :  { %v3597_v47 = vmul.f32 %v4100_v3, %v5334_v45  ;;  %vm3613_vm7 = vcmp.gt.f32.partialorder %v3589_v37, 0.0  ;;  %vm3614_vm8 = vcmp.gt.f32.partialorder %v3590_v43, 0.0  ;;  %vm3615_vm9 = vcmp.gt.f32.partialorder %v3591_v32, 0.0 }
 0x41d   :  { %vm3616_vm10 = vcmp.gt.f32.partialorder %v3592_v55, 0.0  ;;  %vm3617_vm11 = vcmp.gt.f32.partialorder %v3593_v52, 0.0  ;;  %vm3618_vm12 = vcmp.gt.f32.partialorder %v3594_v59, 0.0  ;;  %vm3619_vm13 = vcmp.gt.f32.partialorder %v3595_v15, 0.0 }
 0x41e   :  { %vm3620_vm14 = vcmp.gt.f32.partialorder %v3596_v38, 0.0  ;;  %vm3621_vm15 = vcmp.gt.f32.partialorder %v3597_v47, 0.0  ;;  %v3634_v61 = vmul.f32 0.2, %v3586_v41  ;;  %v3635_v57 = vmul.f32 0.2, %v3587_v16 }
 0x41f   :  { %v3636_v53 = vmul.f32 0.2, %v3588_v19  ;;  %v3637_v49 = vmul.f32 0.2, %v3589_v37  ;;  %v3638_v62 = vmul.f32 0.2, %v3590_v43 }
 0x420   :  { %v3639_v11 = vmul.f32 0.2, %v3591_v32  ;;  %v3640_v13 = vmul.f32 0.2, %v3592_v55  ;;  %v3641_v45 = vmul.f32 0.2, %v3593_v52  ;;  %v3658_v12 = vsel %vm3610_vm4, %v3586_v41, %v3634_v61 }
 0x421   :  { %v3642_v0 = vmul.f32 0.2, %v3594_v59  ;;  %v3643_v42 = vmul.f32 0.2, %v3595_v15  ;;  %v3644_v25 = vmul.f32 0.2, %v3596_v38  ;;  %v3659_v54 = vsel %vm3611_vm5, %v3587_v16, %v3635_v57 }
 0x422   :  { %v3645_v35 = vmul.f32 0.2, %v3597_v47  ;;  %v3660_v8 = vsel %vm3612_vm6, %v3588_v19, %v3636_v53  ;;  %v3661_v1 = vsel %vm3613_vm7, %v3589_v37, %v3637_v49  ;;  %v3662_v5 = vsel %vm3614_vm8, %v3590_v43, %v3638_v62 }
 0x423   :  { %v3663_v10 = vsel %vm3615_vm9, %v3591_v32, %v3639_v11  ;;  %v3664_v23 = vsel %vm3616_vm10, %v3592_v55, %v3640_v13  ;;  %v3665_v20 = vsel %vm3617_vm11, %v3593_v52, %v3641_v45  ;;  %v3666_v50 = vsel %vm3618_vm12, %v3594_v59, %v3642_v0 }
 0x424   :  { %v3667_v18 = vsel %vm3619_vm13, %v3595_v15, %v3643_v42  ;;  %v3668_v48 = vsel %vm3620_vm14, %v3596_v38, %v3644_v25  ;;  %v3669_v30 = vsel %vm3621_vm15, %v3597_v47, %v3645_v35  ;;  %v3905_v14 = vpack.c.bf16 %v3659_v54, %v3658_v12 }
 0x425   :  { %v3906_v39 = vpack.c.bf16 %v3661_v1, %v3660_v8  ;;  %v3907_v44 = vpack.c.bf16 %v3663_v10, %v3662_v5  ;;  %v3908_v60 = vpack.c.bf16 %v3665_v20, %v3664_v23  ;;  %v3909_v46 = vpack.c.bf16 %v3667_v18, %v3666_v50 }
 0x426   :  { %v3910_v7 = vpack.c.bf16 %v3669_v30, %v3668_v48  ;;  %3748 = vst [vmem:[%s5436_s5 + $0x30] sm:$0xff] %v3905_v14 }
 0x427   :  { %3749 = vst [vmem:[%s5436_s5 + $0x38] sm:$0xff] %v3906_v39  ;;  %3750 = vst [vmem:[%s5436_s5 + $0x40] sm:$0xff] %v3907_v44 }
 0x428   :  { %3751 = vst [vmem:[%s5436_s5 + $0x48] sm:$0xff] %v3908_v60  ;;  %3752 = vst [vmem:[%s5436_s5 + $0x50] sm:$0xff] %v3909_v46 }
 0x429   :  { %3753 = vst [vmem:[%s5436_s5 + $0x58] sm:$0xff] %v3910_v7 }

// kernel: discriminator_forward.6
= control target key start
LH: loop header
LB: loop body
LE: loop exit
PB: predicated region body
PF: predicated region fallthrough
CT: control target
= control target key end

     0   :  { %s1197_s20 = smov 103   ;;  %s1198_s21 = smov 127   ;;  %v1199_v12 = vmov 0   ;;  %vm261_vm0 = vcmask 1039360   ;;  %vm606_vm1 = vcmask 842752   ;;  %vm705_vm2 = vcmask 834560   ;;  %s1548_s0 = inlined_call_operand.vmem [shape: bf16[8,16,64], index: 0, kind: input, shape index: {}]   ;;  %s1549_s1 = inlined_call_operand.vmem [shape: bf16[64,512], index: 1, kind: input, shape index: {}, may-alias: {1,2}]   ;;  %s1550_s2 = inlined_call_operand.vmem [shape: bf16[64,512], index: 2, kind: input, shape index: {}, may-alias: {1,2}]   ;;  %s1551_s3 = inlined_call_operand.vmem [shape: f32[16,1], index: 3, kind: input, shape index: {}]   ;;  %s1552_s4 = inlined_call_operand.vmem [shape: f32[1,256], index: 4, kind: input, shape index: {}]   ;;  %s1553_s5 = inlined_call_operand.vmem [shape: bf16[16,256], index: 5, kind: output, shape index: {}]  }
   0x1   :  { %v1238_v0 = vld [vmem:[%s1549_s1 + $0x4] ss:$16 sps:$4 sm:$0xff]   ;;  %v1247_v1 = vld [vmem:[%s1550_s2 + $0x8] ss:$16 sps:$4 sm:$0xff]   ;;  %v1252_v2 = vld [vmem:[%s1549_s1] ss:$16 sps:$4 sm:$0xff]   ;;  %658 = vmatprep.mubr.bf16.mxu0 %v1199_v12  ;;  %314 = vmatprep.mubr.bf16.mxu1 %v1199_v12 }
   0x2   :  { %584 = vrot.lane.b32.xlu1 %v1238_v0, %s1197_s20  ;;  %239 = vrot.lane.b32.xlu0 %v1238_v0, %s1198_s21  ;;  %v1261_v3 = vld [vmem:[%s1550_s2 + $0x28] ss:$16 sps:$4 sm:$0xff]   ;;  %v1266_v4 = vld [vmem:[%s1549_s1 + $0x24] ss:$16 sps:$4 sm:$0xff]   ;;  %s1200_s18 = smov 102   ;;  %s1202_s19 = smov 98  }
   0x3   :  { %v1283_v5 = vld [vmem:[%s1549_s1 + $0x20] ss:$16 sps:$4 sm:$0xff]   ;;  %v1292_v6 = vld [vmem:[%s1550_s2 + $0x48] ss:$16 sps:$4 sm:$0xff]   ;;  %v1297_v7 = vld [vmem:[%s1549_s1 + $0x44] ss:$16 sps:$4 sm:$0xff]   ;;  %1167 = vset.pattern.permute.xlu0 %v1199_v12  ;;  %1168 = vset.pattern.permute.xlu1 %v1199_v12 }
   0x4   :  { %v1310_v8 = vld [vmem:[%s1549_s1 + $0x40] ss:$16 sps:$4 sm:$0xff]   ;;  %v1319_v9 = vld [vmem:[%s1550_s2 + $0x68] ss:$16 sps:$4 sm:$0xff]   ;;  %v1324_v10 = vld [vmem:[%s1549_s1 + $0x64] ss:$16 sps:$4 sm:$0xff]  }
   0x5   :  { %v1337_v11 = vld [vmem:[%s1549_s1 + $0x60] ss:$16 sps:$4 sm:$0xff]   ;;  %s1201_s1 = smov 123   ;;  %v1186_v54 = vld [vmem:[%s1548_s0 + $0x8] sm:$0xff]   ;;  %vm278_vm3 = vcmask 523264   ;;  %vm408_vm4 = vcmask 1006592  }
   0x6   :  { %586 = vrot.lane.b32.xlu1 %v1247_v1, %s1197_s20  ;;  %241 = vrot.lane.b32.xlu0 %v1247_v1, %s1198_s21  ;;  %v1185_v53 = vld [vmem:[%s1548_s0 + $0x20] sm:$0xff]   ;;  %v971_v62 = vld [vmem:[%s1551_s3 + $0x8] sm:$0xff]  ;;  %vm804_vm5 = vcmask 801792   ;;  %vm507_vm6 = vcmask 998400   ;;  %vm903_vm7 = vcmask 793600  }
   0x7   :  { %v970_v60 = vld [vmem:[%s1551_s3] sm:$0xff] }
   0xa   :  { %582 = vrot.lane.b32.xlu1 %v1252_v2, %s1197_s20  ;;  %237 = vrot.lane.b32.xlu0 %v1252_v2, %s1198_s21 }
   0xe   :  { %247 = vrot.lane.b32.xlu1 %v1261_v3, %s1198_s21  ;;  %245 = vrot.lane.b32.xlu0 %v1266_v4, %s1198_s21 }
  0x12   :  { %592 = vrot.lane.b32.xlu1 %v1261_v3, %s1197_s20  ;;  %590 = vrot.lane.b32.xlu0 %v1266_v4, %s1197_s20 }
  0x16   :  { %588 = vrot.lane.b32.xlu1 %v1283_v5, %s1197_s20  ;;  %243 = vrot.lane.b32.xlu0 %v1283_v5, %s1198_s21 }
  0x1a   :  { %253 = vrot.lane.b32.xlu1 %v1292_v6, %s1198_s21  ;;  %251 = vrot.lane.b32.xlu0 %v1297_v7, %s1198_s21 }
  0x1e   :  { %598 = vrot.lane.b32.xlu1 %v1292_v6, %s1197_s20  ;;  %596 = vrot.lane.b32.xlu0 %v1297_v7, %s1197_s20 }
  0x22   :  { %594 = vrot.lane.b32.xlu1 %v1310_v8, %s1197_s20  ;;  %249 = vrot.lane.b32.xlu0 %v1310_v8, %s1198_s21 }
  0x26   :  { %259 = vrot.lane.b32.xlu1 %v1319_v9, %s1198_s21  ;;  %257 = vrot.lane.b32.xlu0 %v1324_v10, %s1198_s21 }
  0x2a   :  { %604 = vrot.lane.b32.xlu1 %v1319_v9, %s1197_s20  ;;  %602 = vrot.lane.b32.xlu0 %v1324_v10, %s1197_s20 }
  0x2e   :  { %600 = vrot.lane.b32.xlu1 %v1337_v11, %s1197_s20  ;;  %255 = vrot.lane.b32.xlu0 %v1337_v11, %s1198_s21  ;;  %s1203_s20 = smov 122   ;;  %s1204_s21 = smov 97  }
  0x32   :  { %685 = vrot.lane.b32.xlu1 %v1247_v1, %s1200_s18  ;;  %683 = vrot.lane.b32.xlu0 %v1238_v0, %s1200_s18 }
  0x36   :  { %689 = vrot.lane.b32.xlu1 %v1266_v4, %s1200_s18  ;;  %681 = vrot.lane.b32.xlu0 %v1252_v2, %s1200_s18 }
  0x3a   :  { %687 = vrot.lane.b32.xlu1 %v1283_v5, %s1200_s18  ;;  %691 = vrot.lane.b32.xlu0 %v1261_v3, %s1200_s18 }
  0x3e   :  { %697 = vrot.lane.b32.xlu1 %v1292_v6, %s1200_s18  ;;  %695 = vrot.lane.b32.xlu0 %v1297_v7, %s1200_s18 }
  0x42   :  { %701 = vrot.lane.b32.xlu1 %v1324_v10, %s1200_s18  ;;  %693 = vrot.lane.b32.xlu0 %v1310_v8, %s1200_s18 }
  0x46   :  { %699 = vrot.lane.b32.xlu1 %v1337_v11, %s1200_s18  ;;  %703 = vrot.lane.b32.xlu0 %v1319_v9, %s1200_s18 }
  0x4a   :  { %388 = vrot.lane.b32.xlu1 %v1247_v1, %s1201_s1  ;;  %386 = vrot.lane.b32.xlu0 %v1238_v0, %s1201_s1 }
  0x4e   :  { %784 = vrot.lane.b32.xlu1 %v1247_v1, %s1202_s19  ;;  %782 = vrot.lane.b32.xlu0 %v1238_v0, %s1202_s19 }
  0x52   :  { %780 = vrot.lane.b32.xlu1 %v1252_v2, %s1202_s19  ;;  %384 = vrot.lane.b32.xlu0 %v1252_v2, %s1201_s1 }
  0x56   :  { %394 = vrot.lane.b32.xlu1 %v1261_v3, %s1201_s1  ;;  %392 = vrot.lane.b32.xlu0 %v1266_v4, %s1201_s1 }
  0x5a   :  { %790 = vrot.lane.b32.xlu1 %v1261_v3, %s1202_s19  ;;  %788 = vrot.lane.b32.xlu0 %v1266_v4, %s1202_s19 }
  0x5e   :  { %786 = vrot.lane.b32.xlu1 %v1283_v5, %s1202_s19  ;;  %390 = vrot.lane.b32.xlu0 %v1283_v5, %s1201_s1 }
  0x62   :  { %400 = vrot.lane.b32.xlu1 %v1292_v6, %s1201_s1  ;;  %398 = vrot.lane.b32.xlu0 %v1297_v7, %s1201_s1 }
  0x66   :  { %796 = vrot.lane.b32.xlu1 %v1292_v6, %s1202_s19  ;;  %794 = vrot.lane.b32.xlu0 %v1297_v7, %s1202_s19 }
  0x6a   :  { %792 = vrot.lane.b32.xlu1 %v1310_v8, %s1202_s19  ;;  %396 = vrot.lane.b32.xlu0 %v1310_v8, %s1201_s1 }
  0x6e   :  { %406 = vrot.lane.b32.xlu1 %v1319_v9, %s1201_s1  ;;  %404 = vrot.lane.b32.xlu0 %v1324_v10, %s1201_s1 }
  0x72   :  { %802 = vrot.lane.b32.xlu1 %v1319_v9, %s1202_s19  ;;  %800 = vrot.lane.b32.xlu0 %v1324_v10, %s1202_s19 }
  0x74   :  { %v585_v13 = vpop.permute.xlu1 %584  ;;  %v240_v14 = vpop.permute.xlu0 %239 }
  0x76   :  { %798 = vrot.lane.b32.xlu1 %v1337_v11, %s1202_s19  ;;  %402 = vrot.lane.b32.xlu0 %v1337_v11, %s1201_s1 }
  0x78   :  { %v587_v15 = vpop.permute.xlu1 %586  ;;  %v242_v16 = vpop.permute.xlu0 %241 }
  0x79   :  { %v263_v17 = vsel %vm261_vm0, %v240_v14, %v242_v16  ;;  %v608_v18 = vsel %vm606_vm1, %v585_v13, %v587_v15 }
  0x7a   :  { %282 = vmatprep.subr.bf16.mxu1 %v263_v17  ;;  %626 = vmatprep.subr.bf16.mxu0 %v608_v18 }
  0x7b   :  { %487 = vrot.lane.b32.xlu1 %v1247_v1, %s1203_s20  ;;  %485 = vrot.lane.b32.xlu0 %v1238_v0, %s1203_s20 }
  0x7c   :  { %v583_v19 = vpop.permute.xlu1 %582  ;;  %v238_v20 = vpop.permute.xlu0 %237 }
  0x7d   :  { %v607_v21 = vsel %vm606_vm1, %v583_v19, %v585_v13  ;;  %v262_v22 = vsel %vm261_vm0, %v238_v20, %v240_v14 }
  0x7e   :  { %627 = vmatpush1.bf16.msra.mxu0 %v607_v21  ;;  %283 = vmatpush1.bf16.msra.mxu1 %v262_v22 }
  0x7f   :  { %883 = vrot.lane.b32.xlu1 %v1247_v1, %s1204_s21  ;;  %881 = vrot.lane.b32.xlu0 %v1238_v0, %s1204_s21 }
  0x80   :  { %v248_v23 = vpop.permute.xlu1 %247  ;;  %v246_v24 = vpop.permute.xlu0 %245 }
  0x81   :  { %v265_v25 = vsel %vm261_vm0, %v246_v24, %v248_v23 }
  0x82   :  { %284 = vmatprep.subr.bf16.mxu1 %v265_v25 }
  0x83   :  { %879 = vrot.lane.b32.xlu1 %v1252_v2, %s1204_s21  ;;  %483 = vrot.lane.b32.xlu0 %v1252_v2, %s1203_s20 }
  0x84   :  { %v593_v26 = vpop.permute.xlu1 %592  ;;  %v591_v27 = vpop.permute.xlu0 %590 }
  0x85   :  { %v610_v28 = vsel %vm606_vm1, %v591_v27, %v593_v26 }
  0x86   :  { %628 = vmatprep.subr.bf16.mxu0 %v610_v28 }
  0x87   :  { %493 = vrot.lane.b32.xlu1 %v1261_v3, %s1203_s20  ;;  %491 = vrot.lane.b32.xlu0 %v1266_v4, %s1203_s20 }
  0x88   :  { %v589_v29 = vpop.permute.xlu1 %588  ;;  %v244_v30 = vpop.permute.xlu0 %243 }
  0x89   :  { %v264_v31 = vsel %vm261_vm0, %v244_v30, %v246_v24  ;;  %v609_v32 = vsel %vm606_vm1, %v589_v29, %v591_v27 }
  0x8a   :  { %285 = vmatpush1.bf16.msra.mxu1 %v264_v31  ;;  %629 = vmatpush1.bf16.msra.mxu0 %v609_v32 }
  0x8b   :  { %889 = vrot.lane.b32.xlu1 %v1261_v3, %s1204_s21  ;;  %887 = vrot.lane.b32.xlu0 %v1266_v4, %s1204_s21 }
  0x8c   :  { %v254_v33 = vpop.permute.xlu1 %253  ;;  %v252_v34 = vpop.permute.xlu0 %251 }
  0x8d   :  { %v267_v35 = vsel %vm261_vm0, %v252_v34, %v254_v33 }
  0x8e   :  { %286 = vmatprep.subr.bf16.mxu1 %v267_v35 }
  0x8f   :  { %885 = vrot.lane.b32.xlu1 %v1283_v5, %s1204_s21  ;;  %489 = vrot.lane.b32.xlu0 %v1283_v5, %s1203_s20 }
  0x90   :  { %v599_v36 = vpop.permute.xlu1 %598  ;;  %v597_v37 = vpop.permute.xlu0 %596 }
  0x91   :  { %v612_v38 = vsel %vm606_vm1, %v597_v37, %v599_v36 }
  0x92   :  { %630 = vmatprep.subr.bf16.mxu0 %v612_v38 }
  0x93   :  { %499 = vrot.lane.b32.xlu1 %v1292_v6, %s1203_s20  ;;  %497 = vrot.lane.b32.xlu0 %v1297_v7, %s1203_s20 }
  0x94   :  { %v595_v39 = vpop.permute.xlu1 %594  ;;  %v250_v40 = vpop.permute.xlu0 %249 }
  0x95   :  { %v266_v41 = vsel %vm261_vm0, %v250_v40, %v252_v34  ;;  %v611_v42 = vsel %vm606_vm1, %v595_v39, %v597_v37 }
  0x96   :  { %287 = vmatpush1.bf16.msra.mxu1 %v266_v41  ;;  %631 = vmatpush1.bf16.msra.mxu0 %v611_v42 }
  0x97   :  { %895 = vrot.lane.b32.xlu1 %v1292_v6, %s1204_s21  ;;  %893 = vrot.lane.b32.xlu0 %v1297_v7, %s1204_s21  ;;  %v1187_v6 = vld [vmem:[%s1548_s0] sm:$0xff]  }
  0x98   :  { %v260_v43 = vpop.permute.xlu1 %259  ;;  %v258_v44 = vpop.permute.xlu0 %257 }
  0x99   :  { %v269_v45 = vsel %vm261_vm0, %v258_v44, %v260_v43 }
  0x9a   :  { %288 = vmatprep.subr.bf16.mxu1 %v269_v45 }
  0x9b   :  { %891 = vrot.lane.b32.xlu1 %v1310_v8, %s1204_s21  ;;  %495 = vrot.lane.b32.xlu0 %v1310_v8, %s1203_s20 }
  0x9c   :  { %v605_v46 = vpop.permute.xlu1 %604  ;;  %v603_v47 = vpop.permute.xlu0 %602 }
  0x9d   :  { %v614_v48 = vsel %vm606_vm1, %v603_v47, %v605_v46 }
  0x9e   :  { %632 = vmatprep.subr.bf16.mxu0 %v614_v48 }
  0x9f   :  { %505 = vrot.lane.b32.xlu1 %v1319_v9, %s1203_s20  ;;  %503 = vrot.lane.b32.xlu0 %v1324_v10, %s1203_s20 }
  0xa0   :  { %v601_v49 = vpop.permute.xlu1 %600  ;;  %v256_v50 = vpop.permute.xlu0 %255 }
  0xa1   :  { %v268_v51 = vsel %vm261_vm0, %v256_v50, %v258_v44  ;;  %v613_v52 = vsel %vm606_vm1, %v601_v49, %v603_v47 }
  0xa2   :  { %289 = vmatpush1.bf16.msra.mxu1 %v268_v51  ;;  %633 = vmatpush1.bf16.msra.mxu0 %v613_v52 }
  0xa3   :  { %901 = vrot.lane.b32.xlu1 %v1319_v9, %s1204_s21  ;;  %899 = vrot.lane.b32.xlu0 %v1324_v10, %s1204_s21 }
  0xa4   :  { %v686_v55 = vpop.permute.xlu1 %685  ;;  %v684_v56 = vpop.permute.xlu0 %683  ;;  %333 = vmatprep.subr.bf16.mxu1 %v1238_v0 }
  0xa5   :  { %v707_v57 = vsel %vm705_vm2, %v684_v56, %v686_v55  ;;  %1114 = vmatmul.mubr.msk.bf16.vlgmr.msra.gmra.mrb[0].mxu0 %vm278_vm3, %v1185_v53  ;;  %1100 = vmatmul.mubr.msk.bf16.vlgmr.msra.gmra.mrb[0].mxu1 %vm278_vm3, %v1186_v54 }
  0xa6   :  { %725 = vmatprep.subr.bf16.mxu0 %v707_v57  ;;  %334 = vmatpush1.bf16.msra.mxu1 %v1252_v2  ;;  %v1190_v57 = vld [vmem:[%s1548_s0 + $0x30] sm:$0xff]  }
  0xa7   :  { %897 = vrot.lane.b32.xlu1 %v1337_v11, %s1204_s21  ;;  %501 = vrot.lane.b32.xlu0 %v1337_v11, %s1203_s20 }
  0xa8   :  { %v690_v58 = vpop.permute.xlu1 %689  ;;  %v682_v59 = vpop.permute.xlu0 %681  ;;  %335 = vmatprep.subr.bf16.mxu1 %v1266_v4  ;;  %365 = vmatprep.mubr.bf16.mxu1 %v1199_v12 }
  0xa9   :  { %v706_v61 = vsel %vm705_vm2, %v682_v59, %v684_v56  ;;  %757 = vmatprep.mubr.bf16.mxu0 %v1199_v12  ;;  %v1189_v56 = vld [vmem:[%s1548_s0 + $0x10] sm:$0xff]  }
  0xaa   :  { %726 = vmatpush1.bf16.msra.mxu0 %v706_v61  ;;  %336 = vmatpush1.bf16.msra.mxu1 %v1283_v5 }
  0xab   :  { %337 = vmatprep.subr.bf16.mxu1 %v1297_v7  ;;  %974 = vperm.xlu0 %1167, %v970_v60  }
  0xac   :  { %v688_v63 = vpop.permute.xlu1 %687  ;;  %v692_v0 = vpop.permute.xlu0 %691  ;;  %979 = vperm.xlu1 %1168, %v971_v62  }
  0xad   :  { %v708_v1 = vsel %vm705_vm2, %v688_v63, %v690_v58  ;;  %v709_v2 = vsel %vm705_vm2, %v690_v58, %v692_v0 }
  0xae   :  { %727 = vmatprep.subr.bf16.mxu0 %v709_v2  ;;  %338 = vmatpush1.bf16.msra.mxu1 %v1310_v8 }
  0xaf   :  { %728 = vmatpush1.bf16.msra.mxu0 %v708_v1  ;;  %339 = vmatprep.subr.bf16.mxu1 %v1324_v10 }
  0xb0   :  { %v698_v3 = vpop.permute.xlu1 %697  ;;  %v696_v4 = vpop.permute.xlu0 %695 }
  0xb1   :  { %v711_v5 = vsel %vm705_vm2, %v696_v4, %v698_v3 }
  0xb2   :  { %729 = vmatprep.subr.bf16.mxu0 %v711_v5  ;;  %340 = vmatpush1.bf16.msra.mxu1 %v1337_v11  ;;  %v1188_v11 = vld [vmem:[%s1548_s0 + $0x28] sm:$0xff]  }
  0xb4   :  { %v702_v7 = vpop.permute.xlu1 %701  ;;  %v694_v9 = vpop.permute.xlu0 %693 }
  0xb5   :  { %v710_v13 = vsel %vm705_vm2, %v694_v9, %v696_v4  ;;  %1102 = vmatmul.mubr.msk.bf16.vlgmr.msra.gmra.mrb[0].mxu1 %vm278_vm3, %v1187_v6 }
  0xb6   :  { %730 = vmatpush1.bf16.msra.mxu0 %v710_v13  ;;  %460 = vmatprep.mubr.bf16.mxu1 %v1199_v12 }
  0xb8   :  { %v700_v8 = vpop.permute.xlu1 %699  ;;  %v704_v10 = vpop.permute.xlu0 %703 }
  0xb9   :  { %v712_v14 = vsel %vm705_vm2, %v700_v8, %v702_v7  ;;  %v713_v15 = vsel %vm705_vm2, %v702_v7, %v704_v10 }
  0xba   :  { %731 = vmatprep.subr.bf16.mxu0 %v713_v15 }
  0xbb   :  { %732 = vmatpush1.bf16.msra.mxu0 %v712_v14 }
  0xbc   :  { %v389_v16 = vpop.permute.xlu1 %388  ;;  %v387_v17 = vpop.permute.xlu0 %386 }
  0xbd   :  { %v410_v18 = vsel %vm408_vm4, %v387_v17, %v389_v16 }
  0xbe   :  { %428 = vmatprep.subr.bf16.mxu1 %v410_v18  ;;  %1118 = vmatmul.mubr.msk.bf16.vlgmr.msra.gmra.mrb[0].mxu0 %vm278_vm3, %v1188_v11 }
  0xbf   :  { %856 = vmatprep.mubr.bf16.mxu0 %v1199_v12 }
  0xc0   :  { %v785_v19 = vpop.permute.xlu1 %784  ;;  %v783_v20 = vpop.permute.xlu0 %782 }
  0xc1   :  { %v806_v21 = vsel %vm804_vm5, %v783_v20, %v785_v19 }
  0xc2   :  { %824 = vmatprep.subr.bf16.mxu0 %v806_v21 }
  0xc4   :  { %v781_v22 = vpop.permute.xlu1 %780  ;;  %v385_v23 = vpop.permute.xlu0 %384 }
  0xc5   :  { %v805_v24 = vsel %vm804_vm5, %v781_v22, %v783_v20  ;;  %v409_v25 = vsel %vm408_vm4, %v385_v23, %v387_v17 }
  0xc6   :  { %429 = vmatpush1.bf16.msra.mxu1 %v409_v25  ;;  %825 = vmatpush1.bf16.msra.mxu0 %v805_v24 }
  0xc8   :  { %v395_v26 = vpop.permute.xlu1 %394  ;;  %v393_v27 = vpop.permute.xlu0 %392 }
  0xc9   :  { %v412_v28 = vsel %vm408_vm4, %v393_v27, %v395_v26 }
  0xca   :  { %430 = vmatprep.subr.bf16.mxu1 %v412_v28 }
  0xcc   :  { %v791_v29 = vpop.permute.xlu1 %790  ;;  %v789_v30 = vpop.permute.xlu0 %788 }
  0xcd   :  { %v808_v31 = vsel %vm804_vm5, %v789_v30, %v791_v29 }
  0xce   :  { %826 = vmatprep.subr.bf16.mxu0 %v808_v31 }
  0xd0   :  { %v787_v32 = vpop.permute.xlu1 %786  ;;  %v391_v33 = vpop.permute.xlu0 %390 }
  0xd1   :  { %v807_v34 = vsel %vm804_vm5, %v787_v32, %v789_v30  ;;  %v411_v35 = vsel %vm408_vm4, %v391_v33, %v393_v27 }
  0xd2   :  { %431 = vmatpush1.bf16.msra.mxu1 %v411_v35  ;;  %827 = vmatpush1.bf16.msra.mxu0 %v807_v34  ;;  %v1191_v34 = vld [vmem:[%s1548_s0 + $0x18] sm:$0xff]  }
  0xd3   :  { %v1192_v35 = vld [vmem:[%s1548_s0 + $0x38] sm:$0xff]  }
  0xd4   :  { %v401_v36 = vpop.permute.xlu1 %400  ;;  %v399_v37 = vpop.permute.xlu0 %398 }
  0xd5   :  { %v414_v38 = vsel %vm408_vm4, %v399_v37, %v401_v36  ;;  %v988_v36 = vlaneseq }
  0xd6   :  { %432 = vmatprep.subr.bf16.mxu1 %v414_v38 }
  0xd8   :  { %v797_v39 = vpop.permute.xlu1 %796  ;;  %v795_v40 = vpop.permute.xlu0 %794 }
  0xd9   :  { %v810_v41 = vsel %vm804_vm5, %v795_v40, %v797_v39  ;;  %v986_v39 = vld [vmem:[%s1552_s4] sm:$0x3] }
  0xda   :  { %828 = vmatprep.subr.bf16.mxu0 %v810_v41 }
  0xdc   :  { %v793_v42 = vpop.permute.xlu1 %792  ;;  %v397_v43 = vpop.permute.xlu0 %396 }
  0xdd   :  { %v809_v44 = vsel %vm804_vm5, %v793_v42, %v795_v40  ;;  %v413_v45 = vsel %vm408_vm4, %v397_v43, %v399_v37  ;;  %v989_v37 = vshrl.u32 %v988_v36, 7 }
  0xde   :  { %433 = vmatpush1.bf16.msra.mxu1 %v413_v45  ;;  %829 = vmatpush1.bf16.msra.mxu0 %v809_v44 }
  0xdf   :  { %v990_v38 = vsub.s32 0, %v989_v37  ;;  %v994_v40 = vsub.s32 1, %v989_v37 }
  0xe0   :  { %v407_v46 = vpop.permute.xlu1 %406  ;;  %v405_v47 = vpop.permute.xlu0 %404 }
  0xe1   :  { %v416_v48 = vsel %vm408_vm4, %v405_v47, %v407_v46 }
  0xe2   :  { %434 = vmatprep.subr.bf16.mxu1 %v416_v48  ;;  %v991_v48 = vrot.slane %v986_v39, %v990_v38 }
  0xe4   :  { %v803_v49 = vpop.permute.xlu1 %802  ;;  %v801_v50 = vpop.permute.xlu0 %800 }
  0xe5   :  { %v812_v51 = vsel %vm804_vm5, %v801_v50, %v803_v49 }
  0xe6   :  { %830 = vmatprep.subr.bf16.mxu0 %v812_v51 }
  0xe8   :  { %v799_v52 = vpop.permute.xlu1 %798  ;;  %v403_v53 = vpop.permute.xlu0 %402 }
  0xe9   :  { %v811_v54 = vsel %vm804_vm5, %v799_v52, %v801_v50  ;;  %v415_v55 = vsel %vm408_vm4, %v403_v53, %v405_v47  ;;  %v995_v52 = vrot.slane %v986_v39, %v994_v40 }
  0xea   :  { %435 = vmatpush1.bf16.msra.mxu1 %v415_v55  ;;  %831 = vmatpush1.bf16.msra.mxu0 %v811_v54 }
  0xed   :  { %v488_v58 = vpop.permute.xlu1 %487  ;;  %v486_v59 = vpop.permute.xlu0 %485  ;;  %1106 = vmatmul.mubr.msk.bf16.vlgmr.msra.gmra.mrb[0].mxu1 %vm278_vm3, %v1189_v56  ;;  %1122 = vmatmul.mubr.msk.bf16.vlgmr.msra.gmra.mrb[0].mxu0 %vm278_vm3, %v1190_v57 }
  0xee   :  { %v509_v60 = vsel %vm507_vm6, %v486_v59, %v488_v58  ;;  %559 = vmatprep.mubr.bf16.mxu1 %v1199_v12  ;;  %955 = vmatprep.mubr.bf16.mxu0 %v1199_v12 }
  0xef   :  { %527 = vmatprep.subr.bf16.mxu1 %v509_v60 }
  0xf1   :  { %v884_v61 = vpop.permute.xlu1 %883  ;;  %v882_v62 = vpop.permute.xlu0 %881 }
  0xf2   :  { %v905_v63 = vsel %vm903_vm7, %v882_v62, %v884_v61 }
  0xf3   :  { %923 = vmatprep.subr.bf16.mxu0 %v905_v63 }
  0xf5   :  { %v880_v0 = vpop.permute.xlu1 %879  ;;  %v484_v1 = vpop.permute.xlu0 %483 }
  0xf6   :  { %v904_v2 = vsel %vm903_vm7, %v880_v0, %v882_v62  ;;  %v508_v3 = vsel %vm507_vm6, %v484_v1, %v486_v59 }
  0xf7   :  { %528 = vmatpush1.bf16.msra.mxu1 %v508_v3  ;;  %924 = vmatpush1.bf16.msra.mxu0 %v904_v2 }
  0xf9   :  { %v494_v4 = vpop.permute.xlu1 %493  ;;  %v492_v5 = vpop.permute.xlu0 %491 }
  0xfa   :  { %v511_v6 = vsel %vm507_vm6, %v492_v5, %v494_v4 }
  0xfb   :  { %529 = vmatprep.subr.bf16.mxu1 %v511_v6 }
  0xfd   :  { %v890_v12 = vpop.permute.xlu1 %889  ;;  %v888_v7 = vpop.permute.xlu0 %887 }
  0xfe   :  { %v907_v9 = vsel %vm903_vm7, %v888_v7, %v890_v12 }
  0xff   :  { %925 = vmatprep.subr.bf16.mxu0 %v907_v9 }
 0x101   :  { %v886_v13 = vpop.permute.xlu1 %885  ;;  %v490_v8 = vpop.permute.xlu0 %489 }
 0x102   :  { %v906_v10 = vsel %vm903_vm7, %v886_v13, %v888_v7  ;;  %v510_v14 = vsel %vm507_vm6, %v490_v8, %v492_v5 }
 0x103   :  { %530 = vmatpush1.bf16.msra.mxu1 %v510_v14  ;;  %926 = vmatpush1.bf16.msra.mxu0 %v906_v10 }
 0x105   :  { %v500_v15 = vpop.permute.xlu1 %499  ;;  %v498_v11 = vpop.permute.xlu0 %497 }
 0x106   :  { %v513_v16 = vsel %vm507_vm6, %v498_v11, %v500_v15 }
 0x107   :  { %531 = vmatprep.subr.bf16.mxu1 %v513_v16 }
 0x109   :  { %v896_v17 = vpop.permute.xlu1 %895  ;;  %v894_v18 = vpop.permute.xlu0 %893 }
 0x10a   :  { %v909_v19 = vsel %vm903_vm7, %v894_v18, %v896_v17 }
 0x10b   :  { %927 = vmatprep.subr.bf16.mxu0 %v909_v19 }
 0x10d   :  { %v892_v20 = vpop.permute.xlu1 %891  ;;  %v496_v21 = vpop.permute.xlu0 %495 }
 0x10e   :  { %v908_v22 = vsel %vm903_vm7, %v892_v20, %v894_v18  ;;  %v512_v23 = vsel %vm507_vm6, %v496_v21, %v498_v11 }
 0x10f   :  { %532 = vmatpush1.bf16.msra.mxu1 %v512_v23  ;;  %928 = vmatpush1.bf16.msra.mxu0 %v908_v22 }
 0x111   :  { %v506_v24 = vpop.permute.xlu1 %505  ;;  %v504_v25 = vpop.permute.xlu0 %503 }
 0x112   :  { %v515_v26 = vsel %vm507_vm6, %v504_v25, %v506_v24 }
 0x113   :  { %533 = vmatprep.subr.bf16.mxu1 %v515_v26 }
 0x115   :  { %v902_v27 = vpop.permute.xlu1 %901  ;;  %v900_v28 = vpop.permute.xlu0 %899 }
 0x116   :  { %v911_v29 = vsel %vm903_vm7, %v900_v28, %v902_v27 }
 0x117   :  { %929 = vmatprep.subr.bf16.mxu0 %v911_v29 }
 0x119   :  { %v898_v30 = vpop.permute.xlu1 %897  ;;  %v502_v31 = vpop.permute.xlu0 %501 }
 0x11a   :  { %v910_v32 = vsel %vm903_vm7, %v898_v30, %v900_v28  ;;  %v514_v33 = vsel %vm507_vm6, %v502_v31, %v504_v25 }
 0x11b   :  { %534 = vmatpush1.bf16.msra.mxu1 %v514_v33  ;;  %930 = vmatpush1.bf16.msra.mxu0 %v910_v32 }
 0x11e   :  { %1110 = vmatmul.mubr.msk.bf16.vlgmr.msra.gmra.mrb[0].mxu1 %vm278_vm3, %v1191_v34  ;;  %1126 = vmatmul.mubr.msk.bf16.vlgmr.msra.gmra.mrb[0].mxu0 %vm278_vm3, %v1192_v35 }
 0x12a   :  { %v975_v41 = vpop.permute.xlu0 %974 }
 0x12b   :  { %v980_v42 = vpop.permute.xlu1 %979 }
 0x1f1   :  { %v561_v43 = vpop.f32.mrb[0].mxu1  ;;  %v957_v44 = vpop.f32.mrb[0].mxu0 }
 0x1f2   :  { %v1131_v45 = vadd.f32 %v957_v44, %v561_v43  ;;  %v563_v46 = vpop.f32.mrb[1].mxu1  ;;  %v959_v47 = vpop.f32.mrb[1].mxu0 }
 0x1f3   :  { %v1132_v49 = vadd.f32 %v959_v47, %v563_v46  ;;  %v565_v50 = vpop.f32.mrb[2].mxu1  ;;  %v961_v51 = vpop.f32.mrb[2].mxu0 }
 0x1f4   :  { %v1133_v53 = vadd.f32 %v961_v51, %v565_v50  ;;  %v982_v54 = vadd.f32 %v1131_v45, %v975_v41  ;;  %v567_v55 = vpop.f32.mrb[3].mxu1  ;;  %v963_v56 = vpop.f32.mrb[3].mxu0 }
 0x1f5   :  { %v983_v57 = vadd.f32 %v1132_v49, %v975_v41  ;;  %v1134_v58 = vadd.f32 %v963_v56, %v567_v55 }
 0x1f6   :  { %v984_v59 = vadd.f32 %v1133_v53, %v980_v42  ;;  %v998_v60 = vmul.f32 %v991_v48, %v982_v54 }
 0x1f7   :  { %v985_v61 = vadd.f32 %v1134_v58, %v980_v42  ;;  %v999_v62 = vmul.f32 %v995_v52, %v983_v57 }
 0x1f8   :  { %v1000_v63 = vmul.f32 %v991_v48, %v984_v59 }
 0x1f9   :  { %v1002_v0 = vadd.f32 %v999_v62, %v998_v60  ;;  %v1001_v1 = vmul.f32 %v995_v52, %v985_v61 }
 0x1fb   :  { %1003 = vadd.xlane.f32.xlu1 %v1002_v0  ;;  %v1005_v2 = vadd.f32 %v1001_v1, %v1000_v63 }
 0x1fd   :  { %1006 = vadd.xlane.f32.xlu0 %v1005_v2 }
 0x288   :  { %v1004_v3 = vpop.xlane.xlu1 %1003 }
 0x289   :  { %v1008_v4 = vmul.f32 0.0078125, %v1004_v3 }
 0x28a   :  { %v1007_v5 = vpop.xlane.xlu0 %1006 }
 0x28b   :  { %v1010_v6 = vsub.f32 %v982_v54, %v1008_v4  ;;  %v1011_v12 = vsub.f32 %v983_v57, %v1008_v4  ;;  %v1009_v7 = vmul.f32 0.0078125, %v1007_v5 }
 0x28d   :  { %v1014_v9 = vmul.f32 %v1010_v6, %v1010_v6  ;;  %v1015_v13 = vmul.f32 %v1011_v12, %v1011_v12  ;;  %v1012_v8 = vsub.f32 %v984_v59, %v1009_v7  ;;  %v1013_v10 = vsub.f32 %v985_v61, %v1009_v7 }
 0x28f   :  { %v1016_v14 = vmul.f32 %v1012_v8, %v1012_v8  ;;  %v1017_v15 = vmul.f32 %v1013_v10, %v1013_v10  ;;  %v1018_v11 = vmul.f32 %v1014_v9, %v991_v48  ;;  %v1019_v16 = vmul.f32 %v1015_v13, %v995_v52 }
 0x291   :  { %v1022_v17 = vadd.f32 %v1019_v16, %v1018_v11  ;;  %v1020_v18 = vmul.f32 %v1016_v14, %v991_v48  ;;  %v1021_v19 = vmul.f32 %v1017_v15, %v995_v52 }
 0x293   :  { %1023 = vadd.xlane.f32.xlu0 %v1022_v17  ;;  %v1025_v20 = vadd.f32 %v1021_v19, %v1020_v18 }
 0x295   :  { %1026 = vadd.xlane.f32.xlu1 %v1025_v20 }
 0x320   :  { %v1024_v21 = vpop.xlane.xlu0 %1023 }
 0x321   :  { %v1028_v22 = vmul.f32 0.0078125, %v1024_v21 }
 0x322   :  { %v1027_v23 = vpop.xlane.xlu1 %1026 }
 0x323   :  { %v1030_v24 = vadd.f32 1e-05, %v1028_v22  ;;  %v1029_v25 = vmul.f32 0.0078125, %v1027_v23 }
 0x325   :  { %1193 = vrsqrt.f32 %v1030_v24  ;;  %v1031_v26 = vadd.f32 1e-05, %v1029_v25 }
 0x327   :  { %1195 = vrsqrt.f32 %v1031_v26 }
 0x32f   :  { %v1194_v27 = vpop.eup %1193 }
 0x330   :  { %v1034_v28 = vmul.f32 %v1194_v27, %v1010_v6  ;;  %v1035_v29 = vmul.f32 %v1194_v27, %v1011_v12 }
 0x331   :  { %v1196_v30 = vpop.eup %1195 }
 0x332   :  { %vm1038_vm8 = vcmp.gt.f32.partialorder %v1034_v28, 0.0  ;;  %vm1039_vm9 = vcmp.gt.f32.partialorder %v1035_v29, 0.0  ;;  %v1042_v31 = vmul.f32 0.2, %v1034_v28  ;;  %v1043_v32 = vmul.f32 0.2, %v1035_v29 }
 0x333   :  { %v1036_v33 = vmul.f32 %v1196_v30, %v1012_v8  ;;  %v1037_v34 = vmul.f32 %v1196_v30, %v1013_v10 }
 0x334   :  { %v1046_v35 = vsel %vm1038_vm8, %v1034_v28, %v1042_v31  ;;  %v1047_v36 = vsel %vm1039_vm9, %v1035_v29, %v1043_v32 }
 0x335   :  { %v1129_v37 = vpack.c.bf16 %v1047_v36, %v1046_v35  ;;  %vm1040_vm10 = vcmp.gt.f32.partialorder %v1036_v33, 0.0  ;;  %vm1041_vm11 = vcmp.gt.f32.partialorder %v1037_v34, 0.0  ;;  %v1044_v38 = vmul.f32 0.2, %v1036_v33 }
 0x336   :  { %v1045_v39 = vmul.f32 0.2, %v1037_v34 }
 0x337   :  { %1062 = vst [vmem:[%s1553_s5] sm:$0xff] %v1129_v37  ;;  %v1048_v40 = vsel %vm1040_vm10, %v1036_v33, %v1044_v38 }
 0x338   :  { %v1049_v41 = vsel %vm1041_vm11, %v1037_v34, %v1045_v39 }
 0x339   :  { %v1130_v42 = vpack.c.bf16 %v1049_v41, %v1048_v40 }
 0x33b   :  { %1063 = vst [vmem:[%s1553_s5 + $0x8] sm:$0xff] %v1130_v42 }

// kernel: discriminator_forward.7
= control target key start
LH: loop header
LB: loop body
LE: loop exit
PB: predicated region body
PF: predicated region fallthrough
CT: control target
= control target key end

     0   :  { %s2380_s0 = inlined_call_operand.vmem [shape: bf16[8,32,128], index: 0, kind: input, shape index: {}]   ;;  %s2381_s1 = inlined_call_operand.vmem [shape: bf16[128,256], index: 1, kind: input, shape index: {}, may-alias: {1,2}]   ;;  %s2382_s2 = inlined_call_operand.vmem [shape: bf16[128,256], index: 2, kind: input, shape index: {}, may-alias: {1,2}]   ;;  %s2383_s3 = inlined_call_operand.vmem [shape: f32[32,1], index: 3, kind: input, shape index: {}]   ;;  %s2384_s4 = inlined_call_operand.vmem [shape: f32[1,128], index: 4, kind: input, shape index: {}]   ;;  %s2385_s5 = inlined_call_operand.vmem [shape: f32[2,32,128], index: 5, kind: input, shape index: {}]   ;;  %s2386_s6 = inlined_call_operand.<no memory space> [shape: f32[1,1], index: 6, kind: input, shape index: {}]   ;;  %s2387_s7 = inlined_call_operand.vmem [shape: f32[1,128], index: 7, kind: output, shape index: {}]  }
   0x1   :  { %v12_v0 = vstv %s2386_s6 }
   0x2   :  { %13 = vst [vmem:[#allocation2] sm:$0x1] %v12_v0 }
   0x3   :  { %v33_v1 = vld [vmem:[%s2381_s1] sm:$0xf]  ;;  %v35_v2 = vld [vmem:[%s2381_s1 + $0x8] sm:$0xf]  ;;  %v1432_v3 = vld [vmem:[%s2382_s2 + $0x4] sm:$0xf] }
   0x4   :  { %34 = vst [vmem:[#allocation3] sm:$0xf] %v33_v1  ;;  %36 = vst [vmem:[#allocation3 + $0x4] sm:$0xf] %v35_v2  ;;  %v1433_v4 = vld [vmem:[%s2382_s2 + $0xc] sm:$0xf] }
   0x5   :  { %v1434_v5 = vld [vmem:[%s2382_s2 + $0x14] sm:$0xf]  ;;  %138 = vst [vmem:[#allocation4] sm:$0xf] %v1432_v3  ;;  %140 = vst [vmem:[#allocation4 + $0x4] sm:$0xf] %v1433_v4 }
   0x6   :  { %142 = vst [vmem:[#allocation4 + $0x8] sm:$0xf] %v1434_v5  ;;  %v1435_v6 = vld [vmem:[%s2382_s2 + $0x1c] sm:$0xf]  ;;  %v37_v7 = vld [vmem:[%s2381_s1 + $0x10] sm:$0xf] }
   0x7   :  { %v39_v8 = vld [vmem:[%s2381_s1 + $0x18] sm:$0xf]  ;;  %144 = vst [vmem:[#allocation4 + $0xc] sm:$0xf] %v1435_v6  ;;  %38 = vst [vmem:[#allocation3 + $0x8] sm:$0xf] %v37_v7 }
   0x8   :  { %40 = vst [vmem:[#allocation3 + $0xc] sm:$0xf] %v39_v8  ;;  %v1436_v9 = vld [vmem:[%s2382_s2 + $0x24] sm:$0xf]  ;;  %v1437_v10 = vld [vmem:[%s2382_s2 + $0x2c] sm:$0xf] }
   0x9   :  { %v41_v11 = vld [vmem:[%s2381_s1 + $0x20] sm:$0xf]  ;;  %146 = vst [vmem:[#allocation4 + $0x10] sm:$0xf] %v1436_v9  ;;  %148 = vst [vmem:[#allocation4 + $0x14] sm:$0xf] %v1437_v10 }
   0xa   :  { %42 = vst [vmem:[#allocation3 + $0x10] sm:$0xf] %v41_v11  ;;  %v43_v12 = vld [vmem:[%s2381_s1 + $0x28] sm:$0xf]  ;;  %v1438_v13 = vld [vmem:[%s2382_s2 + $0x34] sm:$0xf] }
   0xb   :  { %v1439_v14 = vld [vmem:[%s2382_s2 + $0x3c] sm:$0xf]  ;;  %44 = vst [vmem:[#allocation3 + $0x14] sm:$0xf] %v43_v12  ;;  %150 = vst [vmem:[#allocation4 + $0x18] sm:$0xf] %v1438_v13 }
   0xc   :  { %152 = vst [vmem:[#allocation4 + $0x1c] sm:$0xf] %v1439_v14  ;;  %v45_v15 = vld [vmem:[%s2381_s1 + $0x30] sm:$0xf]  ;;  %v47_v16 = vld [vmem:[%s2381_s1 + $0x38] sm:$0xf] }
   0xd   :  { %v1440_v17 = vld [vmem:[%s2382_s2 + $0x44] sm:$0xf]  ;;  %46 = vst [vmem:[#allocation3 + $0x18] sm:$0xf] %v45_v15  ;;  %48 = vst [vmem:[#allocation3 + $0x1c] sm:$0xf] %v47_v16 }
   0xe   :  { %154 = vst [vmem:[#allocation4 + $0x20] sm:$0xf] %v1440_v17  ;;  %v1441_v18 = vld [vmem:[%s2382_s2 + $0x4c] sm:$0xf]  ;;  %v49_v19 = vld [vmem:[%s2381_s1 + $0x40] sm:$0xf] }
   0xf   :  { %v51_v20 = vld [vmem:[%s2381_s1 + $0x48] sm:$0xf]  ;;  %156 = vst [vmem:[#allocation4 + $0x24] sm:$0xf] %v1441_v18  ;;  %50 = vst [vmem:[#allocation3 + $0x20] sm:$0xf] %v49_v19 }
  0x10   :  { %52 = vst [vmem:[#allocation3 + $0x24] sm:$0xf] %v51_v20  ;;  %v1442_v21 = vld [vmem:[%s2382_s2 + $0x54] sm:$0xf]  ;;  %v1443_v22 = vld [vmem:[%s2382_s2 + $0x5c] sm:$0xf] }
  0x11   :  { %v53_v23 = vld [vmem:[%s2381_s1 + $0x50] sm:$0xf]  ;;  %v1951_v24 = vld [vmem:[#allocation3] sm:$0xff]   ;;  %158 = vst [vmem:[#allocation4 + $0x28] sm:$0xf] %v1442_v21  ;;  %s1831_s24 = smov 119  }
  0x12   :  { %160 = vst [vmem:[#allocation4 + $0x2c] sm:$0xf] %v1443_v22  ;;  %54 = vst [vmem:[#allocation3 + $0x28] sm:$0xf] %v53_v23  ;;  %790 = vrot.lane.b32.xlu1 %v1951_v24, %s1831_s24  ;;  %s1832_s25 = smov 127   ;;  %v1957_v25 = vld [vmem:[#allocation4] sm:$0xff]  }
  0x13   :  { %376 = vrot.lane.b32.xlu0 %v1951_v24, %s1832_s25  ;;  %v1959_v26 = vld [vmem:[#allocation4 + $0x8] sm:$0xff]   ;;  %v55_v28 = vld [vmem:[%s2381_s1 + $0x58] sm:$0xf]  ;;  %v1444_v29 = vld [vmem:[%s2382_s2 + $0x64] sm:$0xf]  ;;  %s1833_s22 = smov 118  }
  0x14   :  { %v1965_v27 = vld [vmem:[#allocation3 + $0x8] sm:$0xff]   ;;  %v1977_v30 = vld [vmem:[#allocation4 + $0x10] sm:$0xff]   ;;  %56 = vst [vmem:[#allocation3 + $0x2c] sm:$0xf] %v55_v28  ;;  %162 = vst [vmem:[#allocation4 + $0x30] sm:$0xf] %v1444_v29 }
  0x15   :  { %v1445_v31 = vld [vmem:[%s2382_s2 + $0x6c] sm:$0xf]  ;;  %v57_v32 = vld [vmem:[%s2381_s1 + $0x60] sm:$0xf]  ;;  %v59_v33 = vld [vmem:[%s2381_s1 + $0x68] sm:$0xf] }
  0x16   :  { %792 = vrot.lane.b32.xlu1 %v1957_v25, %s1831_s24  ;;  %164 = vst [vmem:[#allocation4 + $0x34] sm:$0xf] %v1445_v31  ;;  %58 = vst [vmem:[#allocation3 + $0x30] sm:$0xf] %v57_v32  ;;  %v1446_v34 = vld [vmem:[%s2382_s2 + $0x74] sm:$0xf] }
  0x17   :  { %378 = vrot.lane.b32.xlu0 %v1957_v25, %s1832_s25  ;;  %60 = vst [vmem:[#allocation3 + $0x34] sm:$0xf] %v59_v33  ;;  %v1447_v35 = vld [vmem:[%s2382_s2 + $0x7c] sm:$0xf]  ;;  %v61_v36 = vld [vmem:[%s2381_s1 + $0x70] sm:$0xf] }
  0x18   :  { %v2001_v37 = vld [vmem:[#allocation3 + $0x10] sm:$0xff]   ;;  %166 = vst [vmem:[#allocation4 + $0x38] sm:$0xf] %v1446_v34  ;;  %168 = vst [vmem:[#allocation4 + $0x3c] sm:$0xf] %v1447_v35  ;;  %v2010_v39 = vld [vmem:[#allocation4 + $0x18] sm:$0xff]  }
  0x19   :  { %62 = vst [vmem:[#allocation3 + $0x38] sm:$0xf] %v61_v36  ;;  %v63_v38 = vld [vmem:[%s2381_s1 + $0x78] sm:$0xf]  ;;  %v2022_v41 = vld [vmem:[#allocation4 + $0x20] sm:$0xff]   ;;  %v2038_v43 = vld [vmem:[#allocation4 + $0x28] sm:$0xff]  }
  0x1a   :  { %382 = vrot.lane.b32.xlu1 %v1959_v26, %s1832_s25  ;;  %64 = vst [vmem:[#allocation3 + $0x3c] sm:$0xf] %v63_v38  ;;  %v2016_v40 = vld [vmem:[#allocation3 + $0x18] sm:$0xff]   ;;  %v2028_v42 = vld [vmem:[#allocation3 + $0x20] sm:$0xff]   ;;  %v1807_v47 = vld [vmem:[%s2380_s0 + $0x10] sm:$0xff]   ;;  %s1834_s23 = smov 125  }
  0x1b   :  { %380 = vrot.lane.b32.xlu0 %v1965_v27, %s1832_s25  ;;  %v2040_v44 = vld [vmem:[#allocation3 + $0x28] sm:$0xff]   ;;  %v1808_v48 = vld [vmem:[%s2380_s0 + $0x40] sm:$0xff]   ;;  %1609 = vmatprep.mubr.bf16.mxu1 %v1807_v47  ;;  %vm822_vm0 = vcmask 973824   ;;  %vm408_vm1 = vcmask 1039360   ;;  %s1837_s26 = smov 115   ;;  %v1809_v47 = vld [vmem:[%s2380_s0 + $0x18] sm:$0xff]  }
  0x1c   :  { %1689 = vmatprep.mubr.bf16.mxu0 %v1808_v48  ;;  %vm941_vm2 = vcmask 965632   ;;  %vm584_vm3 = vcmask 1022976   ;;  %vm1060_vm4 = vcmask 949248   ;;  %vm703_vm5 = vcmask 1014784  }
  0x1d   :  { %v2050_v45 = vld [vmem:[#allocation4 + $0x30] sm:$0xff]   ;;  %vm1179_vm6 = vcmask 941056  }
  0x1e   :  { %796 = vrot.lane.b32.xlu1 %v1959_v26, %s1831_s24  ;;  %v2052_v46 = vld [vmem:[#allocation3 + $0x30] sm:$0xff]  }
  0x1f   :  { %794 = vrot.lane.b32.xlu0 %v1965_v27, %s1831_s24  ;;  %v2068_v49 = vld [vmem:[#allocation4 + $0x38] sm:$0xff]  }
  0x21   :  { %v2070_v50 = vld [vmem:[#allocation3 + $0x38] sm:$0xff]  }
  0x22   :  { %386 = vrot.lane.b32.xlu1 %v1977_v30, %s1832_s25 }
  0x23   :  { %384 = vrot.lane.b32.xlu0 %v2001_v37, %s1832_s25 }
  0x26   :  { %800 = vrot.lane.b32.xlu1 %v1977_v30, %s1831_s24 }
  0x27   :  { %798 = vrot.lane.b32.xlu0 %v2001_v37, %s1831_s24 }
  0x2a   :  { %390 = vrot.lane.b32.xlu1 %v2010_v39, %s1832_s25 }
  0x2b   :  { %388 = vrot.lane.b32.xlu0 %v2016_v40, %s1832_s25 }
  0x2e   :  { %804 = vrot.lane.b32.xlu1 %v2010_v39, %s1831_s24 }
  0x2f   :  { %802 = vrot.lane.b32.xlu0 %v2016_v40, %s1831_s24 }
  0x32   :  { %394 = vrot.lane.b32.xlu1 %v2022_v41, %s1832_s25 }
  0x33   :  { %392 = vrot.lane.b32.xlu0 %v2028_v42, %s1832_s25 }
  0x36   :  { %808 = vrot.lane.b32.xlu1 %v2022_v41, %s1831_s24 }
  0x37   :  { %806 = vrot.lane.b32.xlu0 %v2028_v42, %s1831_s24 }
  0x3a   :  { %398 = vrot.lane.b32.xlu1 %v2038_v43, %s1832_s25 }
  0x3b   :  { %396 = vrot.lane.b32.xlu0 %v2040_v44, %s1832_s25 }
  0x3e   :  { %812 = vrot.lane.b32.xlu1 %v2038_v43, %s1831_s24 }
  0x3f   :  { %810 = vrot.lane.b32.xlu0 %v2040_v44, %s1831_s24 }
  0x42   :  { %402 = vrot.lane.b32.xlu1 %v2050_v45, %s1832_s25 }
  0x43   :  { %400 = vrot.lane.b32.xlu0 %v2052_v46, %s1832_s25 }
  0x46   :  { %816 = vrot.lane.b32.xlu1 %v2050_v45, %s1831_s24 }
  0x47   :  { %814 = vrot.lane.b32.xlu0 %v2052_v46, %s1831_s24 }
  0x4a   :  { %406 = vrot.lane.b32.xlu1 %v2068_v49, %s1832_s25 }
  0x4b   :  { %404 = vrot.lane.b32.xlu0 %v2070_v50, %s1832_s25  ;;  %s1836_s25 = smov 124  }
  0x4e   :  { %820 = vrot.lane.b32.xlu1 %v2068_v49, %s1831_s24 }
  0x4f   :  { %818 = vrot.lane.b32.xlu0 %v2070_v50, %s1831_s24  ;;  %s1835_s24 = smov 116  }
  0x52   :  { %911 = vrot.lane.b32.xlu1 %v1957_v25, %s1833_s22 }
  0x53   :  { %909 = vrot.lane.b32.xlu0 %v1951_v24, %s1833_s22 }
  0x56   :  { %915 = vrot.lane.b32.xlu1 %v1959_v26, %s1833_s22 }
  0x57   :  { %913 = vrot.lane.b32.xlu0 %v1965_v27, %s1833_s22 }
  0x5a   :  { %919 = vrot.lane.b32.xlu1 %v1977_v30, %s1833_s22 }
  0x5b   :  { %917 = vrot.lane.b32.xlu0 %v2001_v37, %s1833_s22 }
  0x5e   :  { %923 = vrot.lane.b32.xlu1 %v2010_v39, %s1833_s22 }
  0x5f   :  { %921 = vrot.lane.b32.xlu0 %v2016_v40, %s1833_s22 }
  0x62   :  { %927 = vrot.lane.b32.xlu1 %v2022_v41, %s1833_s22 }
  0x63   :  { %925 = vrot.lane.b32.xlu0 %v2028_v42, %s1833_s22 }
  0x66   :  { %931 = vrot.lane.b32.xlu1 %v2038_v43, %s1833_s22 }
  0x67   :  { %929 = vrot.lane.b32.xlu0 %v2040_v44, %s1833_s22 }
  0x6a   :  { %935 = vrot.lane.b32.xlu1 %v2050_v45, %s1833_s22 }
  0x6b   :  { %933 = vrot.lane.b32.xlu0 %v2052_v46, %s1833_s22 }
  0x6e   :  { %939 = vrot.lane.b32.xlu1 %v2068_v49, %s1833_s22 }
  0x6f   :  { %937 = vrot.lane.b32.xlu0 %v2070_v50, %s1833_s22 }
  0x72   :  { %554 = vrot.lane.b32.xlu1 %v1957_v25, %s1834_s23 }
  0x73   :  { %552 = vrot.lane.b32.xlu0 %v1951_v24, %s1834_s23 }
  0x76   :  { %1030 = vrot.lane.b32.xlu1 %v1957_v25, %s1835_s24 }
  0x77   :  { %1028 = vrot.lane.b32.xlu0 %v1951_v24, %s1835_s24 }
  0x7a   :  { %558 = vrot.lane.b32.xlu1 %v1959_v26, %s1834_s23 }
  0x7b   :  { %556 = vrot.lane.b32.xlu0 %v1965_v27, %s1834_s23 }
  0x7e   :  { %1034 = vrot.lane.b32.xlu1 %v1959_v26, %s1835_s24 }
  0x7f   :  { %1032 = vrot.lane.b32.xlu0 %v1965_v27, %s1835_s24 }
  0x82   :  { %562 = vrot.lane.b32.xlu1 %v1977_v30, %s1834_s23 }
  0x83   :  { %560 = vrot.lane.b32.xlu0 %v2001_v37, %s1834_s23 }
  0x84   :  { %v791_v51 = vpop.permute.xlu1 %790 }
  0x85   :  { %v377_v52 = vpop.permute.xlu0 %376 }
  0x86   :  { %1038 = vrot.lane.b32.xlu1 %v1977_v30, %s1835_s24 }
  0x87   :  { %1036 = vrot.lane.b32.xlu0 %v2001_v37, %s1835_s24 }
  0x88   :  { %v793_v53 = vpop.permute.xlu1 %792 }
  0x89   :  { %v379_v54 = vpop.permute.xlu0 %378  ;;  %v823_v55 = vsel %vm822_vm0, %v791_v51, %v793_v53  ;;  %v1811_v51 = vld [vmem:[%s2380_s0] sm:$0xff]  }
  0x8a   :  { %v409_v56 = vsel %vm408_vm1, %v377_v52, %v379_v54  ;;  %566 = vrot.lane.b32.xlu1 %v2010_v39, %s1834_s23  ;;  %1673 = vmatprep.subr.bf16.mxu0 %v823_v55 }
  0x8b   :  { %564 = vrot.lane.b32.xlu0 %v2016_v40, %s1834_s23  ;;  %1593 = vmatprep.subr.bf16.mxu1 %v409_v56 }
  0x8c   :  { %1594 = vmatpush3.bf16.msra.mxu1 %v409_v56  ;;  %1674 = vmatpush3.bf16.msra.mxu0 %v823_v55  ;;  %v383_v57 = vpop.permute.xlu1 %382  ;;  %v1813_v55 = vld [vmem:[%s2380_s0 + $0x50] sm:$0xff]  }
  0x8d   :  { %v381_v58 = vpop.permute.xlu0 %380 }
  0x8e   :  { %v410_v59 = vsel %vm408_vm1, %v381_v58, %v383_v57  ;;  %1042 = vrot.lane.b32.xlu1 %v2010_v39, %s1835_s24 }
  0x8f   :  { %1595 = vmatprep.subr.bf16.mxu1 %v410_v59  ;;  %1040 = vrot.lane.b32.xlu0 %v2016_v40, %s1835_s24 }
  0x90   :  { %1596 = vmatpush3.bf16.msra.mxu1 %v410_v59  ;;  %v797_v60 = vpop.permute.xlu1 %796 }
  0x91   :  { %v795_v61 = vpop.permute.xlu0 %794 }
  0x92   :  { %v824_v62 = vsel %vm822_vm0, %v795_v61, %v797_v60  ;;  %570 = vrot.lane.b32.xlu1 %v2022_v41, %s1834_s23 }
  0x93   :  { %1675 = vmatprep.subr.bf16.mxu0 %v824_v62  ;;  %568 = vrot.lane.b32.xlu0 %v2028_v42, %s1834_s23 }
  0x94   :  { %1676 = vmatpush3.bf16.msra.mxu0 %v824_v62  ;;  %v387_v63 = vpop.permute.xlu1 %386 }
  0x95   :  { %v385_v0 = vpop.permute.xlu0 %384 }
  0x96   :  { %v411_v1 = vsel %vm408_vm1, %v385_v0, %v387_v63  ;;  %1046 = vrot.lane.b32.xlu1 %v2022_v41, %s1835_s24 }
  0x97   :  { %1597 = vmatprep.subr.bf16.mxu1 %v411_v1  ;;  %1044 = vrot.lane.b32.xlu0 %v2028_v42, %s1835_s24 }
  0x98   :  { %1598 = vmatpush3.bf16.msra.mxu1 %v411_v1  ;;  %v801_v2 = vpop.permute.xlu1 %800 }
  0x99   :  { %v799_v3 = vpop.permute.xlu0 %798 }
  0x9a   :  { %v825_v4 = vsel %vm822_vm0, %v799_v3, %v801_v2  ;;  %574 = vrot.lane.b32.xlu1 %v2038_v43, %s1834_s23 }
  0x9b   :  { %1677 = vmatprep.subr.bf16.mxu0 %v825_v4  ;;  %572 = vrot.lane.b32.xlu0 %v2040_v44, %s1834_s23 }
  0x9c   :  { %1678 = vmatpush3.bf16.msra.mxu0 %v825_v4  ;;  %v391_v5 = vpop.permute.xlu1 %390  ;;  %v1812_v4 = vld [vmem:[%s2380_s0 + $0x8] sm:$0xff]  }
  0x9d   :  { %v389_v6 = vpop.permute.xlu0 %388 }
  0x9e   :  { %v412_v7 = vsel %vm408_vm1, %v389_v6, %v391_v5  ;;  %1050 = vrot.lane.b32.xlu1 %v2038_v43, %s1835_s24 }
  0x9f   :  { %1599 = vmatprep.subr.bf16.mxu1 %v412_v7  ;;  %1048 = vrot.lane.b32.xlu0 %v2040_v44, %s1835_s24 }
  0xa0   :  { %1600 = vmatpush3.bf16.msra.mxu1 %v412_v7  ;;  %v805_v8 = vpop.permute.xlu1 %804  ;;  %v1814_v7 = vld [vmem:[%s2380_s0 + $0x58] sm:$0xff]  }
  0xa1   :  { %v803_v9 = vpop.permute.xlu0 %802 }
  0xa2   :  { %v826_v10 = vsel %vm822_vm0, %v803_v9, %v805_v8  ;;  %578 = vrot.lane.b32.xlu1 %v2050_v45, %s1834_s23  ;;  %v1817_v9 = vld [vmem:[%s2380_s0 + $0x60] sm:$0xff]  }
  0xa3   :  { %1679 = vmatprep.subr.bf16.mxu0 %v826_v10  ;;  %576 = vrot.lane.b32.xlu0 %v2052_v46, %s1834_s23 }
  0xa4   :  { %1680 = vmatpush3.bf16.msra.mxu0 %v826_v10  ;;  %v395_v11 = vpop.permute.xlu1 %394 }
  0xa5   :  { %v393_v12 = vpop.permute.xlu0 %392 }
  0xa6   :  { %v413_v13 = vsel %vm408_vm1, %v393_v12, %v395_v11  ;;  %1054 = vrot.lane.b32.xlu1 %v2050_v45, %s1835_s24  ;;  %v1838_v12 = vmov 0  }
  0xa7   :  { %1601 = vmatprep.subr.bf16.mxu1 %v413_v13  ;;  %1052 = vrot.lane.b32.xlu0 %v2052_v46, %s1835_s24 }
  0xa8   :  { %1602 = vmatpush3.bf16.msra.mxu1 %v413_v13  ;;  %v809_v14 = vpop.permute.xlu1 %808  ;;  %1790 = vset.pattern.permute.xlu1 %v1838_v12 }
  0xa9   :  { %v807_v15 = vpop.permute.xlu0 %806  ;;  %1789 = vset.pattern.permute.xlu0 %v1838_v12 }
  0xaa   :  { %v827_v16 = vsel %vm822_vm0, %v807_v15, %v809_v14  ;;  %582 = vrot.lane.b32.xlu1 %v2068_v49, %s1834_s23  ;;  %v1250_v15 = vld [vmem:[%s2383_s3 + $0x8] sm:$0xff] }
  0xab   :  { %1681 = vmatprep.subr.bf16.mxu0 %v827_v16  ;;  %580 = vrot.lane.b32.xlu0 %v2070_v50, %s1834_s23 }
  0xac   :  { %1682 = vmatpush3.bf16.msra.mxu0 %v827_v16  ;;  %v399_v17 = vpop.permute.xlu1 %398 }
  0xad   :  { %v397_v18 = vpop.permute.xlu0 %396 }
  0xae   :  { %v414_v19 = vsel %vm408_vm1, %v397_v18, %v399_v17  ;;  %1058 = vrot.lane.b32.xlu1 %v2068_v49, %s1835_s24  ;;  %v1249_v18 = vld [vmem:[%s2383_s3] sm:$0xff] }
  0xaf   :  { %1603 = vmatprep.subr.bf16.mxu1 %v414_v19  ;;  %1056 = vrot.lane.b32.xlu0 %v2070_v50, %s1835_s24 }
  0xb0   :  { %1604 = vmatpush3.bf16.msra.mxu1 %v414_v19  ;;  %v813_v20 = vpop.permute.xlu1 %812 }
  0xb1   :  { %v811_v21 = vpop.permute.xlu0 %810 }
  0xb2   :  { %v828_v22 = vsel %vm822_vm0, %v811_v21, %v813_v20  ;;  %673 = vrot.lane.b32.xlu1 %v1957_v25, %s1836_s25  ;;  %v1252_v21 = vld [vmem:[%s2383_s3 + $0x18] sm:$0xff] }
  0xb3   :  { %1683 = vmatprep.subr.bf16.mxu0 %v828_v22  ;;  %671 = vrot.lane.b32.xlu0 %v1951_v24, %s1836_s25 }
  0xb4   :  { %1684 = vmatpush3.bf16.msra.mxu0 %v828_v22  ;;  %v403_v23 = vpop.permute.xlu1 %402 }
  0xb5   :  { %v401_v28 = vpop.permute.xlu0 %400 }
  0xb6   :  { %v415_v29 = vsel %vm408_vm1, %v401_v28, %v403_v23  ;;  %1149 = vrot.lane.b32.xlu1 %v1957_v25, %s1837_s26 }
  0xb7   :  { %1605 = vmatprep.subr.bf16.mxu1 %v415_v29  ;;  %1147 = vrot.lane.b32.xlu0 %v1951_v24, %s1837_s26 }
  0xb8   :  { %1606 = vmatpush3.bf16.msra.mxu1 %v415_v29  ;;  %v817_v31 = vpop.permute.xlu1 %816 }
  0xb9   :  { %v815_v32 = vpop.permute.xlu0 %814 }
  0xba   :  { %v829_v33 = vsel %vm822_vm0, %v815_v32, %v817_v31  ;;  %677 = vrot.lane.b32.xlu1 %v1959_v26, %s1836_s25 }
  0xbb   :  { %1685 = vmatprep.subr.bf16.mxu0 %v829_v33  ;;  %675 = vrot.lane.b32.xlu0 %v1965_v27, %s1836_s25 }
  0xbc   :  { %1686 = vmatpush3.bf16.msra.mxu0 %v829_v33  ;;  %v407_v34 = vpop.permute.xlu1 %406 }
  0xbd   :  { %v405_v35 = vpop.permute.xlu0 %404 }
  0xbe   :  { %v416_v25 = vsel %vm408_vm1, %v405_v35, %v407_v34  ;;  %1153 = vrot.lane.b32.xlu1 %v1959_v26, %s1837_s26  ;;  %v1810_v26 = vld [vmem:[%s2380_s0 + $0x48] sm:$0xff]  }
  0xbf   :  { %1607 = vmatprep.subr.bf16.mxu1 %v416_v25  ;;  %1151 = vrot.lane.b32.xlu0 %v1965_v27, %s1837_s26 }
  0xc0   :  { %1608 = vmatpush3.bf16.msra.mxu1 %v416_v25  ;;  %v821_v36 = vpop.permute.xlu1 %820 }
  0xc1   :  { %v819_v38 = vpop.permute.xlu0 %818  ;;  %1613 = vmatprep.subr.bf16.mxu1 %v1951_v24 }
  0xc2   :  { %v830_v48 = vsel %vm822_vm0, %v819_v38, %v821_v36  ;;  %681 = vrot.lane.b32.xlu1 %v1977_v30, %s1836_s25 }
  0xc3   :  { %1687 = vmatprep.subr.bf16.mxu0 %v830_v48  ;;  %679 = vrot.lane.b32.xlu0 %v2001_v37, %s1836_s25 }
  0xc4   :  { %1688 = vmatpush3.bf16.msra.mxu0 %v830_v48  ;;  %v912_v52 = vpop.permute.xlu1 %911  ;;  %1610 = vmatmul.mubr.bf16.vlgmr.msra.gmra.mrb[0].mxu1 %v1809_v47 }
  0xc5   :  { %v910_v53 = vpop.permute.xlu0 %909  ;;  %1614 = vmatpush3.bf16.msra.mxu1 %v1951_v24  ;;  %1629 = vmatprep.mubr.bf16.mxu1 %v1811_v51 }
  0xc6   :  { %v942_v54 = vsel %vm941_vm2, %v910_v53, %v912_v52  ;;  %1157 = vrot.lane.b32.xlu1 %v1977_v30, %s1837_s26  ;;  %1615 = vmatprep.subr.bf16.mxu1 %v1965_v27 }
  0xc7   :  { %1693 = vmatprep.subr.bf16.mxu0 %v942_v54  ;;  %1155 = vrot.lane.b32.xlu0 %v2001_v37, %s1837_s26 }
  0xc8   :  { %1690 = vmatmul.mubr.bf16.vlgmr.msra.gmra.mrb[0].mxu0 %v1810_v26  ;;  %v916_v56 = vpop.permute.xlu1 %915 }
  0xc9   :  { %1694 = vmatpush3.bf16.msra.mxu0 %v942_v54  ;;  %v914_v57 = vpop.permute.xlu0 %913  ;;  %1616 = vmatpush3.bf16.msra.mxu1 %v1965_v27 }
  0xca   :  { %v943_v24 = vsel %vm941_vm2, %v914_v57, %v916_v56  ;;  %1709 = vmatprep.mubr.bf16.mxu0 %v1813_v55  ;;  %685 = vrot.lane.b32.xlu1 %v2010_v39, %s1836_s25 }
  0xcb   :  { %1695 = vmatprep.subr.bf16.mxu0 %v943_v24  ;;  %683 = vrot.lane.b32.xlu0 %v2016_v40, %s1836_s25 }
  0xcc   :  { %1617 = vmatprep.subr.bf16.mxu1 %v2001_v37  ;;  %v920_v30 = vpop.permute.xlu1 %919 }
  0xcd   :  { %1696 = vmatpush3.bf16.msra.mxu0 %v943_v24  ;;  %v918_v58 = vpop.permute.xlu0 %917  ;;  %1618 = vmatpush3.bf16.msra.mxu1 %v2001_v37 }
  0xce   :  { %v944_v59 = vsel %vm941_vm2, %v918_v58, %v920_v30  ;;  %1161 = vrot.lane.b32.xlu1 %v2010_v39, %s1837_s26  ;;  %1619 = vmatprep.subr.bf16.mxu1 %v2016_v40 }
  0xcf   :  { %1697 = vmatprep.subr.bf16.mxu0 %v944_v59  ;;  %1159 = vrot.lane.b32.xlu0 %v2016_v40, %s1837_s26 }
  0xd0   :  { %v924_v27 = vpop.permute.xlu1 %923 }
  0xd1   :  { %1698 = vmatpush3.bf16.msra.mxu0 %v944_v59  ;;  %v922_v60 = vpop.permute.xlu0 %921  ;;  %1620 = vmatpush3.bf16.msra.mxu1 %v2016_v40 }
  0xd2   :  { %v945_v61 = vsel %vm941_vm2, %v922_v60, %v924_v27  ;;  %689 = vrot.lane.b32.xlu1 %v2022_v41, %s1836_s25  ;;  %1621 = vmatprep.subr.bf16.mxu1 %v2028_v42 }
  0xd3   :  { %1699 = vmatprep.subr.bf16.mxu0 %v945_v61  ;;  %687 = vrot.lane.b32.xlu0 %v2028_v42, %s1836_s25 }
  0xd4   :  { %v928_v37 = vpop.permute.xlu1 %927 }
  0xd5   :  { %1700 = vmatpush3.bf16.msra.mxu0 %v945_v61  ;;  %v926_v39 = vpop.permute.xlu0 %925  ;;  %1622 = vmatpush3.bf16.msra.mxu1 %v2028_v42 }
  0xd6   :  { %v946_v62 = vsel %vm941_vm2, %v926_v39, %v928_v37  ;;  %1165 = vrot.lane.b32.xlu1 %v2022_v41, %s1837_s26  ;;  %1623 = vmatprep.subr.bf16.mxu1 %v2040_v44 }
  0xd7   :  { %1701 = vmatprep.subr.bf16.mxu0 %v946_v62  ;;  %1163 = vrot.lane.b32.xlu0 %v2028_v42, %s1837_s26 }
  0xd8   :  { %v932_v40 = vpop.permute.xlu1 %931 }
  0xd9   :  { %1702 = vmatpush3.bf16.msra.mxu0 %v946_v62  ;;  %v930_v63 = vpop.permute.xlu0 %929  ;;  %1624 = vmatpush3.bf16.msra.mxu1 %v2040_v44  ;;  %v1816_v62 = vld [vmem:[%s2380_s0 + $0x28] sm:$0xff]  }
  0xda   :  { %v947_v0 = vsel %vm941_vm2, %v930_v63, %v932_v40  ;;  %693 = vrot.lane.b32.xlu1 %v2038_v43, %s1836_s25  ;;  %1625 = vmatprep.subr.bf16.mxu1 %v2052_v46  ;;  %v1819_v63 = vld [vmem:[%s2380_s0 + $0x30] sm:$0xff]  }
  0xdb   :  { %1703 = vmatprep.subr.bf16.mxu0 %v947_v0  ;;  %691 = vrot.lane.b32.xlu0 %v2040_v44, %s1836_s25 }
  0xdc   :  { %v936_v41 = vpop.permute.xlu1 %935 }
  0xdd   :  { %1704 = vmatpush3.bf16.msra.mxu0 %v947_v0  ;;  %v934_v42 = vpop.permute.xlu0 %933  ;;  %1626 = vmatpush3.bf16.msra.mxu1 %v2052_v46 }
  0xde   :  { %v948_v1 = vsel %vm941_vm2, %v934_v42, %v936_v41  ;;  %1169 = vrot.lane.b32.xlu1 %v2038_v43, %s1837_s26  ;;  %1627 = vmatprep.subr.bf16.mxu1 %v2070_v50  ;;  %v1815_v43 = vld [vmem:[%s2380_s0 + $0x20] sm:$0xff]   ;;  %v1818_v42 = vld [vmem:[%s2380_s0 + $0x68] sm:$0xff]  }
  0xdf   :  { %1705 = vmatprep.subr.bf16.mxu0 %v948_v1  ;;  %1167 = vrot.lane.b32.xlu0 %v2040_v44, %s1837_s26 }
  0xe0   :  { %v940_v2 = vpop.permute.xlu1 %939 }
  0xe1   :  { %1706 = vmatpush3.bf16.msra.mxu0 %v948_v1  ;;  %v938_v3 = vpop.permute.xlu0 %937  ;;  %1628 = vmatpush3.bf16.msra.mxu1 %v2070_v50 }
  0xe2   :  { %v949_v5 = vsel %vm941_vm2, %v938_v3, %v940_v2  ;;  %697 = vrot.lane.b32.xlu1 %v2050_v45, %s1836_s25  ;;  %v1821_v2 = vld [vmem:[%s2380_s0 + $0x70] sm:$0xff]  }
  0xe3   :  { %1707 = vmatprep.subr.bf16.mxu0 %v949_v5  ;;  %695 = vrot.lane.b32.xlu0 %v2052_v46, %s1836_s25 }
  0xe4   :  { %v555_v44 = vpop.permute.xlu1 %554  ;;  %1630 = vmatmul.mubr.bf16.vlgmr.msra.gmra.mrb[0].mxu1 %v1812_v4 }
  0xe5   :  { %1708 = vmatpush3.bf16.msra.mxu0 %v949_v5  ;;  %v553_v6 = vpop.permute.xlu0 %552  ;;  %1649 = vmatprep.mubr.bf16.mxu1 %v1815_v43 }
  0xe6   :  { %v585_v8 = vsel %vm584_vm3, %v553_v6, %v555_v44  ;;  %1173 = vrot.lane.b32.xlu1 %v2050_v45, %s1837_s26 }
  0xe7   :  { %1633 = vmatprep.subr.bf16.mxu1 %v585_v8  ;;  %1171 = vrot.lane.b32.xlu0 %v2052_v46, %s1837_s26 }
  0xe8   :  { %1634 = vmatpush3.bf16.msra.mxu1 %v585_v8  ;;  %v1031_v10 = vpop.permute.xlu1 %1030  ;;  %1710 = vmatmul.mubr.bf16.vlgmr.msra.gmra.mrb[0].mxu0 %v1814_v7 }
  0xe9   :  { %v1029_v11 = vpop.permute.xlu0 %1028  ;;  %1729 = vmatprep.mubr.bf16.mxu0 %v1817_v9 }
  0xea   :  { %v1061_v13 = vsel %vm1060_vm4, %v1029_v11, %v1031_v10  ;;  %701 = vrot.lane.b32.xlu1 %v2068_v49, %s1836_s25 }
  0xeb   :  { %1713 = vmatprep.subr.bf16.mxu0 %v1061_v13  ;;  %699 = vrot.lane.b32.xlu0 %v2070_v50, %s1836_s25 }
  0xec   :  { %1714 = vmatpush3.bf16.msra.mxu0 %v1061_v13  ;;  %v559_v45 = vpop.permute.xlu1 %558 }
  0xed   :  { %v557_v46 = vpop.permute.xlu0 %556 }
  0xee   :  { %v586_v14 = vsel %vm584_vm3, %v557_v46, %v559_v45  ;;  %1177 = vrot.lane.b32.xlu1 %v2068_v49, %s1837_s26  ;;  %v1251_v49 = vld [vmem:[%s2383_s3 + $0x10] sm:$0xff] }
  0xef   :  { %1635 = vmatprep.subr.bf16.mxu1 %v586_v14  ;;  %1175 = vrot.lane.b32.xlu0 %v2070_v50, %s1837_s26 }
  0xf0   :  { %1636 = vmatpush3.bf16.msra.mxu1 %v586_v14  ;;  %v1035_v16 = vpop.permute.xlu1 %1034 }
  0xf1   :  { %v1033_v17 = vpop.permute.xlu0 %1032 }
  0xf2   :  { %v1062_v19 = vsel %vm1060_vm4, %v1033_v17, %v1035_v16  ;;  %1260 = vperm.xlu1 %1790, %v1250_v15  }
  0xf3   :  { %1715 = vmatprep.subr.bf16.mxu0 %v1062_v19  ;;  %1255 = vperm.xlu0 %1789, %v1249_v18  }
  0xf4   :  { %1716 = vmatpush3.bf16.msra.mxu0 %v1062_v19  ;;  %v563_v50 = vpop.permute.xlu1 %562 }
  0xf5   :  { %v561_v20 = vpop.permute.xlu0 %560 }
  0xf6   :  { %v587_v22 = vsel %vm584_vm3, %v561_v20, %v563_v50  ;;  %1265 = vperm.xlu1 %1790, %v1251_v49  }
  0xf7   :  { %1637 = vmatprep.subr.bf16.mxu1 %v587_v22  ;;  %1270 = vperm.xlu0 %1789, %v1252_v21  }
  0xf8   :  { %1638 = vmatpush3.bf16.msra.mxu1 %v587_v22  ;;  %v1039_v23 = vpop.permute.xlu1 %1038 }
  0xf9   :  { %v1037_v28 = vpop.permute.xlu0 %1036 }
  0xfa   :  { %v1063_v29 = vsel %vm1060_vm4, %v1037_v28, %v1039_v23 }
  0xfb   :  { %1717 = vmatprep.subr.bf16.mxu0 %v1063_v29 }
  0xfc   :  { %1718 = vmatpush3.bf16.msra.mxu0 %v1063_v29  ;;  %v567_v31 = vpop.permute.xlu1 %566 }
  0xfd   :  { %v565_v32 = vpop.permute.xlu0 %564 }
  0xfe   :  { %v588_v33 = vsel %vm584_vm3, %v565_v32, %v567_v31 }
  0xff   :  { %1639 = vmatprep.subr.bf16.mxu1 %v588_v33 }
 0x100   :  { %1640 = vmatpush3.bf16.msra.mxu1 %v588_v33  ;;  %v1043_v34 = vpop.permute.xlu1 %1042 }
 0x101   :  { %v1041_v35 = vpop.permute.xlu0 %1040 }
 0x102   :  { %v1064_v25 = vsel %vm1060_vm4, %v1041_v35, %v1043_v34 }
 0x103   :  { %1719 = vmatprep.subr.bf16.mxu0 %v1064_v25 }
 0x104   :  { %1720 = vmatpush3.bf16.msra.mxu0 %v1064_v25  ;;  %v571_v36 = vpop.permute.xlu1 %570 }
 0x105   :  { %v569_v38 = vpop.permute.xlu0 %568 }
 0x106   :  { %v589_v47 = vsel %vm584_vm3, %v569_v38, %v571_v36 }
 0x107   :  { %1641 = vmatprep.subr.bf16.mxu1 %v589_v47 }
 0x108   :  { %1642 = vmatpush3.bf16.msra.mxu1 %v589_v47  ;;  %v1047_v48 = vpop.permute.xlu1 %1046 }
 0x109   :  { %v1045_v51 = vpop.permute.xlu0 %1044 }
 0x10a   :  { %v1065_v26 = vsel %vm1060_vm4, %v1045_v51, %v1047_v48 }
 0x10b   :  { %1721 = vmatprep.subr.bf16.mxu0 %v1065_v26 }
 0x10c   :  { %1722 = vmatpush3.bf16.msra.mxu0 %v1065_v26  ;;  %v575_v52 = vpop.permute.xlu1 %574 }
 0x10d   :  { %v573_v53 = vpop.permute.xlu0 %572 }
 0x10e   :  { %v590_v54 = vsel %vm584_vm3, %v573_v53, %v575_v52 }
 0x10f   :  { %1643 = vmatprep.subr.bf16.mxu1 %v590_v54 }
 0x110   :  { %1644 = vmatpush3.bf16.msra.mxu1 %v590_v54  ;;  %v1051_v55 = vpop.permute.xlu1 %1050 }
 0x111   :  { %v1049_v56 = vpop.permute.xlu0 %1048 }
 0x112   :  { %v1066_v57 = vsel %vm1060_vm4, %v1049_v56, %v1051_v55  ;;  %v1820_v55 = vld [vmem:[%s2380_s0 + $0x38] sm:$0xff]  }
 0x113   :  { %1723 = vmatprep.subr.bf16.mxu0 %v1066_v57 }
 0x114   :  { %1724 = vmatpush3.bf16.msra.mxu0 %v1066_v57  ;;  %v579_v24 = vpop.permute.xlu1 %578 }
 0x115   :  { %v577_v30 = vpop.permute.xlu0 %576 }
 0x116   :  { %v591_v58 = vsel %vm584_vm3, %v577_v30, %v579_v24  ;;  %v1822_v30 = vld [vmem:[%s2380_s0 + $0x78] sm:$0xff]  }
 0x117   :  { %1645 = vmatprep.subr.bf16.mxu1 %v591_v58 }
 0x118   :  { %1646 = vmatpush3.bf16.msra.mxu1 %v591_v58  ;;  %v1055_v59 = vpop.permute.xlu1 %1054 }
 0x119   :  { %v1053_v27 = vpop.permute.xlu0 %1052 }
 0x11a   :  { %v1067_v60 = vsel %vm1060_vm4, %v1053_v27, %v1055_v59 }
 0x11b   :  { %1725 = vmatprep.subr.bf16.mxu0 %v1067_v60 }
 0x11c   :  { %1726 = vmatpush3.bf16.msra.mxu0 %v1067_v60  ;;  %v583_v61 = vpop.permute.xlu1 %582 }
 0x11d   :  { %v581_v37 = vpop.permute.xlu0 %580 }
 0x11e   :  { %v592_v39 = vsel %vm584_vm3, %v581_v37, %v583_v61 }
 0x11f   :  { %1647 = vmatprep.subr.bf16.mxu1 %v592_v39 }
 0x120   :  { %1648 = vmatpush3.bf16.msra.mxu1 %v592_v39  ;;  %v1059_v40 = vpop.permute.xlu1 %1058 }
 0x121   :  { %v1057_v0 = vpop.permute.xlu0 %1056 }
 0x122   :  { %v1068_v41 = vsel %vm1060_vm4, %v1057_v0, %v1059_v40 }
 0x123   :  { %1727 = vmatprep.subr.bf16.mxu0 %v1068_v41  ;;  %1650 = vmatmul.mubr.bf16.vlgmr.msra.gmra.mrb[0].mxu1 %v1816_v62 }
 0x124   :  { %1728 = vmatpush3.bf16.msra.mxu0 %v1068_v41  ;;  %v674_v1 = vpop.permute.xlu1 %673  ;;  %1669 = vmatprep.mubr.bf16.mxu1 %v1819_v63  ;;  %v1508_v41 = vld [vmem:[%s2384_s4] ss:$0 sm:$0xff] }
 0x125   :  { %v672_v3 = vpop.permute.xlu0 %671 }
 0x126   :  { %v704_v4 = vsel %vm703_vm5, %v672_v3, %v674_v1 }
 0x127   :  { %1653 = vmatprep.subr.bf16.mxu1 %v704_v4  ;;  %1730 = vmatmul.mubr.bf16.vlgmr.msra.gmra.mrb[0].mxu0 %v1818_v42 }
 0x128   :  { %1654 = vmatpush3.bf16.msra.mxu1 %v704_v4  ;;  %v1150_v5 = vpop.permute.xlu1 %1149  ;;  %1749 = vmatprep.mubr.bf16.mxu0 %v1821_v2 }
 0x129   :  { %v1148_v43 = vpop.permute.xlu0 %1147 }
 0x12a   :  { %v1180_v44 = vsel %vm1179_vm6, %v1148_v43, %v1150_v5 }
 0x12b   :  { %1733 = vmatprep.subr.bf16.mxu0 %v1180_v44 }
 0x12c   :  { %1734 = vmatpush3.bf16.msra.mxu0 %v1180_v44  ;;  %v678_v6 = vpop.permute.xlu1 %677 }
 0x12d   :  { %v676_v7 = vpop.permute.xlu0 %675 }
 0x12e   :  { %v705_v8 = vsel %vm703_vm5, %v676_v7, %v678_v6 }
 0x12f   :  { %1655 = vmatprep.subr.bf16.mxu1 %v705_v8 }
 0x130   :  { %1656 = vmatpush3.bf16.msra.mxu1 %v705_v8  ;;  %v1154_v9 = vpop.permute.xlu1 %1153 }
 0x131   :  { %v1152_v10 = vpop.permute.xlu0 %1151 }
 0x132   :  { %v1181_v11 = vsel %vm1179_vm6, %v1152_v10, %v1154_v9 }
 0x133   :  { %1735 = vmatprep.subr.bf16.mxu0 %v1181_v11 }
 0x134   :  { %1736 = vmatpush3.bf16.msra.mxu0 %v1181_v11  ;;  %v682_v12 = vpop.permute.xlu1 %681 }
 0x135   :  { %v680_v13 = vpop.permute.xlu0 %679 }
 0x136   :  { %v706_v45 = vsel %vm703_vm5, %v680_v13, %v682_v12 }
 0x137   :  { %1657 = vmatprep.subr.bf16.mxu1 %v706_v45 }
 0x138   :  { %1658 = vmatpush3.bf16.msra.mxu1 %v706_v45  ;;  %v1158_v46 = vpop.permute.xlu1 %1157 }
 0x139   :  { %v1156_v14 = vpop.permute.xlu0 %1155 }
 0x13a   :  { %v1182_v15 = vsel %vm1179_vm6, %v1156_v14, %v1158_v46 }
 0x13b   :  { %1737 = vmatprep.subr.bf16.mxu0 %v1182_v15 }
 0x13c   :  { %1738 = vmatpush3.bf16.msra.mxu0 %v1182_v15  ;;  %v686_v16 = vpop.permute.xlu1 %685 }
 0x13d   :  { %v684_v17 = vpop.permute.xlu0 %683 }
 0x13e   :  { %v707_v18 = vsel %vm703_vm5, %v684_v17, %v686_v16 }
 0x13f   :  { %1659 = vmatprep.subr.bf16.mxu1 %v707_v18 }
 0x140   :  { %1660 = vmatpush3.bf16.msra.mxu1 %v707_v18  ;;  %v1162_v19 = vpop.permute.xlu1 %1161 }
 0x141   :  { %v1160_v49 = vpop.permute.xlu0 %1159 }
 0x142   :  { %v1183_v50 = vsel %vm1179_vm6, %v1160_v49, %v1162_v19 }
 0x143   :  { %1739 = vmatprep.subr.bf16.mxu0 %v1183_v50 }
 0x144   :  { %1740 = vmatpush3.bf16.msra.mxu0 %v1183_v50  ;;  %v690_v20 = vpop.permute.xlu1 %689 }
 0x145   :  { %v688_v21 = vpop.permute.xlu0 %687 }
 0x146   :  { %v708_v22 = vsel %vm703_vm5, %v688_v21, %v690_v20 }
 0x147   :  { %1661 = vmatprep.subr.bf16.mxu1 %v708_v22 }
 0x148   :  { %1662 = vmatpush3.bf16.msra.mxu1 %v708_v22  ;;  %v1166_v23 = vpop.permute.xlu1 %1165 }
 0x149   :  { %v1164_v28 = vpop.permute.xlu0 %1163 }
 0x14a   :  { %v1184_v29 = vsel %vm1179_vm6, %v1164_v28, %v1166_v23 }
 0x14b   :  { %1741 = vmatprep.subr.bf16.mxu0 %v1184_v29 }
 0x14c   :  { %1742 = vmatpush3.bf16.msra.mxu0 %v1184_v29  ;;  %v694_v31 = vpop.permute.xlu1 %693 }
 0x14d   :  { %v692_v32 = vpop.permute.xlu0 %691 }
 0x14e   :  { %v709_v33 = vsel %vm703_vm5, %v692_v32, %v694_v31 }
 0x14f   :  { %1663 = vmatprep.subr.bf16.mxu1 %v709_v33 }
 0x150   :  { %1664 = vmatpush3.bf16.msra.mxu1 %v709_v33  ;;  %v1170_v34 = vpop.permute.xlu1 %1169 }
 0x151   :  { %v1168_v35 = vpop.permute.xlu0 %1167 }
 0x152   :  { %v1185_v25 = vsel %vm1179_vm6, %v1168_v35, %v1170_v34 }
 0x153   :  { %1743 = vmatprep.subr.bf16.mxu0 %v1185_v25 }
 0x154   :  { %1744 = vmatpush3.bf16.msra.mxu0 %v1185_v25  ;;  %v698_v36 = vpop.permute.xlu1 %697 }
 0x155   :  { %v696_v38 = vpop.permute.xlu0 %695 }
 0x156   :  { %v710_v47 = vsel %vm703_vm5, %v696_v38, %v698_v36 }
 0x157   :  { %1665 = vmatprep.subr.bf16.mxu1 %v710_v47 }
 0x158   :  { %1666 = vmatpush3.bf16.msra.mxu1 %v710_v47  ;;  %v1174_v48 = vpop.permute.xlu1 %1173 }
 0x159   :  { %v1172_v51 = vpop.permute.xlu0 %1171 }
 0x15a   :  { %v1186_v26 = vsel %vm1179_vm6, %v1172_v51, %v1174_v48 }
 0x15b   :  { %1745 = vmatprep.subr.bf16.mxu0 %v1186_v26 }
 0x15c   :  { %1746 = vmatpush3.bf16.msra.mxu0 %v1186_v26  ;;  %v702_v52 = vpop.permute.xlu1 %701 }
 0x15d   :  { %v700_v53 = vpop.permute.xlu0 %699 }
 0x15e   :  { %v711_v54 = vsel %vm703_vm5, %v700_v53, %v702_v52 }
 0x15f   :  { %1667 = vmatprep.subr.bf16.mxu1 %v711_v54 }
 0x160   :  { %1668 = vmatpush3.bf16.msra.mxu1 %v711_v54  ;;  %v1178_v56 = vpop.permute.xlu1 %1177 }
 0x161   :  { %v1176_v57 = vpop.permute.xlu0 %1175 }
 0x162   :  { %v1187_v24 = vsel %vm1179_vm6, %v1176_v57, %v1178_v56 }
 0x163   :  { %1670 = vmatmul.mubr.bf16.vlgmr.msra.gmra.mrb[0].mxu1 %v1820_v55  ;;  %1747 = vmatprep.subr.bf16.mxu0 %v1187_v24 }
 0x164   :  { %1748 = vmatpush3.bf16.msra.mxu0 %v1187_v24 }
 0x167   :  { %1750 = vmatmul.mubr.bf16.vlgmr.msra.gmra.mrb[0].mxu0 %v1822_v30  ;;  %v1511_v30 = vld [vmem:[%s2385_s5 + $0x30] sm:$0xff] }
 0x171   :  { %v1261_v61 = vpop.permute.xlu1 %1260 }
 0x172   :  { %v1256_v27 = vpop.permute.xlu0 %1255 }
 0x175   :  { %v1266_v5 = vpop.permute.xlu1 %1265 }
 0x176   :  { %v1271_v2 = vpop.permute.xlu0 %1270 }
 0x236   :  { %v1671_v58 = vpop.f32.mrb[0].mxu1 }
 0x237   :  { %v754_v59 = vpop.f32.mrb[1].mxu1 }
 0x238   :  { %v1672_v60 = vpop.f32.mrb[2].mxu1 }
 0x239   :  { %v757_v37 = vpop.f32.mrb[3].mxu1 }
 0x23a   :  { %v1751_v39 = vpop.f32.mrb[0].mxu0 }
 0x23b   :  { %v1753_v62 = vadd.f32 %v1751_v39, %v1671_v58  ;;  %v1230_v40 = vpop.f32.mrb[1].mxu0 }
 0x23c   :  { %v1754_v63 = vadd.f32 %v1230_v40, %v754_v59  ;;  %v1752_v0 = vpop.f32.mrb[2].mxu0 }
 0x23d   :  { %v1755_v42 = vadd.f32 %v1752_v0, %v1672_v60  ;;  %v1233_v1 = vpop.f32.mrb[3].mxu0  ;;  %v1275_v7 = vadd.f32 %v1753_v62, %v1266_v5 }
 0x23e   :  { %v1273_v3 = vadd.f32 %v1754_v63, %v1256_v27  ;;  %v1756_v4 = vadd.f32 %v1233_v1, %v757_v37  ;;  %v1352_v27 = vld [vmem:[%s2385_s5 + $0x10] sm:$0xff]  ;;  %v1351_v63 = vld [vmem:[%s2385_s5 + $0x8] sm:$0xff] }
 0x23f   :  { %v1276_v44 = vadd.f32 %v1755_v42, %v1271_v2  ;;  %v1286_v10 = vmul.f32 %v1508_v41, %v1275_v7 }
 0x240   :  { %v1274_v43 = vadd.f32 %v1756_v4, %v1261_v61  ;;  %v1284_v6 = vmul.f32 %v1508_v41, %v1273_v3  ;;  %v1509_v4 = vld [vmem:[%s2385_s5 + $0x20] sm:$0xff] }
 0x241   :  { %v1287_v9 = vmul.f32 %v1508_v41, %v1276_v44 }
 0x242   :  { %1288 = vadd.xlane.f32.xlu1 %v1284_v6  ;;  %v1285_v8 = vmul.f32 %v1508_v41, %v1274_v43 }
 0x244   :  { %1290 = vadd.xlane.f32.xlu0 %v1285_v8  ;;  %v1353_v8 = vld [vmem:[%s2385_s5 + $0x18] sm:$0xff] }
 0x246   :  { %1294 = vadd.xlane.f32.xlu1 %v1287_v9 }
 0x248   :  { %1292 = vadd.xlane.f32.xlu0 %v1286_v10 }
 0x2cf   :  { %v1289_v11 = vpop.xlane.xlu1 %1288 }
 0x2d0   :  { %v1296_v12 = vmul.f32 0.0625, %v1289_v11  ;;  %v1407_v11 = vld [vmem:[#allocation2] sm:$0x1] }
 0x2d1   :  { %v1291_v13 = vpop.xlane.xlu0 %1290 }
 0x2d2   :  { %v1300_v45 = vsub.f32 %v1273_v3, %v1296_v12  ;;  %v1297_v46 = vmul.f32 0.0625, %v1291_v13  ;;  %v1510_v3 = vld [vmem:[%s2385_s5 + $0x28] sm:$0xff] }
 0x2d3   :  { %v1295_v14 = vpop.xlane.xlu1 %1294 }
 0x2d4   :  { %v1304_v15 = vmul.f32 %v1300_v45, %v1300_v45  ;;  %v1301_v16 = vsub.f32 %v1274_v43, %v1297_v46  ;;  %v1299_v17 = vmul.f32 0.0625, %v1295_v14 }
 0x2d5   :  { %v1293_v18 = vpop.xlane.xlu0 %1292 }
 0x2d6   :  { %v1305_v19 = vmul.f32 %v1301_v16, %v1301_v16  ;;  %v1303_v49 = vsub.f32 %v1276_v44, %v1299_v17  ;;  %v1298_v50 = vmul.f32 0.0625, %v1293_v18  ;;  %v1308_v20 = vmul.f32 %v1508_v41, %v1304_v15 }
 0x2d8   :  { %v1307_v21 = vmul.f32 %v1303_v49, %v1303_v49  ;;  %v1302_v22 = vsub.f32 %v1275_v7, %v1298_v50  ;;  %1312 = vadd.xlane.f32.xlu0 %v1308_v20  ;;  %v1309_v23 = vmul.f32 %v1508_v41, %v1305_v19  ;;  %v1512_v7 = vld [vmem:[%s2385_s5 + $0x38] sm:$0xff] }
 0x2da   :  { %v1306_v28 = vmul.f32 %v1302_v22, %v1302_v22  ;;  %1314 = vadd.xlane.f32.xlu1 %v1309_v23  ;;  %v1311_v29 = vmul.f32 %v1508_v41, %v1307_v21 }
 0x2dc   :  { %v1310_v31 = vmul.f32 %v1508_v41, %v1306_v28  ;;  %v1350_v41 = vld [vmem:[%s2385_s5] sm:$0xff]  ;;  %v1348_v28 = vlaneseq }
 0x2de   :  { %1318 = vadd.xlane.f32.xlu1 %v1311_v29  ;;  %1316 = vadd.xlane.f32.xlu0 %v1310_v31 }
 0x365   :  { %v1313_v32 = vpop.xlane.xlu0 %1312 }
 0x366   :  { %v1320_v33 = vmul.f32 0.0625, %v1313_v32 }
 0x367   :  { %v1315_v34 = vpop.xlane.xlu1 %1314 }
 0x368   :  { %v1324_v35 = vadd.f32 1e-05, %v1320_v33  ;;  %v1321_v25 = vmul.f32 0.0625, %v1315_v34  ;;  %v1349_v34 = vand.u32 127, %v1348_v28 }
 0x36a   :  { %v1325_v36 = vadd.f32 1e-05, %v1321_v25  ;;  %1823 = vrsqrt.f32 %v1324_v35  ;;  %v1414_v35 = vshrl.u32 %v1348_v28, 7  ;;  %vm1375_vm11 = vcmp.eq.s32.totalorder %v1349_v34, 0 }
 0x36b   :  { %v1319_v38 = vpop.xlane.xlu1 %1318  ;;  %v1317_v47 = vpop.xlane.xlu0 %1316  ;;  %vm1404_vm12 = vcmp.eq.s32.totalorder %v1349_v34, 1 }
 0x36c   :  { %v1322_v48 = vmul.f32 0.0625, %v1317_v47  ;;  %1825 = vrsqrt.f32 %v1325_v36  ;;  %v1323_v51 = vmul.f32 0.0625, %v1319_v38 }
 0x36e   :  { %v1326_v26 = vadd.f32 1e-05, %v1322_v48  ;;  %v1327_v52 = vadd.f32 1e-05, %v1323_v51  ;;  %v1415_v48 = vsub.s32 0, %v1414_v35 }
 0x370   :  { %1827 = vrsqrt.f32 %v1326_v26 }
 0x371   :  { %1829 = vrsqrt.f32 %v1327_v52 }
 0x374   :  { %v1824_v53 = vpop.eup %1823 }
 0x375   :  { %v1332_v55 = vmul.f32 %v1824_v53, %v1300_v45 }
 0x376   :  { %v1826_v54 = vpop.eup %1825 }
 0x377   :  { %v1333_v56 = vmul.f32 %v1826_v54, %v1301_v16  ;;  %v1340_v58 = vmul.f32 0.2, %v1332_v55  ;;  %vm1336_vm9 = vcmp.gt.f32.partialorder %v1332_v55, 0.0 }
 0x379   :  { %v1341_v60 = vmul.f32 0.2, %v1333_v56  ;;  %vm1337_vm8 = vcmp.gt.f32.partialorder %v1333_v56, 0.0  ;;  %v1344_v0 = vsel %vm1336_vm9, %v1332_v55, %v1340_v58 }
 0x37a   :  { %v1828_v57 = vpop.eup %1827  ;;  %v1354_v2 = vmul.f32 %v1350_v41, %v1344_v0  ;;  %v1383_v44 = vmul.f32 %v1509_v4, %v1344_v0 }
 0x37b   :  { %v1334_v24 = vmul.f32 %v1828_v57, %v1302_v22  ;;  %v1830_v61 = vpop.eup %1829  ;;  %v1345_v40 = vsel %vm1337_vm8, %v1333_v56, %v1341_v60 }
 0x37c   :  { %v1335_v42 = vmul.f32 %v1830_v61, %v1303_v49  ;;  %v1355_v1 = vmul.f32 %v1351_v63, %v1345_v40  ;;  %v1384_v43 = vmul.f32 %v1510_v3, %v1345_v40 }
 0x37d   :  { %vm1338_vm7 = vcmp.gt.f32.partialorder %v1334_v24, 0.0  ;;  %v1342_v59 = vmul.f32 0.2, %v1334_v24 }
 0x37e   :  { %v1343_v5 = vmul.f32 0.2, %v1335_v42  ;;  %vm1339_vm10 = vcmp.gt.f32.partialorder %v1335_v42, 0.0 }
 0x37f   :  { %v1346_v37 = vsel %vm1338_vm7, %v1334_v24, %v1342_v59 }
 0x380   :  { %v1385_v39 = vmul.f32 %v1511_v30, %v1346_v37  ;;  %v1356_v62 = vmul.f32 %v1352_v27, %v1346_v37  ;;  %v1347_v6 = vsel %vm1339_vm10, %v1335_v42, %v1343_v5 }
 0x381   :  { %v1386_v9 = vmul.f32 %v1512_v7, %v1347_v6  ;;  %v1357_v10 = vmul.f32 %v1353_v8, %v1347_v6 }
 0x382   :  { %1391 = vadd.xlane.f32.xlu1 %v1385_v39  ;;  %1362 = vadd.xlane.f32.xlu0 %v1356_v62 }
 0x386   :  { %1360 = vadd.xlane.f32.xlu1 %v1355_v1  ;;  %1358 = vadd.xlane.f32.xlu0 %v1354_v2 }
 0x38a   :  { %1389 = vadd.xlane.f32.xlu1 %v1384_v43  ;;  %1387 = vadd.xlane.f32.xlu0 %v1383_v44 }
 0x38e   :  { %1393 = vadd.xlane.f32.xlu1 %v1386_v9  ;;  %1364 = vadd.xlane.f32.xlu0 %v1357_v10 }
 0x3a4   :  { %1410 = vperm.xlu0 %1789, %v1407_v11  }
 0x40f   :  { %v1392_v12 = vpop.xlane.xlu1 %1391  ;;  %v1363_v13 = vpop.xlane.xlu0 %1362 }
 0x413   :  { %v1361_v45 = vpop.xlane.xlu1 %1360  ;;  %v1359_v46 = vpop.xlane.xlu0 %1358 }
 0x414   :  { %v1366_v14 = vadd.f32 %v1361_v45, %v1359_v46 }
 0x416   :  { %v1367_v19 = vadd.f32 %v1366_v14, %v1363_v13 }
 0x417   :  { %v1390_v15 = vpop.xlane.xlu1 %1389  ;;  %v1388_v16 = vpop.xlane.xlu0 %1387 }
 0x418   :  { %v1395_v17 = vadd.f32 %v1390_v15, %v1388_v16 }
 0x41a   :  { %v1396_v18 = vadd.f32 %v1395_v17, %v1392_v12 }
 0x41b   :  { %v1394_v49 = vpop.xlane.xlu1 %1393  ;;  %v1365_v50 = vpop.xlane.xlu0 %1364 }
 0x41c   :  { %v1397_v20 = vadd.f32 %v1396_v18, %v1394_v49  ;;  %v1368_v21 = vadd.f32 %v1367_v19, %v1365_v50 }
 0x41e   :  { %v1398_v22 = vrot.slane %v1397_v20, 4  ;;  %v1369_v23 = vrot.slane %v1368_v21, 4 }
 0x420   :  { %v1399_v29 = vadd.f32 %v1398_v22, %v1397_v20  ;;  %v1370_v31 = vadd.f32 %v1369_v23, %v1368_v21 }
 0x422   :  { %v1400_v32 = vrot.slane %v1399_v29, 2  ;;  %v1371_v33 = vrot.slane %v1370_v31, 2 }
 0x423   :  { %v1411_v52 = vpop.permute.xlu0 %1410 }
 0x424   :  { %v1401_v25 = vadd.f32 %v1400_v32, %v1399_v29  ;;  %v1372_v36 = vadd.f32 %v1371_v33, %v1370_v31  ;;  %v1416_v56 = vrot.slane %v1411_v52, %v1415_v48 }
 0x426   :  { %v1402_v38 = vrot.slane %v1401_v25, 1  ;;  %v1373_v47 = vrot.slane %v1372_v36, 1 }
 0x428   :  { %v1403_v51 = vadd.f32 %v1402_v38, %v1401_v25  ;;  %v1374_v26 = vadd.f32 %v1373_v47, %v1372_v36 }
 0x42a   :  { %v1376_v53 = vsel %vm1375_vm11, %v1374_v26, 0.0  ;;  %v1405_v54 = vsel %vm1404_vm12, %v1403_v51, 0.0 }
 0x42b   :  { %v1406_v55 = vadd.f32 %v1405_v54, %v1376_v53 }
 0x42d   :  { %v1417_v57 = vadd.f32 %v1416_v56, %v1406_v55 }
 0x42f   :  { %1418 = vst [vmem:[%s2387_s7] sm:$0x1] %v1417_v57 }

</bundles_post_ra>
